<compile_context>
chip_gen: v6e
topology: v6e:2x2x1
jax: 0.10.0
libtpu: 0.0.40
codegen_flags: <defaults>
</compile_context>

<pallas_src>
import math

import jax
import jax.numpy as jnp
from jax import lax
from jax.experimental import pallas as pl
from jax.experimental.pallas import tpu as pltpu

D_MODEL = 64
NHEAD = 1
NUM_LAYERS = 2
DIM_FF = 2048
OUT_DIM = 50
OUT_PAD = 128          # lane-dense output width (sliced back to OUT_DIM in wrapper)
QKV_PAD = 384          # Q at lanes [0:64), K at [128:192), V at [256:320)
EPS = 1e-5
ROWS_TARGET = 512      # rows per grid step (VMEM-safe on v5e/v6e/v7x with 48 MiB limit)
NEG_INF = -1e30


def _layer_norm(v, w, b):
    mu = jnp.mean(v, axis=-1, keepdims=True)
    var = jnp.mean((v - mu) ** 2, axis=-1, keepdims=True)
    return (v - mu) * lax.rsqrt(var + EPS) * w + b


def decoder_kernel(x_ref,
                   qkv_w_ref, qkv_b_ref,
                   l1_w_ref, l1_b_ref, l2_w_ref, l2_b_ref,
                   n1_w_ref, n1_b_ref, n2_w_ref, n2_b_ref,
                   fc_w_ref, fc_b_ref,
                   o_ref):
    s, bn, d = x_ref.shape
    rows = s * bn
    # Flatten (seq, batch_tile) -> rows.  Row r is (seq r // bn, batch r % bn);
    # every op below except attention is row-local, so the ordering is free.
    h = x_ref[...].astype(jnp.float32).reshape(rows, d)

    # Block-diagonal mask for the flattened attention (hoisted out of the
    # layer loop; skipped entirely when the tile holds a single batch element).
    if bn > 1:
        row_b = lax.broadcasted_iota(jnp.int32, (rows, rows), 0) % bn
        col_b = lax.broadcasted_iota(jnp.int32, (rows, rows), 1) % bn
        same_batch = row_b == col_b
    else:
        same_batch = None

    # Chunk the FFN 2048 dim when the (rows, FF) f32 intermediate would get
    # large (big S => bn=1, rows=S uncapped).  Static decision, no-op here.
    if rows > 1024:
        ff_chunk = 512
    elif rows > 512:
        ff_chunk = 1024
    else:
        ff_chunk = DIM_FF

    for l in range(NUM_LAYERS):          # static unroll over 2 encoder layers
        # --- fused QKV projection (one MXU pass, one bias add).
        #     1/sqrt(head_dim) pre-folded into Wq/bq; the MHA out-projection
        #     pre-folded into the V slab (exact: softmax rows sum to 1). ---
        qkv = jnp.dot(h.astype(jnp.bfloat16), qkv_w_ref[l],
                      preferred_element_type=jnp.float32) + qkv_b_ref[l]   # (rows, 384)
        q = qkv[:, 0:D_MODEL].astype(jnp.bfloat16)
        k = qkv[:, 128:128 + D_MODEL].astype(jnp.bfloat16)
        v = qkv[:, 256:256 + D_MODEL].astype(jnp.bfloat16)

        # --- flat block-diagonal self-attention: two dense (rows-wide) MXU
        #     passes + lane-dense softmax. ---
        sc = jnp.einsum('qd,kd->qk', q, k,
                        preferred_element_type=jnp.float32)                # (rows, rows)
        if same_batch is not None:
            sc = jnp.where(same_batch, sc, NEG_INF)
        sc = sc - jnp.max(sc, axis=-1, keepdims=True)
        p = jnp.exp(sc)
        p = p * pl.reciprocal(jnp.sum(p, axis=-1, keepdims=True), approx=True)
        attn = jnp.dot(p.astype(jnp.bfloat16), v,
                       preferred_element_type=jnp.float32)                 # (rows, D)

        h = _layer_norm(h + attn, n1_w_ref[l], n1_b_ref[l])

        # --- feed-forward (optionally chunked over the 2048 dim) ---
        ff = jnp.zeros((rows, D_MODEL), jnp.float32) + l2_b_ref[l]
        for c in range(0, DIM_FF, ff_chunk):
            part = jnp.dot(h.astype(jnp.bfloat16),
                           l1_w_ref[l, :, c:c + ff_chunk],
                           preferred_element_type=jnp.float32)
            part = jnp.maximum(part + l1_b_ref[l, :, c:c + ff_chunk], 0.0)
            ff = ff + jnp.dot(part.astype(jnp.bfloat16),
                              l2_w_ref[l, c:c + ff_chunk, :],
                              preferred_element_type=jnp.float32)

        h = _layer_norm(h + ff, n2_w_ref[l], n2_b_ref[l])

    # --- final projection, lane-dense (padded to OUT_PAD) ---
    out = jnp.dot(h.astype(jnp.bfloat16), fc_w_ref[...],
                  preferred_element_type=jnp.float32) + fc_b_ref[...]      # (rows, OUT_PAD)
    o_ref[...] = out.reshape(s, bn, OUT_PAD).astype(o_ref.dtype)


def _prepare_params(params):
    """Pre-transpose to (in, out) layout, fuse QKV (padded to 3x128 lanes),
    fold 1/sqrt(d) into Q and the out-projection into V, pad fc to OUT_PAD,
    cast matmul weights to bf16 (biases / LN params stay f32)."""
    (in_w, in_b, out_w, out_b, l1_w, l1_b, l2_w, l2_b,
     n1_w, n1_b, n2_w, n2_b, fc_w, fc_b) = params
    L, D = in_w.shape[0], D_MODEL
    bf16 = jnp.bfloat16
    scale = 1.0 / math.sqrt(D // NHEAD)

    wq_t = jnp.transpose(in_w[:, 0:D, :], (0, 2, 1)) * scale        # (L, D, D)
    wk_t = jnp.transpose(in_w[:, D:2 * D, :], (0, 2, 1))            # (L, D, D)
    wv_t = jnp.transpose(in_w[:, 2 * D:3 * D, :], (0, 2, 1))        # (L, D, D)
    wo_t = jnp.transpose(out_w, (0, 2, 1))                          # (L, D, D)
    wvo_t = jnp.einsum('lij,ljk->lik', wv_t, wo_t)                  # V folded with Wo
    bq = in_b[:, :, 0:D] * scale
    bk = in_b[:, :, D:2 * D]
    bvo = jnp.einsum('lij,ljk->lik', in_b[:, :, 2 * D:3 * D], wo_t) + out_b

    qkv_w = jnp.zeros((L, D, QKV_PAD), jnp.float32)
    qkv_w = qkv_w.at[:, :, 0:D].set(wq_t)
    qkv_w = qkv_w.at[:, :, 128:128 + D].set(wk_t)
    qkv_w = qkv_w.at[:, :, 256:256 + D].set(wvo_t)
    qkv_b = jnp.zeros((L, 1, QKV_PAD), jnp.float32)
    qkv_b = qkv_b.at[:, :, 0:D].set(bq)
    qkv_b = qkv_b.at[:, :, 128:128 + D].set(bk)
    qkv_b = qkv_b.at[:, :, 256:256 + D].set(bvo)

    l1_w_t = jnp.transpose(l1_w, (0, 2, 1)).astype(bf16)            # (L, D, FF)
    l2_w_t = jnp.transpose(l2_w, (0, 2, 1)).astype(bf16)            # (L, FF, D)
    fc_w_t = jnp.zeros((D, OUT_PAD), bf16).at[:, :OUT_DIM].set(fc_w.T.astype(bf16))
    fc_b_p = jnp.zeros((1, OUT_PAD), jnp.float32).at[:, :OUT_DIM].set(fc_b)

    return (qkv_w.astype(bf16), qkv_b,
            l1_w_t, l1_b.astype(jnp.float32), l2_w_t, l2_b.astype(jnp.float32),
            n1_w, n1_b, n2_w, n2_b,
            fc_w_t, fc_b_p)


def _pick_bn(N, S):
    """Batch-tile size: ~ROWS_TARGET rows per grid step, batch block 8-aligned
    when the batch is tiled, and >=2 grid steps on larger workloads so v7x
    megacore ("parallel" axis) can use both TensorCores."""
    bn = max(1, min(N, ROWS_TARGET // max(S, 1)))
    if N * S >= ROWS_TARGET and bn >= N and N > 1:
        bn = pl.cdiv(N, 2)
    if bn < N:
        bn8 = (bn // 8) * 8
        bn = bn8 if bn8 >= 8 else N     # keep the blocked 2nd-minor dim 8-aligned
    return bn


@jax.jit
def decoder_forward(x_snd, params):
    """x_snd: (S, N, D_MODEL) float32, matching PyTorch batch_first=False.
    Returns (S, N, 50)."""
    S, N, D = x_snd.shape
    assert D == D_MODEL
    prepped = _prepare_params(params)

    bn = _pick_bn(N, S)
    n_steps = pl.cdiv(N, bn)
    n_pad = n_steps * bn
    x = x_snd
    if n_pad != N:
        # Zero-pad the batch: padded rows stay finite, are masked out of the
        # block-diagonal attention, and are dropped from the output slice.
        x = jnp.pad(x, ((0, 0), (0, n_pad - N), (0, 0)))

    def const_spec(a):
        nd = a.ndim
        return pl.BlockSpec(a.shape, lambda b, _nd=nd: (0,) * _nd)
    # TODO(synk): weight operands could be single-buffered (pl.Buffered(1)) to
    # free ~1 MiB VMEM; left double-buffered for maximum compatibility.

    in_specs = [pl.BlockSpec((S, bn, D), lambda b: (0, b, 0))] + \
               [const_spec(p) for p in prepped]
    out_spec = pl.BlockSpec((S, bn, OUT_PAD), lambda b: (0, b, 0))

    out = pl.pallas_call(
        decoder_kernel,
        out_shape=jax.ShapeDtypeStruct((S, n_pad, OUT_PAD), x.dtype),
        grid_spec=pltpu.PrefetchScalarGridSpec(
            num_scalar_prefetch=0,
            grid=(n_steps,),
            in_specs=in_specs,
            out_specs=out_spec,
        ),
        compiler_params=pltpu.CompilerParams(
            dimension_semantics=("parallel",),
            vmem_limit_bytes=48 * 1024 * 1024),
    )(x, *prepped)

    return out[:, :N, :OUT_DIM]          # drop batch/lane padding -> (S, N, 50)


def decoder_reference(x_snd, params):
    """Pure-JAX f32 reference (PyTorch eval semantics) for validation."""
    (in_w, in_b, out_w, out_b, l1_w, l1_b, l2_w, l2_b,
     n1_w, n1_b, n2_w, n2_b, fc_w, fc_b) = params
    h = jnp.transpose(x_snd, (1, 0, 2))          # (N, S, D)
    scale = 1.0 / math.sqrt(D_MODEL // NHEAD)
    for l in range(NUM_LAYERS):
        qkv = h @ in_w[l].T + in_b[l]
        q, k, v = (qkv[..., :D_MODEL], qkv[..., D_MODEL:2 * D_MODEL],
                   qkv[..., 2 * D_MODEL:])
        s = jnp.einsum('bqd,bkd->bqk', q, k) * scale
        p = jax.nn.softmax(s, axis=-1)
        a = jnp.einsum('bqk,bkd->bqd', p, v) @ out_w[l].T + out_b[l]
        h = _layer_norm(h + a, n1_w[l], n1_b[l])
        ff = jnp.maximum(h @ l1_w[l].T + l1_b[l], 0.0) @ l2_w[l].T + l2_b[l]
        h = _layer_norm(h + ff, n2_w[l], n2_b[l])
    out = h @ fc_w.T + fc_b
    return jnp.transpose(out, (1, 0, 2))


def init_params(key):
    """Deterministic synthetic parameters with the shapes nn.TransformerEncoder
    + nn.Linear would have; per-layer tensors stacked on a leading axis."""
    keys = jax.random.split(key, 10)
    L = NUM_LAYERS

    def w(k, shape, scale=0.05):
        return jax.random.normal(k, shape, jnp.float32) * scale

    in_w = w(keys[0], (L, 3 * D_MODEL, D_MODEL))    # MHA in_proj_weight
    in_b = w(keys[1], (L, 1, 3 * D_MODEL))          # MHA in_proj_bias
    out_w = w(keys[2], (L, D_MODEL, D_MODEL))       # MHA out_proj.weight
    out_b = w(keys[3], (L, 1, D_MODEL))             # MHA out_proj.bias
    l1_w = w(keys[4], (L, DIM_FF, D_MODEL))         # linear1.weight
    l1_b = w(keys[5], (L, 1, DIM_FF))               # linear1.bias
    l2_w = w(keys[6], (L, D_MODEL, DIM_FF))         # linear2.weight
    l2_b = w(keys[7], (L, 1, D_MODEL))              # linear2.bias
    n1_w = jnp.ones((L, 1, D_MODEL), jnp.float32)   # norm1.weight
    n1_b = jnp.zeros((L, 1, D_MODEL), jnp.float32)  # norm1.bias
    n2_w = jnp.ones((L, 1, D_MODEL), jnp.float32)   # norm2.weight
    n2_b = jnp.zeros((L, 1, D_MODEL), jnp.float32)  # norm2.bias
    fc_w = w(keys[8], (OUT_DIM, D_MODEL))           # fc.weight
    fc_b = w(keys[9], (1, OUT_DIM))                 # fc.bias

    return (in_w, in_b, out_w, out_b,
            l1_w, l1_b, l2_w, l2_b,
            n1_w, n1_b, n2_w, n2_b,
            fc_w, fc_b)


if __name__ == "__main__":
    key = jax.random.PRNGKey(0)
    kx, kp = jax.random.split(key)

    S, N = 8, 2  # seq len, batch
    x = jax.random.normal(kx, (S, N, D_MODEL), jnp.float32)
    params = init_params(kp)

    y = decoder_forward(x, params)
    jax.block_until_ready(y)

    assert y.shape == (S, N, OUT_DIM), y.shape
    assert jnp.all(jnp.isfinite(y))

    # bf16 matmuls + folded weights + approx reciprocal -> small drift vs f32.
    y_ref = decoder_reference(x, params)
    assert jnp.allclose(y, y_ref, atol=5e-2, rtol=5e-2), \
        float(jnp.max(jnp.abs(y - y_ref)))

    print("KERNEL_OK")
</pallas_src>

<mosaic_0001>
module attributes {stable_mosaic.version = 11 : i64} {
  func.func @decoder_kernel(%arg0: i32, %arg1: memref<8x2x64xf32, #tpu.memory_space<vmem>>, %arg2: memref<2x64x384xbf16, #tpu.memory_space<vmem>>, %arg3: memref<2x1x384xf32, #tpu.memory_space<vmem>>, %arg4: memref<2x64x2048xbf16, #tpu.memory_space<vmem>>, %arg5: memref<2x1x2048xf32, #tpu.memory_space<vmem>>, %arg6: memref<2x2048x64xbf16, #tpu.memory_space<vmem>>, %arg7: memref<2x1x64xf32, #tpu.memory_space<vmem>>, %arg8: memref<2x1x64xf32, #tpu.memory_space<vmem>>, %arg9: memref<2x1x64xf32, #tpu.memory_space<vmem>>, %arg10: memref<2x1x64xf32, #tpu.memory_space<vmem>>, %arg11: memref<2x1x64xf32, #tpu.memory_space<vmem>>, %arg12: memref<64x128xbf16, #tpu.memory_space<vmem>>, %arg13: memref<1x128xf32, #tpu.memory_space<vmem>>, %arg14: memref<8x2x128xf32, #tpu.memory_space<vmem>>) attributes {dimension_semantics = [#tpu.dimension_semantics<parallel>], iteration_bounds = array<i64: 1>, scalar_prefetch = 0 : i64, scratch_operands = 0 : i64, tpu.core_type = #tpu.core_type<tc>, window_params = [{transform_indices = @transform_0, window_bounds = array<i64: 8, 2, 64>}, {pipeline_mode = #tpu.pipeline_mode<synchronous>, transform_indices = @transform_1, window_bounds = array<i64: 2, 64, 384>}, {pipeline_mode = #tpu.pipeline_mode<synchronous>, transform_indices = @transform_2, window_bounds = array<i64: 2, 1, 384>}, {pipeline_mode = #tpu.pipeline_mode<synchronous>, transform_indices = @transform_3, window_bounds = array<i64: 2, 64, 2048>}, {pipeline_mode = #tpu.pipeline_mode<synchronous>, transform_indices = @transform_4, window_bounds = array<i64: 2, 1, 2048>}, {pipeline_mode = #tpu.pipeline_mode<synchronous>, transform_indices = @transform_5, window_bounds = array<i64: 2, 2048, 64>}, {pipeline_mode = #tpu.pipeline_mode<synchronous>, transform_indices = @transform_6, window_bounds = array<i64: 2, 1, 64>}, {pipeline_mode = #tpu.pipeline_mode<synchronous>, transform_indices = @transform_7, window_bounds = array<i64: 2, 1, 64>}, {pipeline_mode = #tpu.pipeline_mode<synchronous>, transform_indices = @transform_8, window_bounds = array<i64: 2, 1, 64>}, {pipeline_mode = #tpu.pipeline_mode<synchronous>, transform_indices = @transform_9, window_bounds = array<i64: 2, 1, 64>}, {pipeline_mode = #tpu.pipeline_mode<synchronous>, transform_indices = @transform_10, window_bounds = array<i64: 2, 1, 64>}, {pipeline_mode = #tpu.pipeline_mode<synchronous>, transform_indices = @transform_11, window_bounds = array<i64: 64, 128>}, {pipeline_mode = #tpu.pipeline_mode<synchronous>, transform_indices = @transform_12, window_bounds = array<i64: 1, 128>}, {transform_indices = @transform_13, window_bounds = array<i64: 8, 2, 128>}]} {
    %c0 = arith.constant 0 : index
    %c0_0 = arith.constant 0 : index
    %c0_1 = arith.constant 0 : index
    %0 = vector.load %arg1[%c0, %c0_0, %c0_1] : memref<8x2x64xf32, #tpu.memory_space<vmem>>, vector<8x2x64xf32>
    %1 = vector.shape_cast %0 : vector<8x2x64xf32> to vector<16x64xf32>
    %2 = tpu.iota {dimensions = array<i32: 0>} : vector<16x16xi32>
    %c2_i32 = arith.constant 2 : i32
    %c0_i32 = arith.constant 0 : i32
    %3 = arith.cmpi eq, %c2_i32, %c0_i32 : i32
    %c1_i32 = arith.constant 1 : i32
    %4 = arith.select %3, %c1_i32, %c2_i32 : i32
    %5 = vector.broadcast %4 : i32 to vector<16x16xi32>
    %6 = arith.remsi %2, %5 : vector<16x16xi32>
    %c0_i32_2 = arith.constant 0 : i32
    %7 = vector.broadcast %c0_i32_2 : i32 to vector<16x16xi32>
    %8 = arith.cmpi ne, %6, %7 : vector<16x16xi32>
    %c0_i32_3 = arith.constant 0 : i32
    %9 = vector.broadcast %c0_i32_3 : i32 to vector<16x16xi32>
    %10 = arith.cmpi slt, %6, %9 : vector<16x16xi32>
    %c0_i32_4 = arith.constant 0 : i32
    %11 = arith.cmpi slt, %4, %c0_i32_4 : i32
    %12 = vector.broadcast %11 : i1 to vector<16x16xi1>
    %13 = vector.broadcast %12 : vector<16x16xi1> to vector<16x16xi1>
    %14 = arith.xori %10, %13 : vector<16x16xi1>
    %15 = arith.andi %14, %8 : vector<16x16xi1>
    %16 = vector.broadcast %4 : i32 to vector<16x16xi32>
    %17 = arith.addi %6, %16 : vector<16x16xi32>
    %18 = arith.select %15, %17, %6 : vector<16x16xi1>, vector<16x16xi32>
    %19 = tpu.iota {dimensions = array<i32: 1>} : vector<16x16xi32>
    %c2_i32_5 = arith.constant 2 : i32
    %c0_i32_6 = arith.constant 0 : i32
    %20 = arith.cmpi eq, %c2_i32_5, %c0_i32_6 : i32
    %c1_i32_7 = arith.constant 1 : i32
    %21 = arith.select %20, %c1_i32_7, %c2_i32_5 : i32
    %22 = vector.broadcast %21 : i32 to vector<16x16xi32>
    %23 = arith.remsi %19, %22 : vector<16x16xi32>
    %c0_i32_8 = arith.constant 0 : i32
    %24 = vector.broadcast %c0_i32_8 : i32 to vector<16x16xi32>
    %25 = arith.cmpi ne, %23, %24 : vector<16x16xi32>
    %c0_i32_9 = arith.constant 0 : i32
    %26 = vector.broadcast %c0_i32_9 : i32 to vector<16x16xi32>
    %27 = arith.cmpi slt, %23, %26 : vector<16x16xi32>
    %c0_i32_10 = arith.constant 0 : i32
    %28 = arith.cmpi slt, %21, %c0_i32_10 : i32
    %29 = vector.broadcast %28 : i1 to vector<16x16xi1>
    %30 = vector.broadcast %29 : vector<16x16xi1> to vector<16x16xi1>
    %31 = arith.xori %27, %30 : vector<16x16xi1>
    %32 = arith.andi %31, %25 : vector<16x16xi1>
    %33 = vector.broadcast %21 : i32 to vector<16x16xi32>
    %34 = arith.addi %23, %33 : vector<16x16xi32>
    %35 = arith.select %32, %34, %23 : vector<16x16xi1>, vector<16x16xi32>
    %36 = arith.cmpi eq, %18, %35 : vector<16x16xi32>
    %37 = arith.truncf %1 : vector<16x64xf32> to vector<16x64xbf16>
    %c0_11 = arith.constant 0 : index
    %c0_12 = arith.constant 0 : index
    %c0_13 = arith.constant 0 : index
    %38 = vector.load %arg2[%c0_11, %c0_12, %c0_13] : memref<2x64x384xbf16, #tpu.memory_space<vmem>>, vector<1x64x384xbf16>
    %39 = vector.shape_cast %38 : vector<1x64x384xbf16> to vector<64x384xbf16>
    %cst = arith.constant dense<0.000000e+00> : vector<16x384xf32>
    %40 = tpu.matmul %37, %39, %cst {dimension_numbers = #tpu.dot_dimension_numbers<[1], [0], [0], [1], [0, 0, 1, 1], [], []>} : vector<16x64xbf16>, vector<64x384xbf16>, vector<16x384xf32> -> vector<16x384xf32>
    %c0_14 = arith.constant 0 : index
    %c0_15 = arith.constant 0 : index
    %c0_16 = arith.constant 0 : index
    %41 = vector.load %arg3[%c0_14, %c0_15, %c0_16] : memref<2x1x384xf32, #tpu.memory_space<vmem>>, vector<1x1x384xf32>
    %42 = vector.shape_cast %41 : vector<1x1x384xf32> to vector<1x384xf32>
    %43 = vector.broadcast %42 : vector<1x384xf32> to vector<16x384xf32>
    %44 = arith.addf %40, %43 : vector<16x384xf32>
    %45 = vector.extract_strided_slice %44 {offsets = [0, 0], sizes = [16, 64], strides = [1, 1]} : vector<16x384xf32> to vector<16x64xf32>
    %46 = arith.truncf %45 : vector<16x64xf32> to vector<16x64xbf16>
    %47 = vector.extract_strided_slice %44 {offsets = [0, 128], sizes = [16, 64], strides = [1, 1]} : vector<16x384xf32> to vector<16x64xf32>
    %48 = arith.truncf %47 : vector<16x64xf32> to vector<16x64xbf16>
    %49 = vector.extract_strided_slice %44 {offsets = [0, 256], sizes = [16, 64], strides = [1, 1]} : vector<16x384xf32> to vector<16x64xf32>
    %50 = arith.truncf %49 : vector<16x64xf32> to vector<16x64xbf16>
    "tpu.trace_start"() <{level = 10 : i32, message = "qd,kd->qk"}> : () -> ()
    %cst_17 = arith.constant dense<0.000000e+00> : vector<16x16xf32>
    %51 = tpu.matmul %46, %48, %cst_17 {dimension_numbers = #tpu.dot_dimension_numbers<[1], [1], [0], [0], [0, 0, 1, 0], [], []>} : vector<16x64xbf16>, vector<16x64xbf16>, vector<16x16xf32> -> vector<16x16xf32>
    %cst_18 = arith.constant -1.000000e+30 : f32
    "tpu.trace_stop"() : () -> ()
    %52 = vector.broadcast %cst_18 : f32 to vector<16x16xf32>
    %53 = arith.select %36, %51, %52 : vector<16x16xi1>, vector<16x16xf32>
    %cst_19 = arith.constant dense<0xFF800000> : vector<16xf32>
    %54 = vector.multi_reduction <maximumf>, %53, %cst_19 [1] : vector<16x16xf32> to vector<16xf32>
    %55 = vector.shape_cast %54 : vector<16xf32> to vector<16x1xf32>
    %56 = vector.broadcast %55 : vector<16x1xf32> to vector<16x16xf32>
    %57 = arith.subf %53, %56 : vector<16x16xf32>
    %58 = math.exp %57 : vector<16x16xf32>
    %cst_20 = arith.constant dense<0.000000e+00> : vector<16xf32>
    %59 = vector.multi_reduction <add>, %58, %cst_20 [1] : vector<16x16xf32> to vector<16xf32>
    %60 = vector.shape_cast %59 : vector<16xf32> to vector<16x1xf32>
    %61 = tpu.reciprocal %60 {approx = true} : vector<16x1xf32> -> vector<16x1xf32>
    %62 = vector.broadcast %61 : vector<16x1xf32> to vector<16x16xf32>
    %63 = arith.mulf %58, %62 : vector<16x16xf32>
    %64 = arith.truncf %63 : vector<16x16xf32> to vector<16x16xbf16>
    %cst_21 = arith.constant dense<0.000000e+00> : vector<16x64xf32>
    %65 = tpu.matmul %64, %50, %cst_21 {dimension_numbers = #tpu.dot_dimension_numbers<[1], [0], [0], [1], [0, 0, 1, 1], [], []>} : vector<16x16xbf16>, vector<16x64xbf16>, vector<16x64xf32> -> vector<16x64xf32>
    %66 = arith.addf %1, %65 : vector<16x64xf32>
    %c0_22 = arith.constant 0 : index
    %c0_23 = arith.constant 0 : index
    %c0_24 = arith.constant 0 : index
    %67 = vector.load %arg8[%c0_22, %c0_23, %c0_24] : memref<2x1x64xf32, #tpu.memory_space<vmem>>, vector<1x1x64xf32>
    %68 = vector.shape_cast %67 : vector<1x1x64xf32> to vector<1x64xf32>
    %c0_25 = arith.constant 0 : index
    %c0_26 = arith.constant 0 : index
    %c0_27 = arith.constant 0 : index
    %69 = vector.load %arg9[%c0_25, %c0_26, %c0_27] : memref<2x1x64xf32, #tpu.memory_space<vmem>>, vector<1x1x64xf32>
    %70 = vector.shape_cast %69 : vector<1x1x64xf32> to vector<1x64xf32>
    %cst_28 = arith.constant dense<0.000000e+00> : vector<16xf32>
    %71 = vector.multi_reduction <add>, %66, %cst_28 [1] : vector<16x64xf32> to vector<16xf32>
    %72 = vector.shape_cast %71 : vector<16xf32> to vector<16x1xf32>
    %cst_29 = arith.constant 6.400000e+01 : f32
    %73 = vector.broadcast %cst_29 : f32 to vector<16x1xf32>
    %74 = arith.divf %72, %73 : vector<16x1xf32>
    %75 = vector.broadcast %74 : vector<16x1xf32> to vector<16x64xf32>
    %76 = arith.subf %66, %75 : vector<16x64xf32>
    %77 = arith.mulf %76, %76 : vector<16x64xf32>
    %cst_30 = arith.constant dense<0.000000e+00> : vector<16xf32>
    %78 = vector.multi_reduction <add>, %77, %cst_30 [1] : vector<16x64xf32> to vector<16xf32>
    %79 = vector.shape_cast %78 : vector<16xf32> to vector<16x1xf32>
    %cst_31 = arith.constant 6.400000e+01 : f32
    %80 = vector.broadcast %cst_31 : f32 to vector<16x1xf32>
    %81 = arith.divf %79, %80 : vector<16x1xf32>
    %82 = vector.broadcast %74 : vector<16x1xf32> to vector<16x64xf32>
    %83 = arith.subf %66, %82 : vector<16x64xf32>
    %cst_32 = arith.constant 9.99999974E-6 : f32
    %84 = vector.broadcast %cst_32 : f32 to vector<16x1xf32>
    %85 = arith.addf %81, %84 : vector<16x1xf32>
    %86 = math.rsqrt %85 : vector<16x1xf32>
    %87 = vector.broadcast %86 : vector<16x1xf32> to vector<16x64xf32>
    %88 = arith.mulf %83, %87 : vector<16x64xf32>
    %89 = vector.broadcast %68 : vector<1x64xf32> to vector<16x64xf32>
    %90 = arith.mulf %88, %89 : vector<16x64xf32>
    %91 = vector.broadcast %70 : vector<1x64xf32> to vector<16x64xf32>
    %92 = arith.addf %90, %91 : vector<16x64xf32>
    %cst_33 = arith.constant 0.000000e+00 : f32
    %93 = vector.broadcast %cst_33 : f32 to vector<16x64xf32>
    %c0_34 = arith.constant 0 : index
    %c0_35 = arith.constant 0 : index
    %c0_36 = arith.constant 0 : index
    %94 = vector.load %arg7[%c0_34, %c0_35, %c0_36] : memref<2x1x64xf32, #tpu.memory_space<vmem>>, vector<1x1x64xf32>
    %95 = vector.shape_cast %94 : vector<1x1x64xf32> to vector<1x64xf32>
    %96 = vector.broadcast %95 : vector<1x64xf32> to vector<16x64xf32>
    %97 = arith.addf %93, %96 : vector<16x64xf32>
    %98 = arith.truncf %92 : vector<16x64xf32> to vector<16x64xbf16>
    %c0_37 = arith.constant 0 : index
    %c0_38 = arith.constant 0 : index
    %c0_39 = arith.constant 0 : index
    %99 = vector.load %arg4[%c0_37, %c0_38, %c0_39] : memref<2x64x2048xbf16, #tpu.memory_space<vmem>>, vector<1x64x2048xbf16>
    %100 = vector.shape_cast %99 : vector<1x64x2048xbf16> to vector<64x2048xbf16>
    %cst_40 = arith.constant dense<0.000000e+00> : vector<16x2048xf32>
    %101 = tpu.matmul %98, %100, %cst_40 {dimension_numbers = #tpu.dot_dimension_numbers<[1], [0], [0], [1], [0, 0, 1, 1], [], []>} : vector<16x64xbf16>, vector<64x2048xbf16>, vector<16x2048xf32> -> vector<16x2048xf32>
    %c0_41 = arith.constant 0 : index
    %c0_42 = arith.constant 0 : index
    %c0_43 = arith.constant 0 : index
    %102 = vector.load %arg5[%c0_41, %c0_42, %c0_43] : memref<2x1x2048xf32, #tpu.memory_space<vmem>>, vector<1x1x2048xf32>
    %103 = vector.shape_cast %102 : vector<1x1x2048xf32> to vector<1x2048xf32>
    %104 = vector.broadcast %103 : vector<1x2048xf32> to vector<16x2048xf32>
    %105 = arith.addf %101, %104 : vector<16x2048xf32>
    %cst_44 = arith.constant 0.000000e+00 : f32
    %106 = vector.broadcast %cst_44 : f32 to vector<16x2048xf32>
    %107 = arith.maximumf %105, %106 : vector<16x2048xf32>
    %108 = arith.truncf %107 : vector<16x2048xf32> to vector<16x2048xbf16>
    %c0_45 = arith.constant 0 : index
    %c0_46 = arith.constant 0 : index
    %c0_47 = arith.constant 0 : index
    %109 = vector.load %arg6[%c0_45, %c0_46, %c0_47] : memref<2x2048x64xbf16, #tpu.memory_space<vmem>>, vector<1x2048x64xbf16>
    %110 = vector.shape_cast %109 : vector<1x2048x64xbf16> to vector<2048x64xbf16>
    %cst_48 = arith.constant dense<0.000000e+00> : vector<16x64xf32>
    %111 = tpu.matmul %108, %110, %cst_48 {dimension_numbers = #tpu.dot_dimension_numbers<[1], [0], [0], [1], [0, 0, 1, 1], [], []>} : vector<16x2048xbf16>, vector<2048x64xbf16>, vector<16x64xf32> -> vector<16x64xf32>
    %112 = arith.addf %97, %111 : vector<16x64xf32>
    %113 = arith.addf %92, %112 : vector<16x64xf32>
    %c0_49 = arith.constant 0 : index
    %c0_50 = arith.constant 0 : index
    %c0_51 = arith.constant 0 : index
    %114 = vector.load %arg10[%c0_49, %c0_50, %c0_51] : memref<2x1x64xf32, #tpu.memory_space<vmem>>, vector<1x1x64xf32>
    %115 = vector.shape_cast %114 : vector<1x1x64xf32> to vector<1x64xf32>
    %c0_52 = arith.constant 0 : index
    %c0_53 = arith.constant 0 : index
    %c0_54 = arith.constant 0 : index
    %116 = vector.load %arg11[%c0_52, %c0_53, %c0_54] : memref<2x1x64xf32, #tpu.memory_space<vmem>>, vector<1x1x64xf32>
    %117 = vector.shape_cast %116 : vector<1x1x64xf32> to vector<1x64xf32>
    %cst_55 = arith.constant dense<0.000000e+00> : vector<16xf32>
    %118 = vector.multi_reduction <add>, %113, %cst_55 [1] : vector<16x64xf32> to vector<16xf32>
    %119 = vector.shape_cast %118 : vector<16xf32> to vector<16x1xf32>
    %cst_56 = arith.constant 6.400000e+01 : f32
    %120 = vector.broadcast %cst_56 : f32 to vector<16x1xf32>
    %121 = arith.divf %119, %120 : vector<16x1xf32>
    %122 = vector.broadcast %121 : vector<16x1xf32> to vector<16x64xf32>
    %123 = arith.subf %113, %122 : vector<16x64xf32>
    %124 = arith.mulf %123, %123 : vector<16x64xf32>
    %cst_57 = arith.constant dense<0.000000e+00> : vector<16xf32>
    %125 = vector.multi_reduction <add>, %124, %cst_57 [1] : vector<16x64xf32> to vector<16xf32>
    %126 = vector.shape_cast %125 : vector<16xf32> to vector<16x1xf32>
    %cst_58 = arith.constant 6.400000e+01 : f32
    %127 = vector.broadcast %cst_58 : f32 to vector<16x1xf32>
    %128 = arith.divf %126, %127 : vector<16x1xf32>
    %129 = vector.broadcast %121 : vector<16x1xf32> to vector<16x64xf32>
    %130 = arith.subf %113, %129 : vector<16x64xf32>
    %cst_59 = arith.constant 9.99999974E-6 : f32
    %131 = vector.broadcast %cst_59 : f32 to vector<16x1xf32>
    %132 = arith.addf %128, %131 : vector<16x1xf32>
    %133 = math.rsqrt %132 : vector<16x1xf32>
    %134 = vector.broadcast %133 : vector<16x1xf32> to vector<16x64xf32>
    %135 = arith.mulf %130, %134 : vector<16x64xf32>
    %136 = vector.broadcast %115 : vector<1x64xf32> to vector<16x64xf32>
    %137 = arith.mulf %135, %136 : vector<16x64xf32>
    %138 = vector.broadcast %117 : vector<1x64xf32> to vector<16x64xf32>
    %139 = arith.addf %137, %138 : vector<16x64xf32>
    %140 = arith.truncf %139 : vector<16x64xf32> to vector<16x64xbf16>
    %c1 = arith.constant 1 : index
    %c0_60 = arith.constant 0 : index
    %c0_61 = arith.constant 0 : index
    %141 = vector.load %arg2[%c1, %c0_60, %c0_61] : memref<2x64x384xbf16, #tpu.memory_space<vmem>>, vector<1x64x384xbf16>
    %142 = vector.shape_cast %141 : vector<1x64x384xbf16> to vector<64x384xbf16>
    %cst_62 = arith.constant dense<0.000000e+00> : vector<16x384xf32>
    %143 = tpu.matmul %140, %142, %cst_62 {dimension_numbers = #tpu.dot_dimension_numbers<[1], [0], [0], [1], [0, 0, 1, 1], [], []>} : vector<16x64xbf16>, vector<64x384xbf16>, vector<16x384xf32> -> vector<16x384xf32>
    %c1_63 = arith.constant 1 : index
    %c0_64 = arith.constant 0 : index
    %c0_65 = arith.constant 0 : index
    %144 = vector.load %arg3[%c1_63, %c0_64, %c0_65] : memref<2x1x384xf32, #tpu.memory_space<vmem>>, vector<1x1x384xf32>
    %145 = vector.shape_cast %144 : vector<1x1x384xf32> to vector<1x384xf32>
    %146 = vector.broadcast %145 : vector<1x384xf32> to vector<16x384xf32>
    %147 = arith.addf %143, %146 : vector<16x384xf32>
    %148 = vector.extract_strided_slice %147 {offsets = [0, 0], sizes = [16, 64], strides = [1, 1]} : vector<16x384xf32> to vector<16x64xf32>
    %149 = arith.truncf %148 : vector<16x64xf32> to vector<16x64xbf16>
    %150 = vector.extract_strided_slice %147 {offsets = [0, 128], sizes = [16, 64], strides = [1, 1]} : vector<16x384xf32> to vector<16x64xf32>
    %151 = arith.truncf %150 : vector<16x64xf32> to vector<16x64xbf16>
    %152 = vector.extract_strided_slice %147 {offsets = [0, 256], sizes = [16, 64], strides = [1, 1]} : vector<16x384xf32> to vector<16x64xf32>
    %153 = arith.truncf %152 : vector<16x64xf32> to vector<16x64xbf16>
    "tpu.trace_start"() <{level = 10 : i32, message = "qd,kd->qk"}> : () -> ()
    %cst_66 = arith.constant dense<0.000000e+00> : vector<16x16xf32>
    %154 = tpu.matmul %149, %151, %cst_66 {dimension_numbers = #tpu.dot_dimension_numbers<[1], [1], [0], [0], [0, 0, 1, 0], [], []>} : vector<16x64xbf16>, vector<16x64xbf16>, vector<16x16xf32> -> vector<16x16xf32>
    %cst_67 = arith.constant -1.000000e+30 : f32
    "tpu.trace_stop"() : () -> ()
    %155 = vector.broadcast %cst_67 : f32 to vector<16x16xf32>
    %156 = arith.select %36, %154, %155 : vector<16x16xi1>, vector<16x16xf32>
    %cst_68 = arith.constant dense<0xFF800000> : vector<16xf32>
    %157 = vector.multi_reduction <maximumf>, %156, %cst_68 [1] : vector<16x16xf32> to vector<16xf32>
    %158 = vector.shape_cast %157 : vector<16xf32> to vector<16x1xf32>
    %159 = vector.broadcast %158 : vector<16x1xf32> to vector<16x16xf32>
    %160 = arith.subf %156, %159 : vector<16x16xf32>
    %161 = math.exp %160 : vector<16x16xf32>
    %cst_69 = arith.constant dense<0.000000e+00> : vector<16xf32>
    %162 = vector.multi_reduction <add>, %161, %cst_69 [1] : vector<16x16xf32> to vector<16xf32>
    %163 = vector.shape_cast %162 : vector<16xf32> to vector<16x1xf32>
    %164 = tpu.reciprocal %163 {approx = true} : vector<16x1xf32> -> vector<16x1xf32>
    %165 = vector.broadcast %164 : vector<16x1xf32> to vector<16x16xf32>
    %166 = arith.mulf %161, %165 : vector<16x16xf32>
    %167 = arith.truncf %166 : vector<16x16xf32> to vector<16x16xbf16>
    %cst_70 = arith.constant dense<0.000000e+00> : vector<16x64xf32>
    %168 = tpu.matmul %167, %153, %cst_70 {dimension_numbers = #tpu.dot_dimension_numbers<[1], [0], [0], [1], [0, 0, 1, 1], [], []>} : vector<16x16xbf16>, vector<16x64xbf16>, vector<16x64xf32> -> vector<16x64xf32>
    %169 = arith.addf %139, %168 : vector<16x64xf32>
    %c1_71 = arith.constant 1 : index
    %c0_72 = arith.constant 0 : index
    %c0_73 = arith.constant 0 : index
    %170 = vector.load %arg8[%c1_71, %c0_72, %c0_73] : memref<2x1x64xf32, #tpu.memory_space<vmem>>, vector<1x1x64xf32>
    %171 = vector.shape_cast %170 : vector<1x1x64xf32> to vector<1x64xf32>
    %c1_74 = arith.constant 1 : index
    %c0_75 = arith.constant 0 : index
    %c0_76 = arith.constant 0 : index
    %172 = vector.load %arg9[%c1_74, %c0_75, %c0_76] : memref<2x1x64xf32, #tpu.memory_space<vmem>>, vector<1x1x64xf32>
    %173 = vector.shape_cast %172 : vector<1x1x64xf32> to vector<1x64xf32>
    %cst_77 = arith.constant dense<0.000000e+00> : vector<16xf32>
    %174 = vector.multi_reduction <add>, %169, %cst_77 [1] : vector<16x64xf32> to vector<16xf32>
    %175 = vector.shape_cast %174 : vector<16xf32> to vector<16x1xf32>
    %cst_78 = arith.constant 6.400000e+01 : f32
    %176 = vector.broadcast %cst_78 : f32 to vector<16x1xf32>
    %177 = arith.divf %175, %176 : vector<16x1xf32>
    %178 = vector.broadcast %177 : vector<16x1xf32> to vector<16x64xf32>
    %179 = arith.subf %169, %178 : vector<16x64xf32>
    %180 = arith.mulf %179, %179 : vector<16x64xf32>
    %cst_79 = arith.constant dense<0.000000e+00> : vector<16xf32>
    %181 = vector.multi_reduction <add>, %180, %cst_79 [1] : vector<16x64xf32> to vector<16xf32>
    %182 = vector.shape_cast %181 : vector<16xf32> to vector<16x1xf32>
    %cst_80 = arith.constant 6.400000e+01 : f32
    %183 = vector.broadcast %cst_80 : f32 to vector<16x1xf32>
    %184 = arith.divf %182, %183 : vector<16x1xf32>
    %185 = vector.broadcast %177 : vector<16x1xf32> to vector<16x64xf32>
    %186 = arith.subf %169, %185 : vector<16x64xf32>
    %cst_81 = arith.constant 9.99999974E-6 : f32
    %187 = vector.broadcast %cst_81 : f32 to vector<16x1xf32>
    %188 = arith.addf %184, %187 : vector<16x1xf32>
    %189 = math.rsqrt %188 : vector<16x1xf32>
    %190 = vector.broadcast %189 : vector<16x1xf32> to vector<16x64xf32>
    %191 = arith.mulf %186, %190 : vector<16x64xf32>
    %192 = vector.broadcast %171 : vector<1x64xf32> to vector<16x64xf32>
    %193 = arith.mulf %191, %192 : vector<16x64xf32>
    %194 = vector.broadcast %173 : vector<1x64xf32> to vector<16x64xf32>
    %195 = arith.addf %193, %194 : vector<16x64xf32>
    %cst_82 = arith.constant 0.000000e+00 : f32
    %196 = vector.broadcast %cst_82 : f32 to vector<16x64xf32>
    %c1_83 = arith.constant 1 : index
    %c0_84 = arith.constant 0 : index
    %c0_85 = arith.constant 0 : index
    %197 = vector.load %arg7[%c1_83, %c0_84, %c0_85] : memref<2x1x64xf32, #tpu.memory_space<vmem>>, vector<1x1x64xf32>
    %198 = vector.shape_cast %197 : vector<1x1x64xf32> to vector<1x64xf32>
    %199 = vector.broadcast %198 : vector<1x64xf32> to vector<16x64xf32>
    %200 = arith.addf %196, %199 : vector<16x64xf32>
    %201 = arith.truncf %195 : vector<16x64xf32> to vector<16x64xbf16>
    %c1_86 = arith.constant 1 : index
    %c0_87 = arith.constant 0 : index
    %c0_88 = arith.constant 0 : index
    %202 = vector.load %arg4[%c1_86, %c0_87, %c0_88] : memref<2x64x2048xbf16, #tpu.memory_space<vmem>>, vector<1x64x2048xbf16>
    %203 = vector.shape_cast %202 : vector<1x64x2048xbf16> to vector<64x2048xbf16>
    %cst_89 = arith.constant dense<0.000000e+00> : vector<16x2048xf32>
    %204 = tpu.matmul %201, %203, %cst_89 {dimension_numbers = #tpu.dot_dimension_numbers<[1], [0], [0], [1], [0, 0, 1, 1], [], []>} : vector<16x64xbf16>, vector<64x2048xbf16>, vector<16x2048xf32> -> vector<16x2048xf32>
    %c1_90 = arith.constant 1 : index
    %c0_91 = arith.constant 0 : index
    %c0_92 = arith.constant 0 : index
    %205 = vector.load %arg5[%c1_90, %c0_91, %c0_92] : memref<2x1x2048xf32, #tpu.memory_space<vmem>>, vector<1x1x2048xf32>
    %206 = vector.shape_cast %205 : vector<1x1x2048xf32> to vector<1x2048xf32>
    %207 = vector.broadcast %206 : vector<1x2048xf32> to vector<16x2048xf32>
    %208 = arith.addf %204, %207 : vector<16x2048xf32>
    %cst_93 = arith.constant 0.000000e+00 : f32
    %209 = vector.broadcast %cst_93 : f32 to vector<16x2048xf32>
    %210 = arith.maximumf %208, %209 : vector<16x2048xf32>
    %211 = arith.truncf %210 : vector<16x2048xf32> to vector<16x2048xbf16>
    %c1_94 = arith.constant 1 : index
    %c0_95 = arith.constant 0 : index
    %c0_96 = arith.constant 0 : index
    %212 = vector.load %arg6[%c1_94, %c0_95, %c0_96] : memref<2x2048x64xbf16, #tpu.memory_space<vmem>>, vector<1x2048x64xbf16>
    %213 = vector.shape_cast %212 : vector<1x2048x64xbf16> to vector<2048x64xbf16>
    %cst_97 = arith.constant dense<0.000000e+00> : vector<16x64xf32>
    %214 = tpu.matmul %211, %213, %cst_97 {dimension_numbers = #tpu.dot_dimension_numbers<[1], [0], [0], [1], [0, 0, 1, 1], [], []>} : vector<16x2048xbf16>, vector<2048x64xbf16>, vector<16x64xf32> -> vector<16x64xf32>
    %215 = arith.addf %200, %214 : vector<16x64xf32>
    %216 = arith.addf %195, %215 : vector<16x64xf32>
    %c1_98 = arith.constant 1 : index
    %c0_99 = arith.constant 0 : index
    %c0_100 = arith.constant 0 : index
    %217 = vector.load %arg10[%c1_98, %c0_99, %c0_100] : memref<2x1x64xf32, #tpu.memory_space<vmem>>, vector<1x1x64xf32>
    %218 = vector.shape_cast %217 : vector<1x1x64xf32> to vector<1x64xf32>
    %c1_101 = arith.constant 1 : index
    %c0_102 = arith.constant 0 : index
    %c0_103 = arith.constant 0 : index
    %219 = vector.load %arg11[%c1_101, %c0_102, %c0_103] : memref<2x1x64xf32, #tpu.memory_space<vmem>>, vector<1x1x64xf32>
    %220 = vector.shape_cast %219 : vector<1x1x64xf32> to vector<1x64xf32>
    %cst_104 = arith.constant dense<0.000000e+00> : vector<16xf32>
    %221 = vector.multi_reduction <add>, %216, %cst_104 [1] : vector<16x64xf32> to vector<16xf32>
    %222 = vector.shape_cast %221 : vector<16xf32> to vector<16x1xf32>
    %cst_105 = arith.constant 6.400000e+01 : f32
    %223 = vector.broadcast %cst_105 : f32 to vector<16x1xf32>
    %224 = arith.divf %222, %223 : vector<16x1xf32>
    %225 = vector.broadcast %224 : vector<16x1xf32> to vector<16x64xf32>
    %226 = arith.subf %216, %225 : vector<16x64xf32>
    %227 = arith.mulf %226, %226 : vector<16x64xf32>
    %cst_106 = arith.constant dense<0.000000e+00> : vector<16xf32>
    %228 = vector.multi_reduction <add>, %227, %cst_106 [1] : vector<16x64xf32> to vector<16xf32>
    %229 = vector.shape_cast %228 : vector<16xf32> to vector<16x1xf32>
    %cst_107 = arith.constant 6.400000e+01 : f32
    %230 = vector.broadcast %cst_107 : f32 to vector<16x1xf32>
    %231 = arith.divf %229, %230 : vector<16x1xf32>
    %232 = vector.broadcast %224 : vector<16x1xf32> to vector<16x64xf32>
    %233 = arith.subf %216, %232 : vector<16x64xf32>
    %cst_108 = arith.constant 9.99999974E-6 : f32
    %234 = vector.broadcast %cst_108 : f32 to vector<16x1xf32>
    %235 = arith.addf %231, %234 : vector<16x1xf32>
    %236 = math.rsqrt %235 : vector<16x1xf32>
    %237 = vector.broadcast %236 : vector<16x1xf32> to vector<16x64xf32>
    %238 = arith.mulf %233, %237 : vector<16x64xf32>
    %239 = vector.broadcast %218 : vector<1x64xf32> to vector<16x64xf32>
    %240 = arith.mulf %238, %239 : vector<16x64xf32>
    %241 = vector.broadcast %220 : vector<1x64xf32> to vector<16x64xf32>
    %242 = arith.addf %240, %241 : vector<16x64xf32>
    %243 = arith.truncf %242 : vector<16x64xf32> to vector<16x64xbf16>
    %c0_109 = arith.constant 0 : index
    %c0_110 = arith.constant 0 : index
    %244 = vector.load %arg12[%c0_109, %c0_110] : memref<64x128xbf16, #tpu.memory_space<vmem>>, vector<64x128xbf16>
    %cst_111 = arith.constant dense<0.000000e+00> : vector<16x128xf32>
    %245 = tpu.matmul %243, %244, %cst_111 {dimension_numbers = #tpu.dot_dimension_numbers<[1], [0], [0], [1], [0, 0, 1, 1], [], []>} : vector<16x64xbf16>, vector<64x128xbf16>, vector<16x128xf32> -> vector<16x128xf32>
    %c0_112 = arith.constant 0 : index
    %c0_113 = arith.constant 0 : index
    %246 = vector.load %arg13[%c0_112, %c0_113] : memref<1x128xf32, #tpu.memory_space<vmem>>, vector<1x128xf32>
    %247 = vector.broadcast %246 : vector<1x128xf32> to vector<16x128xf32>
    %248 = arith.addf %245, %247 : vector<16x128xf32>
    %249 = vector.shape_cast %248 : vector<16x128xf32> to vector<8x2x128xf32>
    %c0_114 = arith.constant 0 : index
    %c0_115 = arith.constant 0 : index
    %c0_116 = arith.constant 0 : index
    %250 = vector.load %arg14[%c0_114, %c0_115, %c0_116] : memref<8x2x128xf32, #tpu.memory_space<vmem>>, vector<8x2x128xf32>
    tpu.vector_store %arg14[%c0_114, %c0_115, %c0_116], %249 {strides = array<i32>} : memref<8x2x128xf32, #tpu.memory_space<vmem>>, vector<8x2x128xf32>,
    return
  }
  func.func @transform_0(%arg0: i32) -> (i32, i32, i32) {
    %c0_i32 = arith.constant 0 : i32
    %c0_i32_0 = arith.constant 0 : i32
    %c0_i32_1 = arith.constant 0 : i32
    return %c0_i32, %arg0, %c0_i32_0 : i32, i32, i32
  }
  func.func @transform_1(%arg0: i32) -> (i32, i32, i32) {
    %c0_i32 = arith.constant 0 : i32
    %c0_i32_0 = arith.constant 0 : i32
    %c0_i32_1 = arith.constant 0 : i32
    %c0_i32_2 = arith.constant 0 : i32
    return %c0_i32, %c0_i32_0, %c0_i32_1 : i32, i32, i32
  }
  func.func @transform_2(%arg0: i32) -> (i32, i32, i32) {
    %c0_i32 = arith.constant 0 : i32
    %c0_i32_0 = arith.constant 0 : i32
    %c0_i32_1 = arith.constant 0 : i32
    %c0_i32_2 = arith.constant 0 : i32
    return %c0_i32, %c0_i32_0, %c0_i32_1 : i32, i32, i32
  }
  func.func @transform_3(%arg0: i32) -> (i32, i32, i32) {
    %c0_i32 = arith.constant 0 : i32
    %c0_i32_0 = arith.constant 0 : i32
    %c0_i32_1 = arith.constant 0 : i32
    %c0_i32_2 = arith.constant 0 : i32
    return %c0_i32, %c0_i32_0, %c0_i32_1 : i32, i32, i32
  }
  func.func @transform_4(%arg0: i32) -> (i32, i32, i32) {
    %c0_i32 = arith.constant 0 : i32
    %c0_i32_0 = arith.constant 0 : i32
    %c0_i32_1 = arith.constant 0 : i32
    %c0_i32_2 = arith.constant 0 : i32
    return %c0_i32, %c0_i32_0, %c0_i32_1 : i32, i32, i32
  }
  func.func @transform_5(%arg0: i32) -> (i32, i32, i32) {
    %c0_i32 = arith.constant 0 : i32
    %c0_i32_0 = arith.constant 0 : i32
    %c0_i32_1 = arith.constant 0 : i32
    %c0_i32_2 = arith.constant 0 : i32
    return %c0_i32, %c0_i32_0, %c0_i32_1 : i32, i32, i32
  }
  func.func @transform_6(%arg0: i32) -> (i32, i32, i32) {
    %c0_i32 = arith.constant 0 : i32
    %c0_i32_0 = arith.constant 0 : i32
    %c0_i32_1 = arith.constant 0 : i32
    %c0_i32_2 = arith.constant 0 : i32
    return %c0_i32, %c0_i32_0, %c0_i32_1 : i32, i32, i32
  }
  func.func @transform_7(%arg0: i32) -> (i32, i32, i32) {
    %c0_i32 = arith.constant 0 : i32
    %c0_i32_0 = arith.constant 0 : i32
    %c0_i32_1 = arith.constant 0 : i32
    %c0_i32_2 = arith.constant 0 : i32
    return %c0_i32, %c0_i32_0, %c0_i32_1 : i32, i32, i32
  }
  func.func @transform_8(%arg0: i32) -> (i32, i32, i32) {
    %c0_i32 = arith.constant 0 : i32
    %c0_i32_0 = arith.constant 0 : i32
    %c0_i32_1 = arith.constant 0 : i32
    %c0_i32_2 = arith.constant 0 : i32
    return %c0_i32, %c0_i32_0, %c0_i32_1 : i32, i32, i32
  }
  func.func @transform_9(%arg0: i32) -> (i32, i32, i32) {
    %c0_i32 = arith.constant 0 : i32
    %c0_i32_0 = arith.constant 0 : i32
    %c0_i32_1 = arith.constant 0 : i32
    %c0_i32_2 = arith.constant 0 : i32
    return %c0_i32, %c0_i32_0, %c0_i32_1 : i32, i32, i32
  }
  func.func @transform_10(%arg0: i32) -> (i32, i32, i32) {
    %c0_i32 = arith.constant 0 : i32
    %c0_i32_0 = arith.constant 0 : i32
    %c0_i32_1 = arith.constant 0 : i32
    %c0_i32_2 = arith.constant 0 : i32
    return %c0_i32, %c0_i32_0, %c0_i32_1 : i32, i32, i32
  }
  func.func @transform_11(%arg0: i32) -> (i32, i32) {
    %c0_i32 = arith.constant 0 : i32
    %c0_i32_0 = arith.constant 0 : i32
    %c0_i32_1 = arith.constant 0 : i32
    return %c0_i32, %c0_i32_0 : i32, i32
  }
  func.func @transform_12(%arg0: i32) -> (i32, i32) {
    %c0_i32 = arith.constant 0 : i32
    %c0_i32_0 = arith.constant 0 : i32
    %c0_i32_1 = arith.constant 0 : i32
    return %c0_i32, %c0_i32_0 : i32, i32
  }
  func.func @transform_13(%arg0: i32) -> (i32, i32, i32) {
    %c0_i32 = arith.constant 0 : i32
    %c0_i32_0 = arith.constant 0 : i32
    %c0_i32_1 = arith.constant 0 : i32
    return %c0_i32, %arg0, %c0_i32_0 : i32, i32, i32
  }
}

</mosaic_0001>

<bundles_post_ra>
// kernel: decoder_forward.1
= control target key start
LH: loop header
LB: loop body
LE: loop exit
PB: predicated region body
PF: predicated region fallthrough
CT: control target
= control target key end

     0   :  { %v54_v1 = vlaneseq  ;;  %v8682_v3 = vmov 0   ;;  %v8683_v6 = vmov 1983009808   ;;  %v8684_v11 = vmov 0.0   ;;  %s10871_s0 = inlined_call_operand.vmem [shape: f32[8,2,64], index: 0, kind: input, shape index: {}]   ;;  %s10872_s1 = inlined_call_operand.vmem [shape: bf16[2,64,384], index: 1, kind: input, shape index: {}]   ;;  %s10873_s2 = inlined_call_operand.vmem [shape: f32[2,1,384], index: 2, kind: input, shape index: {}]   ;;  %s10874_s3 = inlined_call_operand.vmem [shape: bf16[2,64,2048], index: 3, kind: input, shape index: {}]   ;;  %s10875_s4 = inlined_call_operand.vmem [shape: f32[2,1,2048], index: 4, kind: input, shape index: {}]   ;;  %s10876_s5 = inlined_call_operand.vmem [shape: bf16[2,2048,64], index: 5, kind: input, shape index: {}]   ;;  %s10877_s6 = inlined_call_operand.vmem [shape: f32[2,1,64], index: 6, kind: input, shape index: {}]   ;;  %s10878_s7 = inlined_call_operand.vmem [shape: f32[2,1,64], index: 7, kind: input, shape index: {}]   ;;  %s10879_s8 = inlined_call_operand.vmem [shape: f32[2,1,64], index: 8, kind: input, shape index: {}]   ;;  %s10880_s9 = inlined_call_operand.vmem [shape: f32[2,1,64], index: 9, kind: input, shape index: {}]   ;;  %s10881_s10 = inlined_call_operand.vmem [shape: f32[2,1,64], index: 10, kind: input, shape index: {}]   ;;  %s10882_s11 = inlined_call_operand.vmem [shape: bf16[64,128], index: 11, kind: input, shape index: {}]   ;;  %s10883_s12 = inlined_call_operand.vmem [shape: f32[1,128], index: 12, kind: input, shape index: {}]   ;;  %s10884_s13 = inlined_call_operand.hbm [shape: f32[8,2,128], index: 13, kind: output, shape index: {}]  }
   0x1   :  { %v8328_v0 = vld [vmem:[%s10872_s1 + $0x4c] ss:$12 sps:$4 sm:$0xff]   ;;  %v8330_v2 = vld [vmem:[%s10872_s1 + $0x48] ss:$12 sps:$4 sm:$0xff]   ;;  %275 = vmatprep.mubr.bf16.mxu0 %v8682_v3  ;;  %v108_v7 = vunpack.c.l.s4 %v8683_v6  ;;  %v8333_v8 = vld [vmem:[%s10872_s1 + $0x30] ss:$12 sps:$4 sm:$0xff]   ;;  %8257 = vmatprep.subr.bf16.mxu1 %v8684_v11 }
   0x2   :  { %251 = vmatprep.subr.bf16.mxu0 %v8328_v0  ;;  %v8331_v4 = vld [vmem:[%s10872_s1 + $0x34] ss:$12 sps:$4 sm:$0xff]   ;;  %v8774_v5 = vshrl.u32 %v54_v1, 7  ;;  %v8334_v9 = vld [vmem:[%s10872_s1 + $0x1c] ss:$12 sps:$4 sm:$0xff]   ;;  %vm239_vm0 = vcmask 523264  }
   0x3   :  { %252 = vmatpush1.bf16.msra.mxu0 %v8330_v2  ;;  %v109_v10 = vunpack.c.0.s8 %v108_v7  ;;  %v8336_v12 = vld [vmem:[%s10872_s1 + $0x18] ss:$12 sps:$4 sm:$0xff]   ;;  %v46_v13 = vld [vmem:[%s10871_s0] sm:$0x3]  ;;  %v47_v14 = vld [vmem:[%s10871_s0 + $0x2] sm:$0x3] }
   0x4   :  { %253 = vmatprep.subr.bf16.mxu0 %v8331_v4  ;;  %v8337_v15 = vld [vmem:[%s10872_s1 + $0x4] ss:$12 sps:$4 sm:$0xff]   ;;  %v50_v18 = vld [vmem:[%s10871_s0 + $0x8] sm:$0x3]  ;;  %v105_v19 = vcombine.low %v46_v13, %v47_v14  ;;  %v51_v21 = vld [vmem:[%s10871_s0 + $0xa] sm:$0x3] }
   0x5   :  { %v48_v16 = vld [vmem:[%s10871_s0 + $0x4] sm:$0x3]  ;;  %v49_v17 = vld [vmem:[%s10871_s0 + $0x6] sm:$0x3]  ;;  %v8805_v20 = vsub.s32 %v109_v10, %v8774_v5  ;;  %v52_v22 = vld [vmem:[%s10871_s0 + $0xc] sm:$0x3]  ;;  %v122_v26 = vcombine.low %v50_v18, %v51_v21 }
   0x6   :  { %v53_v23 = vld [vmem:[%s10871_s0 + $0xe] sm:$0x3]  ;;  %v106_v24 = vcombine.low %v48_v16, %v49_v17  ;;  %v8340_v28 = vld [vmem:[%s10872_s1 + $0x50] ss:$12 sps:$4 sm:$0xff]   ;;  %v8341_v32 = vld [vmem:[%s10872_s1 + $0x38] ss:$12 sps:$4 sm:$0xff]  }
   0x7   :  { %254 = vmatpush1.bf16.msra.mxu0 %v8333_v8  ;;  %v113_v25 = vrot.slane %v105_v19, %v8805_v20  ;;  %v123_v27 = vcombine.low %v52_v22, %v53_v23  ;;  %v130_v30 = vrot.slane %v122_v26, %v8805_v20  ;;  %8258 = vmatpush3.bf16.msra.mxu1 %v8340_v28  ;;  %v8339_v33 = vld [vmem:[%s10872_s1] ss:$12 sps:$4 sm:$0xff]   ;;  %v8343_v38 = vld [vmem:[%s10872_s1 + $0x8] ss:$12 sps:$4 sm:$0xff]   ;;  %vm8685_vm1 = vmmov 0  }
   0x8   :  { %255 = vmatprep.subr.bf16.mxu0 %v8334_v9  ;;  %v120_v29 = vrot.slane %v106_v24, %v8805_v20  ;;  %8259 = vmatprep.subr.bf16.mxu1 %v8684_v11  ;;  %v8342_v36 = vld [vmem:[%s10872_s1 + $0x20] ss:$12 sps:$4 sm:$0xff]  }
   0x9   :  { %v137_v31 = vrot.slane %v123_v27, %v8805_v20  ;;  %8265 = vmatprep.mubr.msk.bf16.mxu1 %vm8685_vm1, %v8684_v11 }
   0xa   :  { %v121_v34 = vcombine.low %v113_v25, %v120_v29 }
   0xb   :  { %256 = vmatpush1.bf16.msra.mxu0 %v8336_v12  ;;  %v138_v35 = vcombine.low %v130_v30, %v137_v31  ;;  %8260 = vmatpush3.bf16.msra.mxu1 %v8341_v32 }
   0xc   :  { %257 = vmatprep.subr.bf16.mxu0 %v8337_v15  ;;  %8261 = vmatprep.subr.bf16.mxu1 %v8684_v11 }
   0xd   :  { %v141_v37 = vpack.c.bf16 %v138_v35, %v121_v34 }
   0xf   :  { %258 = vmatpush1.bf16.msra.mxu0 %v8339_v33  ;;  %8262 = vmatpush3.bf16.msra.mxu1 %v8342_v36 }
  0x10   :  { %8263 = vmatprep.subr.bf16.mxu1 %v8684_v11 }
  0x12   :  { %7098 = vmatmul.mubr.msk.bf16.vlgmr.msra.gmra.mxu0 %vm239_vm0, %v141_v37 }
  0x13   :  { %1390 = vmatprep.mubr.bf16.mxu0 %v8682_v3  ;;  %8264 = vmatpush3.bf16.msra.mxu1 %v8343_v38 }
  0x14   :  { %8269 = vmatprep.subr.bf16.mxu1 %v8684_v11 }
  0x16   :  { %8266 = vmatmul.mubr.msk.bf16.vlgmr.msra.gmra.mxu1 %vm239_vm0, %v141_v37 }
  0x17   :  { %8271 = vmatprep.mubr.msk.bf16.mxu1 %vm8685_vm1, %v8684_v11 }
  0x18   :  { %18 = vsyncpa [#allocation3], 0  ;;  %v8847_v39 = vsub.s32 1, %v8774_v5  ;;  %v158_v41 = vld [vmem:[%s10873_s2] sm:$0x7]  ;;  %v8854_v46 = vsub.s32 0, %v8774_v5 }
  0x19   :  { %v8863_v55 = vsub.s32 2, %v8774_v5  ;;  %v82_v0 = vand.u32 127, %v54_v1  ;;  %v61_v2 = vand.u32 1, %v8774_v5  ;;  %v56_v6 = vadd.s32 8, %v8774_v5 }
  0x1a   :  { %v167_v43 = vrot.slane %v158_v41, %v8847_v39  ;;  %v163_v50 = vrot.slane %v158_v41, %v8854_v46  ;;  %vm379_vm3 = vcmask 130048  }
  0x1b   :  { %v171_v56 = vrot.slane %v158_v41, %v8863_v55  ;;  %v87_v4 = vand.u32 1, %v82_v0  ;;  %v68_v8 = vand.u32 1, %v56_v6  ;;  %v8658_v6 = vld [vmem:[%s10871_s0 + $0xc] sm:$0x3] }
  0x1d   :  { %vm8869_vm2 = vcmp.eq.s32.totalorder %v61_v2, %v87_v4  ;;  %vm8876_vm4 = vcmp.eq.s32.totalorder %v68_v8, %v87_v4  ;;  %v8657_v2 = vld [vmem:[%s10871_s0 + $0xa] sm:$0x3] }
  0xd2   :  { %v277_v40 = vpop.f32.mrf.mxu0 }
  0xd3   :  { %v278_v53 = vadd.f32 %v277_v40, %v163_v50 }
  0xd4   :  { %v279_v42 = vpop.f32.mrf.mxu0 }
  0xd5   :  { %v280_v47 = vadd.f32 %v279_v42, %v167_v43 }
  0xd6   :  { %v281_v44 = vpop.f32.mrf.mxu0  ;;  %v320_v57 = vpop.f32.mrf.mxu1 }
  0xd7   :  { %v282_v52 = vadd.f32 %v281_v44, %v163_v50  ;;  %v321_v59 = vadd.f32 %v320_v57, %v171_v56 }
  0xd8   :  { %v283_v45 = vpop.f32.mrf.mxu0  ;;  %v8267_v58 = vpop.f32.mrf.mxu1 }
  0xd9   :  { %v284_v48 = vadd.f32 %v283_v45, %v167_v43  ;;  %v327_v54 = vpack.c.bf16 %v282_v52, %v278_v53  ;;  %v8652_v45 = vld [vmem:[%s10871_s0] sm:$0x3]  ;;  %v8654_v53 = vld [vmem:[%s10871_s0 + $0x4] sm:$0x3] }
  0xda   :  { %v323_v60 = vpop.f32.mrf.mxu1 }
  0xdb   :  { %v328_v49 = vpack.c.bf16 %v284_v48, %v280_v47  ;;  %v324_v61 = vadd.f32 %v323_v60, %v171_v56  ;;  %v8653_v48 = vld [vmem:[%s10871_s0 + $0x2] sm:$0x3]  ;;  %v8655_v56 = vld [vmem:[%s10871_s0 + $0x6] sm:$0x3] }
  0xdc   :  { %v8268_v62 = vpop.f32.mrf.mxu1 }
  0xdd   :  { %v334_v51 = vsel %vm239_vm0, %v328_v49, 0  ;;  %v329_v63 = vpack.c.bf16 %v324_v61, %v321_v59 }
  0xde   :  { %8270 = vmatpush3.bf16.xpose.msra.mxu1 %v334_v51 }
  0xdf   :  { %8275 = vmatprep.subr.bf16.mxu1 %v8684_v11 }
  0xe5   :  { %8272 = vmatmul.mubr.msk.bf16.vlgmr.msra.gmra.mxu1 %vm239_vm0, %v327_v54 }
  0xe6   :  { %8277 = vmatprep.mubr.msk.bf16.mxu1 %vm8685_vm1, %v8684_v11  ;;  %8276 = vmatpush3.bf16.msra.mxu1 %v329_v63  ;;  %v8656_v63 = vld [vmem:[%s10871_s0 + $0x8] sm:$0x3] }
 0x1a5   :  { %v370_v9 = vpop.f32.mrf.mxu1 }
 0x1a6   :  { %v377_v10 = vsel %vm8869_vm2, %v370_v9, -1e+30  ;;  %v8659_v9 = vld [vmem:[%s10871_s0 + $0xe] sm:$0x3] }
 0x1a7   :  { %v8273_v12 = vpop.f32.mrf.mxu1  ;;  %v380_v13 = vsel %vm379_vm3, %v377_v10, -inf }
 0x1a8   :  { %381 = vmax.xlane.f32.xlu0 %v380_v13 }
 0x1a9   :  { %v373_v14 = vpop.f32.mrf.mxu1 }
 0x1aa   :  { %v378_v15 = vsel %vm8876_vm4, %v373_v14, -1e+30 }
 0x1ab   :  { %v8274_v16 = vpop.f32.mrf.mxu1  ;;  %v383_v17 = vsel %vm379_vm3, %v378_v15, -inf }
 0x1ac   :  { %384 = vmax.xlane.f32.xlu0 %v383_v17 }
 0x231   :  { %v382_v18 = vpop.xlane.xlu0 %381 }
 0x232   :  { %v386_v19 = vsub.f32 %v377_v10, %v382_v18 }
 0x234   :  { %v388_v21 = vmul.f32 1.442695, %v386_v19 }
 0x235   :  { %v385_v22 = vpop.xlane.xlu0 %384 }
 0x236   :  { %8620 = vpow2.f32 %v388_v21  ;;  %v387_v23 = vsub.f32 %v378_v15, %v385_v22 }
 0x238   :  { %v390_v24 = vmul.f32 1.442695, %v387_v23  ;;  %v8686_v23 = vmov 269488144  }
 0x23a   :  { %8622 = vpow2.f32 %v390_v24  ;;  %v557_v24 = vunpack.c.l.s4 %v8686_v23 }
 0x243   :  { %v8621_v25 = vpop.eup %8620 }
 0x244   :  { %v392_v26 = vsel %vm379_vm3, %v8621_v25, 0.0 }
 0x245   :  { %393 = vadd.xlane.f32.xlu1 %v392_v26 }
 0x247   :  { %v8623_v27 = vpop.eup %8622 }
 0x248   :  { %v395_v28 = vsel %vm379_vm3, %v8623_v27, 0.0 }
 0x249   :  { %396 = vadd.xlane.f32.xlu1 %v395_v28 }
 0x2ce   :  { %v394_v29 = vpop.xlane.xlu1 %393 }
 0x2cf   :  { %8624 = vrcp.f32 %v394_v29  ;;  %v8689_v29 = vmov 1987475062  }
 0x2d2   :  { %v397_v30 = vpop.xlane.xlu1 %396 }
 0x2d3   :  { %8626 = vrcp.f32 %v397_v30  ;;  %v578_v30 = vunpack.c.l.s4 %v8689_v29  ;;  %v944_v29 = vld [vmem:[%s10874_s3 + $0x1c8] sm:$0xff] }
 0x2dc   :  { %v8625_v31 = vpop.eup %8624 }
 0x2dd   :  { %v400_v33 = vmul.f32 %v8625_v31, %v8621_v25  ;;  %v8687_v25 = vmov 842150450   ;;  %v558_v31 = vunpack.c.0.s8 %v557_v24  ;;  %v935_v24 = vld [vmem:[%s10874_s3 + $0x180] sm:$0xff] }
 0x2de   :  { %v564_v26 = vunpack.c.l.s4 %v8687_v25  ;;  %v943_v25 = vld [vmem:[%s10874_s3 + $0x1c0] sm:$0xff] }
 0x2e0   :  { %v8627_v32 = vpop.eup %8626 }
 0x2e1   :  { %v401_v34 = vmul.f32 %v8627_v32, %v8623_v27  ;;  %v8688_v27 = vmov 1414812756   ;;  %v565_v32 = vunpack.c.0.s8 %v564_v26  ;;  %v936_v26 = vld [vmem:[%s10874_s3 + $0x188] sm:$0xff] }
 0x2e2   :  { %v571_v28 = vunpack.c.l.s4 %v8688_v27  ;;  %v7153_v27 = vcombine.low %v935_v24, %v943_v25 }
 0x2e3   :  { %v402_v35 = vpack.c.bf16 %v401_v34, %v400_v33  ;;  %v579_v34 = vunpack.c.0.s8 %v578_v30  ;;  %v919_v30 = vld [vmem:[%s10874_s3 + $0x100] sm:$0xff] }
 0x2e4   :  { %v572_v33 = vunpack.c.0.s8 %v571_v28  ;;  %v7154_v28 = vcombine.high %v935_v24, %v943_v25 }
 0x2e5   :  { %8278 = vmatmul.mubr.msk.bf16.vlgmr.msra.gmra.mxu1 %vm379_vm3, %v402_v35  ;;  %v8922_v35 = vsub.s32 %v558_v31, %v8774_v5  ;;  %v927_v31 = vld [vmem:[%s10874_s3 + $0x140] sm:$0xff] }
 0x2e6   :  { %1433 = vmatprep.mubr.bf16.mxu1 %v8682_v3  ;;  %1366 = vmatprep.subr.bf16.mxu0 %v7154_v28  ;;  %v7103_v28 = vld [vmem:[%s10879_s8] ss:$0 sm:$0xff] }
 0x2e7   :  { %1367 = vmatpush1.bf16.msra.mxu0 %v7153_v27  ;;  %v7102_v27 = vld [vmem:[%s10878_s7] ss:$0 sm:$0xff] }
 0x3a5   :  { %v440_v36 = vpop.f32.mrf.mxu1 }
 0x3a6   :  { %v449_v37 = vcombine.high %v440_v36, %v440_v36  ;;  %v456_v38 = vrot.slane %v440_v36, %v8805_v20  ;;  %v8925_v36 = vsub.s32 %v565_v32, %v8774_v5  ;;  %v7155_v32 = vcombine.low %v936_v26, %v944_v29 }
 0x3a7   :  { %v8279_v40 = vpop.f32.mrf.mxu1 }
 0x3a8   :  { %v463_v41 = vrot.slane %v449_v37, %v8805_v20  ;;  %v464_v42 = vcombine.high %v456_v38, %v456_v38  ;;  %v491_v47 = vadd.f32 %v8652_v45, %v456_v38  ;;  %v8928_v37 = vsub.s32 %v572_v33, %v8774_v5 }
 0x3a9   :  { %v443_v43 = vpop.f32.mrf.mxu1  ;;  %v8931_v38 = vsub.s32 %v579_v34, %v8774_v5  ;;  %v7156_v33 = vcombine.high %v936_v26, %v944_v29  ;;  %v7138_v34 = vcombine.high %v919_v30, %v927_v31  ;;  %v771_v29 = vcombine.high %v7102_v27, %v7102_v27 }
 0x3aa   :  { %v465_v44 = vcombine.high %v463_v41, %v463_v41  ;;  %v492_v49 = vadd.f32 %v8653_v48, %v464_v42  ;;  %v466_v50 = vcombine.high %v443_v43, %v443_v43  ;;  %v473_v51 = vrot.slane %v443_v43, %v8805_v20 }
 0x3ab   :  { %v8280_v52 = vpop.f32.mrf.mxu1  ;;  %v493_v54 = vadd.f32 %v8654_v53, %v463_v41  ;;  %1409 = vmatprep.subr.bf16.mxu1 %v7156_v33  ;;  %1368 = vmatprep.subr.bf16.mxu0 %v7138_v34  ;;  %v812_v33 = vrot.slane %v7103_v28, %v8805_v20 }
 0x3ac   :  { %v494_v57 = vadd.f32 %v8655_v56, %v465_v44  ;;  %v509_v58 = vcombine.low %v491_v47, %v492_v49  ;;  %v480_v59 = vrot.slane %v466_v50, %v8805_v20  ;;  %v481_v60 = vcombine.high %v473_v51, %v473_v51  ;;  %1410 = vmatpush1.bf16.msra.mxu1 %v7155_v32 }
 0x3ad   :  { %v495_v0 = vadd.f32 %v8656_v63, %v473_v51  ;;  %v785_v32 = vrot.slane %v771_v29, %v8805_v20 }
 0x3ae   :  { %v482_v61 = vcombine.high %v480_v59, %v480_v59  ;;  %v510_v62 = vcombine.low %v493_v54, %v494_v57  ;;  %v496_v4 = vadd.f32 %v8657_v2, %v481_v60  ;;  %v497_v8 = vadd.f32 %v8658_v6, %v480_v59 }
 0x3af   :  { %v517_v12 = vrot.slane %v509_v58, %v8805_v20 }
 0x3b0   :  { %v498_v10 = vadd.f32 %v8659_v9, %v482_v61  ;;  %v524_v13 = vrot.slane %v510_v62, %v8805_v20  ;;  %v526_v14 = vcombine.low %v495_v0, %v496_v4 }
 0x3b2   :  { %v525_v15 = vcombine.low %v517_v12, %v524_v13  ;;  %v527_v16 = vcombine.low %v497_v8, %v498_v10  ;;  %v534_v18 = vrot.slane %v526_v14, %v8805_v20 }
 0x3b4   :  { %v545_v17 = vsel %vm239_vm0, %v525_v15, 0.0  ;;  %v541_v19 = vrot.slane %v527_v16, %v8805_v20 }
 0x3b5   :  { %546 = vadd.xlane.f32.xlu0 %v545_v17 }
 0x3b6   :  { %v542_v21 = vcombine.low %v534_v18, %v541_v19 }
 0x3b8   :  { %v548_v22 = vsel %vm239_vm0, %v542_v21, 0.0 }
 0x3b9   :  { %549 = vadd.xlane.f32.xlu1 %v548_v22 }
 0x43e   :  { %v547_v40 = vpop.xlane.xlu0 %546 }
 0x43f   :  { %v552_v41 = vmul.f32 0.015625, %v547_v40  ;;  %v920_v40 = vld [vmem:[%s10874_s3 + $0x108] sm:$0xff] }
 0x441   :  { %v562_v42 = vrot.slane %v552_v41, %v8922_v35  ;;  %v569_v43 = vrot.slane %v552_v41, %v8925_v36  ;;  %v576_v44 = vrot.slane %v552_v41, %v8928_v37  ;;  %v583_v45 = vrot.slane %v552_v41, %v8931_v38  ;;  %v928_v41 = vld [vmem:[%s10874_s3 + $0x148] sm:$0xff] }
 0x442   :  { %v550_v48 = vpop.xlane.xlu1 %549 }
 0x443   :  { %v553_v50 = vmul.f32 0.015625, %v550_v48  ;;  %v8937_v51 = vsub.f32 %v491_v47, %v562_v42  ;;  %v8939_v52 = vsub.f32 %v492_v49, %v569_v43  ;;  %v8941_v53 = vsub.f32 %v493_v54, %v576_v44  ;;  %v903_v42 = vld [vmem:[%s10874_s3 + $0x80] sm:$0xff]  ;;  %v912_v48 = vld [vmem:[%s10874_s3 + $0xc8] sm:$0xff] }
 0x444   :  { %v8943_v56 = vsub.f32 %v494_v57, %v583_v45  ;;  %v7140_v43 = vcombine.high %v920_v40, %v928_v41  ;;  %v911_v44 = vld [vmem:[%s10874_s3 + $0xc0] sm:$0xff]  ;;  %v904_v45 = vld [vmem:[%s10874_s3 + $0x88] sm:$0xff] }
 0x445   :  { %v590_v58 = vrot.slane %v553_v50, %v8922_v35  ;;  %v597_v59 = vrot.slane %v553_v50, %v8925_v36  ;;  %v604_v60 = vrot.slane %v553_v50, %v8928_v37  ;;  %v611_v61 = vrot.slane %v553_v50, %v8931_v38 }
 0x446   :  { %v628_v62 = vmul.f32 %v8937_v51, %v8937_v51  ;;  %v629_v47 = vmul.f32 %v8939_v52, %v8939_v52  ;;  %v630_v49 = vmul.f32 %v8941_v53, %v8941_v53  ;;  %v631_v54 = vmul.f32 %v8943_v56, %v8943_v56  ;;  %1411 = vmatprep.subr.bf16.mxu1 %v7140_v43 }
 0x447   :  { %v8957_v57 = vsub.f32 %v495_v0, %v590_v58  ;;  %v8959_v63 = vsub.f32 %v496_v4, %v597_v59  ;;  %v8961_v2 = vsub.f32 %v497_v8, %v604_v60  ;;  %v8963_v6 = vsub.f32 %v498_v10, %v611_v61  ;;  %v887_v60 = vld [vmem:[%s10874_s3] sm:$0xff]  ;;  %v9021_v61 = vld [vmem:[%s10874_s3 + $0x190] sm:$0xff] }
 0x448   :  { %v644_v9 = vcombine.low %v628_v62, %v629_v47  ;;  %v645_v12 = vcombine.low %v630_v49, %v631_v54  ;;  %v7137_v50 = vcombine.low %v919_v30, %v927_v31  ;;  %v7139_v58 = vcombine.low %v920_v40, %v928_v41  ;;  %v9026_v62 = vld [vmem:[%s10874_s3 + $0x1d0] sm:$0xff]  ;;  %v895_v49 = vld [vmem:[%s10874_s3 + $0x40] sm:$0xff] }
 0x449   :  { %v632_v13 = vmul.f32 %v8957_v57, %v8957_v57  ;;  %v633_v14 = vmul.f32 %v8959_v63, %v8959_v63  ;;  %v634_v15 = vmul.f32 %v8961_v2, %v8961_v2  ;;  %v635_v0 = vmul.f32 %v8963_v6, %v8963_v6 }
 0x44a   :  { %v652_v4 = vrot.slane %v644_v9, %v8805_v20  ;;  %v659_v8 = vrot.slane %v645_v12, %v8805_v20  ;;  %v7122_v59 = vcombine.high %v903_v42, %v911_v44  ;;  %v7124_v47 = vcombine.high %v904_v45, %v912_v48  ;;  %v9036_v9 = vld [vmem:[%s10874_s3 + $0x198] sm:$0xff]  ;;  %1369 = vmatpush1.bf16.msra.mxu0 %v7137_v50 }
 0x44b   :  { %v661_v10 = vcombine.low %v632_v13, %v633_v14  ;;  %v662_v16 = vcombine.low %v634_v15, %v635_v0  ;;  %v7157_v54 = vcombine.low %v9021_v61, %v9026_v62  ;;  %v9041_v12 = vld [vmem:[%s10874_s3 + $0x1d8] sm:$0xff]  ;;  %v888_v13 = vld [vmem:[%s10874_s3 + $0x8] sm:$0xff]  ;;  %v7121_v0 = vcombine.low %v903_v42, %v911_v44  ;;  %1412 = vmatpush1.bf16.msra.mxu1 %v7139_v58 }
 0x44c   :  { %v660_v17 = vcombine.low %v652_v4, %v659_v8  ;;  %v896_v14 = vld [vmem:[%s10874_s3 + $0x48] sm:$0xff]  ;;  %v7159_v15 = vcombine.low %v9036_v9, %v9041_v12  ;;  %1370 = vmatprep.subr.bf16.mxu0 %v7122_v59  ;;  %v7123_v4 = vcombine.low %v904_v45, %v912_v48  ;;  %v7106_v8 = vcombine.high %v887_v60, %v895_v49 }
 0x44d   :  { %v669_v18 = vrot.slane %v661_v10, %v8805_v20  ;;  %v676_v19 = vrot.slane %v662_v16, %v8805_v20  ;;  %1413 = vmatprep.subr.bf16.mxu1 %v7124_v47  ;;  %v7108_v10 = vcombine.high %v888_v13, %v896_v14  ;;  %v7105_v16 = vcombine.low %v887_v60, %v895_v49 }
 0x44e   :  { %v680_v21 = vsel %vm239_vm0, %v660_v17, 0.0  ;;  %1371 = vmatpush1.bf16.msra.mxu0 %v7121_v0  ;;  %v7107_v17 = vcombine.low %v888_v13, %v896_v14  ;;  %v805_v30 = vcombine.high %v7103_v28, %v7103_v28  ;;  %v778_v31 = vrot.slane %v7102_v27, %v8805_v20 }
 0x44f   :  { %681 = vadd.xlane.f32.xlu0 %v680_v21  ;;  %v677_v22 = vcombine.low %v669_v18, %v676_v19  ;;  %1414 = vmatpush1.bf16.msra.mxu1 %v7123_v4  ;;  %v7158_v18 = vcombine.high %v9021_v61, %v9026_v62  ;;  %v7160_v19 = vcombine.high %v9036_v9, %v9041_v12  ;;  %v890_v61 = vld [vmem:[%s10874_s3 + $0x18] sm:$0xff] }
 0x450   :  { %1372 = vmatprep.subr.bf16.mxu0 %v7106_v8  ;;  %1415 = vmatprep.subr.bf16.mxu1 %v7108_v10  ;;  %v819_v34 = vrot.slane %v805_v30, %v8805_v20  ;;  %v786_v41 = vcombine.high %v778_v31, %v778_v31  ;;  %v787_v42 = vcombine.high %v785_v32, %v785_v32  ;;  %v898_v62 = vld [vmem:[%s10874_s3 + $0x58] sm:$0xff] }
 0x451   :  { %v683_v23 = vsel %vm239_vm0, %v677_v22, 0.0  ;;  %v820_v50 = vcombine.high %v812_v33, %v812_v33 }
 0x452   :  { %684 = vadd.xlane.f32.xlu1 %v683_v23  ;;  %1373 = vmatpush1.bf16.msra.mxu0 %v7105_v16  ;;  %v821_v58 = vcombine.high %v819_v34, %v819_v34 }
 0x453   :  { %1416 = vmatpush1.bf16.msra.mxu1 %v7107_v17  ;;  %1452 = vmatprep.subr.bf16.mxu0 %v7158_v18 }
 0x454   :  { %1495 = vmatprep.subr.bf16.mxu1 %v7160_v19 }
 0x4d8   :  { %v682_v21 = vpop.xlane.xlu0 %681 }
 0x4d9   :  { %v686_v22 = vmul.f32 0.015625, %v682_v21 }
 0x4db   :  { %v688_v23 = vadd.f32 1e-05, %v686_v22  ;;  %v685_v24 = vpop.xlane.xlu1 %684 }
 0x4dc   :  { %v687_v25 = vmul.f32 0.015625, %v685_v24 }
 0x4dd   :  { %8628 = vrsqrt.f32 %v688_v23 }
 0x4de   :  { %v689_v26 = vadd.f32 1e-05, %v687_v25 }
 0x4e0   :  { %8630 = vrsqrt.f32 %v689_v26 }
 0x4ea   :  { %v8629_v40 = vpop.eup %8628 }
 0x4eb   :  { %v700_v43 = vrot.slane %v8629_v40, %v8922_v35  ;;  %v707_v44 = vrot.slane %v8629_v40, %v8925_v36  ;;  %v714_v45 = vrot.slane %v8629_v40, %v8928_v37  ;;  %v721_v48 = vrot.slane %v8629_v40, %v8931_v38 }
 0x4ed   :  { %v8631_v59 = vpop.eup %8630  ;;  %v758_v60 = vmul.f32 %v700_v43, %v8937_v51  ;;  %v759_v47 = vmul.f32 %v707_v44, %v8939_v52  ;;  %v760_v49 = vmul.f32 %v714_v45, %v8941_v53  ;;  %v761_v13 = vmul.f32 %v721_v48, %v8943_v56  ;;  %v922_v43 = vld [vmem:[%s10874_s3 + $0x118] sm:$0xff] }
 0x4ee   :  { %v728_v14 = vrot.slane %v8631_v59, %v8922_v35  ;;  %v735_v0 = vrot.slane %v8631_v59, %v8925_v36  ;;  %v742_v4 = vrot.slane %v8631_v59, %v8928_v37  ;;  %v749_v8 = vrot.slane %v8631_v59, %v8931_v38  ;;  %v930_v44 = vld [vmem:[%s10874_s3 + $0x158] sm:$0xff] }
 0x4ef   :  { %v792_v10 = vmul.f32 %v778_v31, %v758_v60  ;;  %v793_v16 = vmul.f32 %v786_v41, %v759_v47  ;;  %v794_v17 = vmul.f32 %v785_v32, %v760_v49  ;;  %v795_v18 = vmul.f32 %v787_v42, %v761_v13  ;;  %v905_v60 = vld [vmem:[%s10874_s3 + $0x90] sm:$0xff]  ;;  %v906_v49 = vld [vmem:[%s10874_s3 + $0x98] sm:$0xff] }
 0x4f0   :  { %v762_v51 = vmul.f32 %v728_v14, %v8957_v57  ;;  %v763_v52 = vmul.f32 %v735_v0, %v8959_v63  ;;  %v764_v53 = vmul.f32 %v742_v4, %v8961_v2  ;;  %v765_v56 = vmul.f32 %v749_v8, %v8963_v6  ;;  %v913_v47 = vld [vmem:[%s10874_s3 + $0xd0] sm:$0xff]  ;;  %v914_v13 = vld [vmem:[%s10874_s3 + $0xd8] sm:$0xff] }
 0x4f1   :  { %v9081_v19 = vadd.f32 %v812_v33, %v792_v10  ;;  %v9083_v21 = vadd.f32 %v820_v50, %v793_v16  ;;  %v9085_v22 = vadd.f32 %v819_v34, %v794_v17  ;;  %v9087_v23 = vadd.f32 %v821_v58, %v795_v18  ;;  %v889_v10 = vld [vmem:[%s10874_s3 + $0x10] sm:$0xff]  ;;  %v939_v17 = vld [vmem:[%s10874_s3 + $0x1a0] sm:$0xff] }
 0x4f2   :  { %v796_v24 = vmul.f32 %v778_v31, %v762_v51  ;;  %v797_v25 = vmul.f32 %v786_v41, %v763_v52  ;;  %v798_v26 = vmul.f32 %v785_v32, %v764_v53  ;;  %v799_v27 = vmul.f32 %v787_v42, %v765_v56  ;;  %v929_v42 = vld [vmem:[%s10874_s3 + $0x150] sm:$0xff]  ;;  %v947_v18 = vld [vmem:[%s10874_s3 + $0x1e0] sm:$0xff]  ;;  %v940_v51 = vld [vmem:[%s10874_s3 + $0x1a8] sm:$0xff] }
 0x4f3   :  { %v850_v57 = vcombine.low %v9081_v19, %v9083_v21  ;;  %v851_v63 = vcombine.low %v9085_v22, %v9087_v23  ;;  %v7144_v59 = vcombine.high %v922_v43, %v930_v44  ;;  %v7143_v0 = vcombine.low %v922_v43, %v930_v44  ;;  %v897_v16 = vld [vmem:[%s10874_s3 + $0x50] sm:$0xff]  ;;  %v948_v52 = vld [vmem:[%s10874_s3 + $0x1e8] sm:$0xff] }
 0x4f4   :  { %v9093_v2 = vadd.f32 %v812_v33, %v796_v24  ;;  %v9095_v6 = vadd.f32 %v820_v50, %v797_v25  ;;  %v9097_v28 = vadd.f32 %v819_v34, %v798_v26  ;;  %v9099_v29 = vadd.f32 %v821_v58, %v799_v27  ;;  %v921_v34 = vld [vmem:[%s10874_s3 + $0x110] sm:$0xff]  ;;  %v923_v26 = vld [vmem:[%s10874_s3 + $0x120] sm:$0xff] }
 0x4f5   :  { %v858_v30 = vrot.slane %v850_v57, %v8805_v20  ;;  %v865_v31 = vrot.slane %v851_v63, %v8805_v20  ;;  %v7142_v58 = vcombine.high %v921_v34, %v929_v42  ;;  %v7141_v14 = vcombine.low %v921_v34, %v929_v42  ;;  %v931_v27 = vld [vmem:[%s10874_s3 + $0x160] sm:$0xff]  ;;  %v924_v57 = vld [vmem:[%s10874_s3 + $0x128] sm:$0xff] }
 0x4f6   :  { %v867_v32 = vcombine.low %v9093_v2, %v9095_v6  ;;  %v868_v40 = vcombine.low %v9097_v28, %v9099_v29  ;;  %v7126_v4 = vcombine.high %v905_v60, %v913_v47  ;;  %v7128_v8 = vcombine.high %v906_v49, %v914_v13  ;;  %v932_v63 = vld [vmem:[%s10874_s3 + $0x168] sm:$0xff] }
 0x4f7   :  { %v866_v45 = vcombine.low %v858_v30, %v865_v31  ;;  %v7127_v9 = vcombine.low %v906_v49, %v914_v13  ;;  %v7110_v12 = vcombine.high %v889_v10, %v897_v16  ;;  %v7109_v53 = vcombine.low %v889_v10, %v897_v16  ;;  %v908_v34 = vld [vmem:[%s10874_s3 + $0xa8] sm:$0xff]  ;;  %v942_v10 = vld [vmem:[%s10874_s3 + $0x1b8] sm:$0xff] }
 0x4f8   :  { %v875_v41 = vrot.slane %v867_v32, %v8805_v20  ;;  %v882_v33 = vrot.slane %v868_v40, %v8805_v20  ;;  %v7111_v56 = vcombine.low %v890_v61, %v898_v62  ;;  %v7162_v24 = vcombine.high %v939_v17, %v947_v18  ;;  %v916_v42 = vld [vmem:[%s10874_s3 + $0xe8] sm:$0xff]  ;;  %v950_v16 = vld [vmem:[%s10874_s3 + $0x1f8] sm:$0xff] }
 0x4f9   :  { %v7164_v25 = vcombine.high %v940_v51, %v948_v52  ;;  %v7161_v30 = vcombine.low %v939_v17, %v947_v18  ;;  %v7163_v31 = vcombine.low %v940_v51, %v948_v52  ;;  %v7146_v32 = vcombine.high %v923_v26, %v931_v27  ;;  %v926_v17 = vld [vmem:[%s10874_s3 + $0x138] sm:$0xff] }
 0x4fa   :  { %v883_v48 = vcombine.low %v875_v41, %v882_v33  ;;  %v7148_v40 = vcombine.high %v924_v57, %v932_v63  ;;  %v907_v41 = vld [vmem:[%s10874_s3 + $0xa0] sm:$0xff]  ;;  %v7145_v43 = vcombine.low %v923_v26, %v931_v27  ;;  %v7147_v44 = vcombine.low %v924_v57, %v932_v63  ;;  %v934_v18 = vld [vmem:[%s10874_s3 + $0x178] sm:$0xff] }
 0x4fb   :  { %v915_v33 = vld [vmem:[%s10874_s3 + $0xe0] sm:$0xff]  ;;  %v7131_v13 = vcombine.low %v908_v34, %v916_v42  ;;  %v7167_v52 = vcombine.low %v942_v10, %v950_v16  ;;  %v910_v26 = vld [vmem:[%s10874_s3 + $0xb8] sm:$0xff]  ;;  %v7151_v63 = vcombine.low %v926_v17, %v934_v18 }
 0x4fc   :  { %v9121_v50 = vpack.c.bf16 %v883_v48, %v866_v45  ;;  %v7130_v45 = vcombine.high %v907_v41, %v915_v33  ;;  %v7132_v48 = vcombine.high %v908_v34, %v916_v42  ;;  %v7129_v49 = vcombine.low %v907_v41, %v915_v33  ;;  %v918_v27 = vld [vmem:[%s10874_s3 + $0xf8] sm:$0xff] }
 0x4fd   :  { %v894_v41 = vld [vmem:[%s10874_s3 + $0x38] sm:$0xff]  ;;  %v7135_v42 = vcombine.low %v910_v26, %v918_v27 }
 0x4fe   :  { %7169 = vmatmul.mubr.msk.bf16.vlgmr.msra.gmra.mxu0 %vm239_vm0, %v9121_v50  ;;  %7170 = vmatmul.mubr.msk.bf16.vlgmr.msra.gmra.mxu1 %vm239_vm0, %v9121_v50  ;;  %v902_v33 = vld [vmem:[%s10874_s3 + $0x78] sm:$0xff] }
 0x4ff   :  { %1453 = vmatpush1.bf16.msra.mxu0 %v7157_v54  ;;  %1496 = vmatpush1.bf16.msra.mxu1 %v7159_v15  ;;  %v7125_v54 = vcombine.low %v905_v60, %v913_v47  ;;  %v7112_v15 = vcombine.high %v890_v61, %v898_v62  ;;  %v892_v60 = vld [vmem:[%s10874_s3 + $0x28] sm:$0xff] }
 0x500   :  { %1454 = vmatprep.subr.bf16.mxu0 %v7142_v58  ;;  %1497 = vmatprep.subr.bf16.mxu1 %v7144_v59  ;;  %v891_v58 = vld [vmem:[%s10874_s3 + $0x20] sm:$0xff]  ;;  %v900_v47 = vld [vmem:[%s10874_s3 + $0x68] sm:$0xff] }
 0x501   :  { %1476 = vmatprep.mubr.bf16.mxu0 %v8682_v3  ;;  %1519 = vmatprep.mubr.bf16.mxu1 %v8682_v3  ;;  %v899_v59 = vld [vmem:[%s10874_s3 + $0x60] sm:$0xff]  ;;  %v7115_v62 = vcombine.low %v892_v60, %v900_v47 }
 0x502   :  { %v7113_v61 = vcombine.low %v891_v58, %v899_v59 }
 0x503   :  { %1455 = vmatpush1.bf16.msra.mxu0 %v7141_v14  ;;  %1498 = vmatpush1.bf16.msra.mxu1 %v7143_v0  ;;  %v7114_v14 = vcombine.high %v891_v58, %v899_v59  ;;  %v7116_v0 = vcombine.high %v892_v60, %v900_v47  ;;  %v8344_v58 = vld [vmem:[%s10876_s5 + $0x78] sm:$0xff]  }
 0x504   :  { %1456 = vmatprep.subr.bf16.mxu0 %v7126_v4  ;;  %1499 = vmatprep.subr.bf16.mxu1 %v7128_v8  ;;  %v941_v4 = vld [vmem:[%s10874_s3 + $0x1b0] sm:$0xff]  ;;  %v8345_v59 = vld [vmem:[%s10876_s5 + $0xf8] sm:$0xff]  }
 0x505   :  { %v949_v8 = vld [vmem:[%s10874_s3 + $0x1f0] sm:$0xff]  ;;  %v8346_v60 = vld [vmem:[%s10876_s5 + $0x38] sm:$0xff]  }
 0x506   :  { %v7165_v51 = vcombine.low %v941_v4, %v949_v8  ;;  %v8347_v47 = vld [vmem:[%s10876_s5 + $0xb8] sm:$0xff]  }
 0x507   :  { %1457 = vmatpush1.bf16.msra.mxu0 %v7125_v54  ;;  %1500 = vmatpush1.bf16.msra.mxu1 %v7127_v9  ;;  %v7166_v54 = vcombine.high %v941_v4, %v949_v8  ;;  %v7168_v9 = vcombine.high %v942_v10, %v950_v16  ;;  %v8352_v4 = vld [vmem:[%s10876_s5 + $0x68] sm:$0xff]   ;;  %v8356_v16 = vld [vmem:[%s10876_s5 + $0x60] sm:$0xff]  }
 0x508   :  { %1458 = vmatprep.subr.bf16.mxu0 %v7110_v12  ;;  %1501 = vmatprep.subr.bf16.mxu1 %v7112_v15  ;;  %v925_v12 = vld [vmem:[%s10874_s3 + $0x130] sm:$0xff]  ;;  %v8354_v8 = vld [vmem:[%s10876_s5 + $0x28] sm:$0xff]  }
 0x509   :  { %v933_v15 = vld [vmem:[%s10874_s3 + $0x170] sm:$0xff]  ;;  %v8355_v10 = vld [vmem:[%s10876_s5 + $0xa8] sm:$0xff]  }
 0x50a   :  { %v7149_v57 = vcombine.low %v925_v12, %v933_v15 }
 0x50b   :  { %1459 = vmatpush1.bf16.msra.mxu0 %v7109_v53  ;;  %1502 = vmatpush1.bf16.msra.mxu1 %v7111_v56  ;;  %v7150_v53 = vcombine.high %v925_v12, %v933_v15  ;;  %v7152_v56 = vcombine.high %v926_v17, %v934_v18  ;;  %v8361_v12 = vld [vmem:[%s10876_s5 + $0xd8] sm:$0xff]   ;;  %v8364_v18 = vld [vmem:[%s10876_s5 + $0x50] sm:$0xff]  }
 0x50c   :  { %1538 = vmatprep.subr.bf16.mxu0 %v7162_v24  ;;  %1581 = vmatprep.subr.bf16.mxu1 %v7164_v25  ;;  %v909_v24 = vld [vmem:[%s10874_s3 + $0xb0] sm:$0xff]  ;;  %v8362_v15 = vld [vmem:[%s10876_s5 + $0x18] sm:$0xff]  }
 0x50d   :  { %v917_v25 = vld [vmem:[%s10874_s3 + $0xf0] sm:$0xff]  ;;  %v8363_v17 = vld [vmem:[%s10876_s5 + $0x98] sm:$0xff]  }
 0x50e   :  { %7171 = vmatmul.mubr.msk.bf16.vlgmr.msra.gmra.mxu0 %vm239_vm0, %v9121_v50  ;;  %7172 = vmatmul.mubr.msk.bf16.vlgmr.msra.gmra.mxu1 %vm239_vm0, %v9121_v50  ;;  %v7133_v34 = vcombine.low %v909_v24, %v917_v25 }
 0x50f   :  { %1539 = vmatpush1.bf16.msra.mxu0 %v7161_v30  ;;  %1582 = vmatpush1.bf16.msra.mxu1 %v7163_v31  ;;  %v7134_v30 = vcombine.high %v909_v24, %v917_v25  ;;  %v7136_v31 = vcombine.high %v910_v26, %v918_v27  ;;  %v8369_v24 = vld [vmem:[%s10876_s5 + $0xc8] sm:$0xff]   ;;  %v8372_v27 = vld [vmem:[%s10876_s5 + $0x40] sm:$0xff]  }
 0x510   :  { %1540 = vmatprep.subr.bf16.mxu0 %v7146_v32  ;;  %1583 = vmatprep.subr.bf16.mxu1 %v7148_v40  ;;  %v893_v32 = vld [vmem:[%s10874_s3 + $0x30] sm:$0xff]  ;;  %v8370_v25 = vld [vmem:[%s10876_s5 + $0x8] sm:$0xff]  }
 0x511   :  { %1562 = vmatprep.mubr.bf16.mxu0 %v8682_v3  ;;  %1605 = vmatprep.mubr.bf16.mxu1 %v8682_v3  ;;  %v901_v40 = vld [vmem:[%s10874_s3 + $0x70] sm:$0xff]  ;;  %v8371_v26 = vld [vmem:[%s10876_s5 + $0x88] sm:$0xff]  }
 0x513   :  { %1541 = vmatpush1.bf16.msra.mxu0 %v7145_v43  ;;  %1584 = vmatpush1.bf16.msra.mxu1 %v7147_v44  ;;  %v7118_v43 = vcombine.high %v893_v32, %v901_v40  ;;  %v7120_v44 = vcombine.high %v894_v41, %v902_v33 }
 0x514   :  { %1542 = vmatprep.subr.bf16.mxu0 %v7130_v45  ;;  %1585 = vmatprep.subr.bf16.mxu1 %v7132_v48  ;;  %v7117_v45 = vcombine.low %v893_v32, %v901_v40  ;;  %v7119_v48 = vcombine.low %v894_v41, %v902_v33  ;;  %v8377_v32 = vld [vmem:[%s10876_s5 + $0x1f8] sm:$0xff]   ;;  %v9374_v40 = vsub.s32 3, %v8774_v5  ;;  %v9379_v41 = vld [vmem:[%s10875_s4] sm:$0xff] }
 0x517   :  { %1543 = vmatpush1.bf16.msra.mxu0 %v7129_v49  ;;  %1586 = vmatpush1.bf16.msra.mxu1 %v7131_v13  ;;  %v8348_v49 = vld [vmem:[%s10876_s5 + $0x70] sm:$0xff]  }
 0x518   :  { %1544 = vmatprep.subr.bf16.mxu0 %v7114_v14  ;;  %1587 = vmatprep.subr.bf16.mxu1 %v7116_v0  ;;  %v8349_v13 = vld [vmem:[%s10876_s5 + $0xf0] sm:$0xff]  }
 0x519   :  { %v8350_v14 = vld [vmem:[%s10876_s5 + $0x30] sm:$0xff]  }
 0x51a   :  { %v8351_v0 = vld [vmem:[%s10876_s5 + $0xb0] sm:$0xff]  }
 0x51b   :  { %1545 = vmatpush1.bf16.msra.mxu0 %v7113_v61  ;;  %1588 = vmatpush1.bf16.msra.mxu1 %v7115_v62  ;;  %v8357_v61 = vld [vmem:[%s10876_s5 + $0xe0] sm:$0xff]  }
 0x51c   :  { %1624 = vmatprep.subr.bf16.mxu0 %v7166_v54  ;;  %1667 = vmatprep.subr.bf16.mxu1 %v7168_v9  ;;  %v8358_v62 = vld [vmem:[%s10876_s5 + $0x20] sm:$0xff]   ;;  %v8360_v9 = vld [vmem:[%s10876_s5 + $0x58] sm:$0xff]  }
 0x51d   :  { %v8359_v54 = vld [vmem:[%s10876_s5 + $0xa0] sm:$0xff]  }
 0x51e   :  { %7173 = vmatmul.mubr.msk.bf16.vlgmr.msra.gmra.mxu0 %vm239_vm0, %v9121_v50  ;;  %7174 = vmatmul.mubr.msk.bf16.vlgmr.msra.gmra.mxu1 %vm239_vm0, %v9121_v50 }
 0x51f   :  { %1625 = vmatpush1.bf16.msra.mxu0 %v7165_v51  ;;  %1668 = vmatpush1.bf16.msra.mxu1 %v7167_v52  ;;  %v8365_v51 = vld [vmem:[%s10876_s5 + $0xd0] sm:$0xff]  }
 0x520   :  { %1626 = vmatprep.subr.bf16.mxu0 %v7150_v53  ;;  %1669 = vmatprep.subr.bf16.mxu1 %v7152_v56  ;;  %v8366_v52 = vld [vmem:[%s10876_s5 + $0x10] sm:$0xff]   ;;  %v8368_v56 = vld [vmem:[%s10876_s5 + $0x48] sm:$0xff]  }
 0x521   :  { %1648 = vmatprep.mubr.bf16.mxu0 %v8682_v3  ;;  %1691 = vmatprep.mubr.bf16.mxu1 %v8682_v3  ;;  %v8367_v53 = vld [vmem:[%s10876_s5 + $0x90] sm:$0xff]  }
 0x523   :  { %1627 = vmatpush1.bf16.msra.mxu0 %v7149_v57  ;;  %1670 = vmatpush1.bf16.msra.mxu1 %v7151_v63  ;;  %v8373_v57 = vld [vmem:[%s10876_s5 + $0xc0] sm:$0xff]  }
 0x524   :  { %1628 = vmatprep.subr.bf16.mxu0 %v7134_v30  ;;  %1671 = vmatprep.subr.bf16.mxu1 %v7136_v31  ;;  %v8374_v63 = vld [vmem:[%s10876_s5] sm:$0xff]   ;;  %v8376_v31 = vld [vmem:[%s10876_s5 + $0x178] sm:$0xff]  }
 0x525   :  { %v8375_v30 = vld [vmem:[%s10876_s5 + $0x80] sm:$0xff]  }
 0x527   :  { %1629 = vmatpush1.bf16.msra.mxu0 %v7133_v34  ;;  %1672 = vmatpush1.bf16.msra.mxu1 %v7135_v42  ;;  %v962_v42 = vrot.slane %v9379_v41, %v8847_v39 }
 0x528   :  { %1630 = vmatprep.subr.bf16.mxu0 %v7118_v43  ;;  %1673 = vmatprep.subr.bf16.mxu1 %v7120_v44  ;;  %v970_v43 = vrot.slane %v9379_v41, %v9374_v40  ;;  %v958_v44 = vrot.slane %v9379_v41, %v8854_v46 }
 0x52b   :  { %1631 = vmatpush1.bf16.msra.mxu0 %v7117_v45  ;;  %1674 = vmatpush1.bf16.msra.mxu1 %v7119_v48  ;;  %v966_v45 = vrot.slane %v9379_v41, %v8863_v55 }
 0x52c   :  { %7891 = vmatprep.subr.bf16.mxu0 %v8344_v58  ;;  %7913 = vmatprep.subr.bf16.mxu1 %v8345_v59 }
 0x52e   :  { %7175 = vmatmul.mubr.msk.bf16.vlgmr.msra.gmra.mxu0 %vm239_vm0, %v9121_v50  ;;  %7176 = vmatmul.mubr.msk.bf16.vlgmr.msra.gmra.mxu1 %vm239_vm0, %v9121_v50  ;;  %v8353_v50 = vld [vmem:[%s10876_s5 + $0xe8] sm:$0xff]  }
 0x52f   :  { %7892 = vmatpush3.bf16.msra.mxu0 %v8346_v60  ;;  %7914 = vmatpush3.bf16.msra.mxu1 %v8347_v47 }
 0x530   :  { %7893 = vmatprep.subr.bf16.mxu0 %v8348_v49  ;;  %7915 = vmatprep.subr.bf16.mxu1 %v8349_v13 }
 0x533   :  { %7894 = vmatpush3.bf16.msra.mxu0 %v8350_v14  ;;  %7916 = vmatpush3.bf16.msra.mxu1 %v8351_v0 }
 0x534   :  { %7895 = vmatprep.subr.bf16.mxu0 %v8352_v4  ;;  %7917 = vmatprep.subr.bf16.mxu1 %v8353_v50 }
 0x537   :  { %7896 = vmatpush3.bf16.msra.mxu0 %v8354_v8  ;;  %7918 = vmatpush3.bf16.msra.mxu1 %v8355_v10 }
 0x538   :  { %7897 = vmatprep.subr.bf16.mxu0 %v8356_v16  ;;  %7919 = vmatprep.subr.bf16.mxu1 %v8357_v61 }
 0x53b   :  { %7898 = vmatpush3.bf16.msra.mxu0 %v8358_v62  ;;  %7920 = vmatpush3.bf16.msra.mxu1 %v8359_v54 }
 0x53c   :  { %7899 = vmatprep.subr.bf16.mxu0 %v8360_v9  ;;  %7921 = vmatprep.subr.bf16.mxu1 %v8361_v12 }
 0x53f   :  { %7900 = vmatpush3.bf16.msra.mxu0 %v8362_v15  ;;  %7922 = vmatpush3.bf16.msra.mxu1 %v8363_v17 }
 0x540   :  { %7901 = vmatprep.subr.bf16.mxu0 %v8364_v18  ;;  %7923 = vmatprep.subr.bf16.mxu1 %v8365_v51 }
 0x543   :  { %7902 = vmatpush3.bf16.msra.mxu0 %v8366_v52  ;;  %7924 = vmatpush3.bf16.msra.mxu1 %v8367_v53  ;;  %v8378_v53 = vld [vmem:[%s10876_s5 + $0x138] sm:$0xff]  }
 0x544   :  { %7903 = vmatprep.subr.bf16.mxu0 %v8368_v56  ;;  %7925 = vmatprep.subr.bf16.mxu1 %v8369_v24  ;;  %v8379_v56 = vld [vmem:[%s10876_s5 + $0x1b8] sm:$0xff]  }
 0x547   :  { %7904 = vmatpush3.bf16.msra.mxu0 %v8370_v25  ;;  %7926 = vmatpush3.bf16.msra.mxu1 %v8371_v26  ;;  %v8380_v26 = vld [vmem:[%s10876_s5 + $0x170] sm:$0xff]  }
 0x548   :  { %7905 = vmatprep.subr.bf16.mxu0 %v8372_v27  ;;  %7927 = vmatprep.subr.bf16.mxu1 %v8373_v57  ;;  %v8381_v27 = vld [vmem:[%s10876_s5 + $0x1f0] sm:$0xff]   ;;  %v9402_v57 = vsub.s32 5, %v8774_v5 }
 0x54b   :  { %7906 = vmatpush3.bf16.msra.mxu0 %v8374_v63  ;;  %7928 = vmatpush3.bf16.msra.mxu1 %v8375_v30  ;;  %v9405_v63 = vsub.s32 7, %v8774_v5  ;;  %v8382_v30 = vld [vmem:[%s10876_s5 + $0x130] sm:$0xff]  }
 0x54c   :  { %7935 = vmatprep.subr.bf16.mxu0 %v8376_v31  ;;  %7957 = vmatprep.subr.bf16.mxu1 %v8377_v32  ;;  %v8383_v31 = vld [vmem:[%s10876_s5 + $0x1b0] sm:$0xff]  }
 0x5be   :  { %v1392_v33 = vpop.f32.mrf.mxu0  ;;  %v1435_v34 = vpop.f32.mrf.mxu1 }
 0x5bf   :  { %v1393_v0 = vadd.f32 %v1392_v33, %v958_v44  ;;  %v1436_v4 = vadd.f32 %v1435_v34, %v966_v45  ;;  %v8384_v34 = vld [vmem:[%s10876_s5 + $0x168] sm:$0xff]  }
 0x5c0   :  { %v1394_v48 = vpop.f32.mrf.mxu0  ;;  %v1437_v58 = vpop.f32.mrf.mxu1 }
 0x5c1   :  { %v1395_v47 = vadd.f32 %v1394_v48, %v962_v42  ;;  %v1438_v49 = vadd.f32 %v1437_v58, %v970_v43  ;;  %v1702_v17 = vmax.f32 %v1393_v0, 0.0  ;;  %v1704_v18 = vmax.f32 %v1436_v4, 0.0  ;;  %v8386_v58 = vld [vmem:[%s10876_s5 + $0x128] sm:$0xff]  }
 0x5c2   :  { %v1396_v59 = vpop.f32.mrf.mxu0  ;;  %v1439_v60 = vpop.f32.mrf.mxu1 }
 0x5c3   :  { %v1397_v13 = vadd.f32 %v1396_v59, %v958_v44  ;;  %v1440_v14 = vadd.f32 %v1439_v60, %v966_v45  ;;  %v1703_v54 = vmax.f32 %v1395_v47, 0.0  ;;  %v1705_v9 = vmax.f32 %v1438_v49, 0.0  ;;  %v8387_v59 = vld [vmem:[%s10876_s5 + $0x1a8] sm:$0xff]   ;;  %v8388_v49 = vld [vmem:[%s10876_s5 + $0x160] sm:$0xff]  }
 0x5c4   :  { %v1398_v50 = vpop.f32.mrf.mxu0  ;;  %v1441_v8 = vpop.f32.mrf.mxu1  ;;  %v986_v44 = vrot.slane %v9379_v41, %v9405_v63 }
 0x5c5   :  { %v1399_v10 = vadd.f32 %v1398_v50, %v962_v42  ;;  %v1442_v16 = vadd.f32 %v1441_v8, %v970_v43  ;;  %v1718_v61 = vmax.f32 %v1397_v13, 0.0  ;;  %v1720_v62 = vmax.f32 %v1440_v14, 0.0  ;;  %v8385_v42 = vld [vmem:[%s10876_s5 + $0x1e8] sm:$0xff]   ;;  %v8389_v13 = vld [vmem:[%s10876_s5 + $0x1e0] sm:$0xff]  }
 0x5c6   :  { %v978_v43 = vrot.slane %v9379_v41, %v9402_v57 }
 0x5c7   :  { %v1719_v12 = vmax.f32 %v1399_v10, 0.0  ;;  %v1721_v15 = vmax.f32 %v1442_v16, 0.0  ;;  %v1734_v24 = vpack.c.bf16 %v1718_v61, %v1702_v17  ;;  %v1736_v25 = vpack.c.bf16 %v1720_v62, %v1704_v18  ;;  %v8390_v16 = vld [vmem:[%s10876_s5 + $0x120] sm:$0xff]   ;;  %v8392_v62 = vld [vmem:[%s10876_s5 + $0x158] sm:$0xff]  }
 0x5c8   :  { %v8391_v61 = vld [vmem:[%s10876_s5 + $0x1a0] sm:$0xff]  }
 0x5c9   :  { %v1735_v51 = vpack.c.bf16 %v1719_v12, %v1703_v54  ;;  %v1737_v52 = vpack.c.bf16 %v1721_v15, %v1705_v9  ;;  %v8393_v54 = vld [vmem:[%s10876_s5 + $0x1d8] sm:$0xff]  }
 0x5cb   :  { %2806 = vmatprep.mubr.bf16.mxu0 %v1735_v51  ;;  %2847 = vmatprep.mubr.bf16.mxu1 %v1737_v52  ;;  %v8394_v52 = vld [vmem:[%s10876_s5 + $0x118] sm:$0xff]  }
 0x5cc   :  { %2807 = vmatmul.mubr.bf16.vlgmr.msra.gmra.mxu0 %v1734_v24  ;;  %2848 = vmatmul.mubr.bf16.vlgmr.msra.gmra.mxu1 %v1736_v25  ;;  %v8397_v24 = vld [vmem:[%s10876_s5 + $0x1d0] sm:$0xff]   ;;  %v9464_v25 = vsub.s32 4, %v8774_v5 }
 0x5cd   :  { %7936 = vmatpush3.bf16.msra.mxu0 %v8378_v53  ;;  %7958 = vmatpush3.bf16.msra.mxu1 %v8379_v56  ;;  %v8395_v53 = vld [vmem:[%s10876_s5 + $0x198] sm:$0xff]   ;;  %v8396_v56 = vld [vmem:[%s10876_s5 + $0x150] sm:$0xff]  }
 0x5ce   :  { %v9413_v32 = vpop.f32.mrf.mxu0  ;;  %v9415_v33 = vpop.f32.mrf.mxu1  ;;  %7937 = vmatprep.subr.bf16.mxu0 %v8380_v26  ;;  %7959 = vmatprep.subr.bf16.mxu1 %v8381_v27  ;;  %v9467_v26 = vsub.s32 6, %v8774_v5  ;;  %v8398_v27 = vld [vmem:[%s10876_s5 + $0x110] sm:$0xff]   ;;  %v8400_v5 = vld [vmem:[%s10876_s5 + $0x148] sm:$0xff]  }
 0x5d0   :  { %v1480_v45 = vpop.f32.mrf.mxu0  ;;  %v1523_v48 = vpop.f32.mrf.mxu1 }
 0x5d1   :  { %7938 = vmatpush3.bf16.msra.mxu0 %v8382_v30  ;;  %7960 = vmatpush3.bf16.msra.mxu1 %v8383_v31  ;;  %v1481_v14 = vadd.f32 %v1480_v45, %v978_v43  ;;  %v1524_v0 = vadd.f32 %v1523_v48, %v986_v44  ;;  %v8399_v30 = vld [vmem:[%s10876_s5 + $0x190] sm:$0xff]   ;;  %v9492_v45 = vld [vmem:[%s10875_s4 + $0x8] sm:$0xff] }
 0x5d2   :  { %v1482_v60 = vpop.f32.mrf.mxu0  ;;  %v1525_v47 = vpop.f32.mrf.mxu1  ;;  %7939 = vmatprep.subr.bf16.mxu0 %v8384_v34  ;;  %7961 = vmatprep.subr.bf16.mxu1 %v8385_v42  ;;  %v8401_v42 = vld [vmem:[%s10876_s5 + $0x1c8] sm:$0xff]  }
 0x5d3   :  { %v1707_v9 = vmax.f32 %v1481_v14, 0.0  ;;  %v1709_v12 = vmax.f32 %v1524_v0, 0.0  ;;  %v1002_v0 = vrot.slane %v9492_v45, %v9374_v40 }
 0x5d4   :  { %v1484_v4 = vpop.f32.mrf.mxu0  ;;  %v1527_v50 = vpop.f32.mrf.mxu1 }
 0x5d5   :  { %v1485_v8 = vadd.f32 %v1484_v4, %v978_v43  ;;  %v1528_v10 = vadd.f32 %v1527_v50, %v986_v44  ;;  %7940 = vmatpush3.bf16.msra.mxu0 %v8386_v58  ;;  %7962 = vmatpush3.bf16.msra.mxu1 %v8387_v59  ;;  %v974_v43 = vrot.slane %v9379_v41, %v9464_v25 }
 0x5d6   :  { %7941 = vmatprep.subr.bf16.mxu0 %v8388_v49  ;;  %7963 = vmatprep.subr.bf16.mxu1 %v8389_v13  ;;  %v982_v44 = vrot.slane %v9379_v41, %v9467_v26  ;;  %v994_v59 = vrot.slane %v9492_v45, %v8847_v39  ;;  %v8402_v49 = vld [vmem:[%s10876_s5 + $0x108] sm:$0xff]  }
 0x5d7   :  { %v1723_v15 = vmax.f32 %v1485_v8, 0.0  ;;  %v1725_v17 = vmax.f32 %v1528_v10, 0.0  ;;  %v8403_v41 = vld [vmem:[%s10876_s5 + $0x188] sm:$0xff]   ;;  %v1483_v13 = vadd.f32 %v1482_v60, %v974_v43  ;;  %v8404_v8 = vld [vmem:[%s10876_s5 + $0x140] sm:$0xff]   ;;  %v1479_v60 = vadd.f32 %v9413_v32, %v974_v43 }
 0x5d8   :  { %v1526_v14 = vadd.f32 %v1525_v47, %v982_v44  ;;  %v8405_v10 = vld [vmem:[%s10876_s5 + $0x1c0] sm:$0xff]   ;;  %v1522_v47 = vadd.f32 %v9415_v33, %v982_v44  ;;  %v8408_v33 = vld [vmem:[%s10876_s5 + $0x278] sm:$0xff]  }
 0x5d9   :  { %v1739_v18 = vpack.c.bf16 %v1723_v15, %v1707_v9  ;;  %v1741_v51 = vpack.c.bf16 %v1725_v17, %v1709_v12  ;;  %7942 = vmatpush3.bf16.msra.mxu0 %v8390_v16  ;;  %7964 = vmatpush3.bf16.msra.mxu1 %v8391_v61  ;;  %v8406_v12 = vld [vmem:[%s10876_s5 + $0x100] sm:$0xff]   ;;  %v1722_v17 = vmax.f32 %v1483_v13, 0.0  ;;  %v8411_v44 = vld [vmem:[%s10876_s5 + $0x2b8] sm:$0xff]   ;;  %v8415_v13 = vld [vmem:[%s10876_s5 + $0x2b0] sm:$0xff]  }
 0x5da   :  { %7943 = vmatprep.subr.bf16.mxu0 %v8392_v62  ;;  %7965 = vmatprep.subr.bf16.mxu1 %v8393_v54  ;;  %v8407_v15 = vld [vmem:[%s10876_s5 + $0x180] sm:$0xff]  }
 0x5db   :  { %2888 = vmatprep.mubr.bf16.mxu0 %v1739_v18  ;;  %2929 = vmatprep.mubr.bf16.mxu1 %v1741_v51  ;;  %v1724_v18 = vmax.f32 %v1526_v14, 0.0  ;;  %v8409_v51 = vld [vmem:[%s10876_s5 + $0x2f8] sm:$0xff]   ;;  %v8416_v14 = vld [vmem:[%s10876_s5 + $0x268] sm:$0xff]  }
 0x5dd   :  { %7944 = vmatpush3.bf16.msra.mxu0 %v8394_v52  ;;  %7966 = vmatpush3.bf16.msra.mxu1 %v8395_v53  ;;  %v1706_v53 = vmax.f32 %v1479_v60, 0.0  ;;  %v8420_v60 = vld [vmem:[%s10876_s5 + $0x260] sm:$0xff]  }
 0x5de   :  { %v9475_v31 = vpop.f32.mrf.mxu0  ;;  %v9477_v34 = vpop.f32.mrf.mxu1  ;;  %7945 = vmatprep.subr.bf16.mxu0 %v8396_v56  ;;  %7967 = vmatprep.subr.bf16.mxu1 %v8397_v24  ;;  %v1708_v56 = vmax.f32 %v1522_v47, 0.0  ;;  %v8421_v47 = vld [vmem:[%s10876_s5 + $0x2e0] sm:$0xff]  }
 0x5e0   :  { %v1566_v48 = vpop.f32.mrf.mxu0  ;;  %v1609_v58 = vpop.f32.mrf.mxu1 }
 0x5e1   :  { %7946 = vmatpush3.bf16.msra.mxu0 %v8398_v27  ;;  %7968 = vmatpush3.bf16.msra.mxu1 %v8399_v30  ;;  %v1567_v62 = vadd.f32 %v1566_v48, %v994_v59  ;;  %v1610_v32 = vadd.f32 %v1609_v58, %v1002_v0  ;;  %v8410_v30 = vld [vmem:[%s10876_s5 + $0x238] sm:$0xff]   ;;  %v8412_v58 = vld [vmem:[%s10876_s5 + $0x270] sm:$0xff]  }
 0x5e2   :  { %v9504_v4 = vpop.f32.mrf.mxu0  ;;  %v9506_v50 = vpop.f32.mrf.mxu1  ;;  %7947 = vmatprep.subr.bf16.mxu0 %v8400_v5  ;;  %7969 = vmatprep.subr.bf16.mxu1 %v8401_v42  ;;  %v1738_v5 = vpack.c.bf16 %v1722_v17, %v1706_v53  ;;  %v1740_v42 = vpack.c.bf16 %v1724_v18, %v1708_v56  ;;  %v8426_v17 = vld [vmem:[%s10876_s5 + $0x218] sm:$0xff]   ;;  %v8430_v53 = vld [vmem:[%s10876_s5 + $0x210] sm:$0xff]  }
 0x5e3   :  { %v1711_v27 = vmax.f32 %v1567_v62, 0.0  ;;  %v1713_v43 = vmax.f32 %v1610_v32, 0.0  ;;  %v8427_v32 = vld [vmem:[%s10876_s5 + $0x298] sm:$0xff]  }
 0x5e4   :  { %v1570_v16 = vpop.f32.mrf.mxu0  ;;  %v1613_v61 = vpop.f32.mrf.mxu1 }
 0x5e5   :  { %v1571_v54 = vadd.f32 %v1570_v16, %v994_v59  ;;  %v1614_v9 = vadd.f32 %v1613_v61, %v1002_v0  ;;  %7948 = vmatpush3.bf16.msra.mxu0 %v8402_v49  ;;  %7970 = vmatpush3.bf16.msra.mxu1 %v8403_v41  ;;  %v8413_v59 = vld [vmem:[%s10876_s5 + $0x2f0] sm:$0xff]   ;;  %v8417_v0 = vld [vmem:[%s10876_s5 + $0x2e8] sm:$0xff]   ;;  %v8422_v61 = vld [vmem:[%s10876_s5 + $0x220] sm:$0xff]  }
 0x5e6   :  { %7949 = vmatprep.subr.bf16.mxu0 %v8404_v8  ;;  %7971 = vmatprep.subr.bf16.mxu1 %v8405_v10  ;;  %v8414_v41 = vld [vmem:[%s10876_s5 + $0x230] sm:$0xff]   ;;  %v8418_v8 = vld [vmem:[%s10876_s5 + $0x228] sm:$0xff]  }
 0x5e7   :  { %v1727_v52 = vmax.f32 %v1571_v54, 0.0  ;;  %v1729_v24 = vmax.f32 %v1614_v9, 0.0  ;;  %v8419_v10 = vld [vmem:[%s10876_s5 + $0x2a8] sm:$0xff]   ;;  %v8423_v54 = vld [vmem:[%s10876_s5 + $0x2a0] sm:$0xff]   ;;  %v8424_v9 = vld [vmem:[%s10876_s5 + $0x258] sm:$0xff]  }
 0x5e9   :  { %7950 = vmatpush3.bf16.msra.mxu0 %v8406_v12  ;;  %7972 = vmatpush3.bf16.msra.mxu1 %v8407_v15  ;;  %v1743_v48 = vpack.c.bf16 %v1727_v52, %v1711_v27  ;;  %v1745_v49 = vpack.c.bf16 %v1729_v24, %v1713_v43  ;;  %v8425_v12 = vld [vmem:[%s10876_s5 + $0x2d8] sm:$0xff]   ;;  %v8431_v24 = vld [vmem:[%s10876_s5 + $0x290] sm:$0xff]   ;;  %v8432_v27 = vld [vmem:[%s10876_s5 + $0x248] sm:$0xff]  }
 0x5ea   :  { %7979 = vmatprep.subr.bf16.mxu0 %v8408_v33  ;;  %8001 = vmatprep.subr.bf16.mxu1 %v8409_v51  ;;  %v8428_v33 = vld [vmem:[%s10876_s5 + $0x250] sm:$0xff]  }
 0x5eb   :  { %v8429_v51 = vld [vmem:[%s10876_s5 + $0x2d0] sm:$0xff]  }
 0x5ec   :  { %2889 = vmatmul.mubr.bf16.vlgmr.msra.gmra.mxu0 %v1738_v5  ;;  %2930 = vmatmul.mubr.bf16.vlgmr.msra.gmra.mxu1 %v1740_v42  ;;  %v990_v5 = vrot.slane %v9492_v45, %v8854_v46  ;;  %v998_v42 = vrot.slane %v9492_v45, %v8863_v55 }
 0x5ed   :  { %7980 = vmatpush3.bf16.msra.mxu0 %v8410_v30  ;;  %2970 = vmatprep.mubr.bf16.mxu0 %v1743_v48  ;;  %v8433_v30 = vld [vmem:[%s10876_s5 + $0x2c8] sm:$0xff]  }
 0x5ee   :  { %8002 = vmatpush3.bf16.msra.mxu1 %v8411_v44  ;;  %3011 = vmatprep.mubr.bf16.mxu1 %v1745_v49  ;;  %v9564_v16 = vpop.f32.mrf.mxu0  ;;  %v9569_v62 = vpop.f32.mrf.mxu1  ;;  %v8434_v44 = vld [vmem:[%s10876_s5 + $0x208] sm:$0xff]   ;;  %v1569_v48 = vadd.f32 %v9504_v4, %v990_v5  ;;  %v8437_v4 = vld [vmem:[%s10876_s5 + $0x2c0] sm:$0xff]  }
 0x5ef   :  { %7981 = vmatprep.subr.bf16.mxu0 %v8412_v58  ;;  %8003 = vmatprep.subr.bf16.mxu1 %v8413_v59  ;;  %v1010_v58 = vrot.slane %v9492_v45, %v9402_v57  ;;  %v8435_v49 = vld [vmem:[%s10876_s5 + $0x288] sm:$0xff]  }
 0x5f0   :  { %v1652_v15 = vpop.f32.mrf.mxu0  ;;  %v1695_v18 = vpop.f32.mrf.mxu1 }
 0x5f1   :  { %7982 = vmatpush3.bf16.msra.mxu0 %v8414_v41  ;;  %v8436_v41 = vld [vmem:[%s10876_s5 + $0x240] sm:$0xff]  }
 0x5f2   :  { %8004 = vmatpush3.bf16.msra.mxu1 %v8415_v13  ;;  %7983 = vmatprep.subr.bf16.mxu0 %v8416_v14  ;;  %v9592_v52 = vpop.f32.mrf.mxu0  ;;  %v9597_v56 = vpop.f32.mrf.mxu1  ;;  %v1612_v13 = vadd.f32 %v9506_v50, %v998_v42  ;;  %v1018_v14 = vrot.slane %v9492_v45, %v9405_v63  ;;  %v1726_v50 = vmax.f32 %v1569_v48, 0.0  ;;  %v8446_v48 = vld [vmem:[%s10876_s5 + $0x330] sm:$0xff]  }
 0x5f3   :  { %8005 = vmatprep.subr.bf16.mxu1 %v8417_v0  ;;  %v1565_v0 = vadd.f32 %v9475_v31, %v990_v5  ;;  %v8440_v31 = vld [vmem:[%s10876_s5 + $0x378] sm:$0xff]   ;;  %v8444_v5 = vld [vmem:[%s10876_s5 + $0x370] sm:$0xff]  }
 0x5f4   :  { %v1656_v43 = vpop.f32.mrf.mxu0  ;;  %v1699_v59 = vpop.f32.mrf.mxu1 }
 0x5f5   :  { %7984 = vmatpush3.bf16.msra.mxu0 %v8418_v8  ;;  %v1657_v8 = vadd.f32 %v1656_v43, %v1010_v58  ;;  %v8445_v43 = vld [vmem:[%s10876_s5 + $0x3f0] sm:$0xff]  }
 0x5f6   :  { %8006 = vmatpush3.bf16.msra.mxu1 %v8419_v10  ;;  %7985 = vmatprep.subr.bf16.mxu0 %v8420_v60  ;;  %v1608_v10 = vadd.f32 %v9477_v34, %v998_v42  ;;  %v1700_v60 = vadd.f32 %v1699_v59, %v1018_v14  ;;  %v1696_v34 = vadd.f32 %v1695_v18, %v1018_v14  ;;  %v8443_v18 = vld [vmem:[%s10876_s5 + $0x3b8] sm:$0xff]   ;;  %v8448_v59 = vld [vmem:[%s10876_s5 + $0x368] sm:$0xff]   ;;  %v8452_v14 = vld [vmem:[%s10876_s5 + $0x360] sm:$0xff]  }
 0x5f7   :  { %8007 = vmatprep.subr.bf16.mxu1 %v8421_v47  ;;  %v8438_v47 = vld [vmem:[%s10876_s5 + $0x200] sm:$0xff]  }
 0x5f9   :  { %7986 = vmatpush3.bf16.msra.mxu0 %v8422_v61  ;;  %v1653_v61 = vadd.f32 %v1652_v15, %v1010_v58  ;;  %v1712_v15 = vmax.f32 %v1608_v10, 0.0  ;;  %v8447_v58 = vld [vmem:[%s10876_s5 + $0x3b0] sm:$0xff]   ;;  %v8456_v10 = vld [vmem:[%s10876_s5 + $0x358] sm:$0xff]  }
 0x5fa   :  { %8008 = vmatpush3.bf16.msra.mxu1 %v8423_v54  ;;  %7987 = vmatprep.subr.bf16.mxu0 %v8424_v9  ;;  %v8439_v54 = vld [vmem:[%s10876_s5 + $0x280] sm:$0xff]   ;;  %v1728_v9 = vmax.f32 %v1612_v13, 0.0  ;;  %v8451_v13 = vld [vmem:[%s10876_s5 + $0x3a8] sm:$0xff]  }
 0x5fb   :  { %8009 = vmatprep.subr.bf16.mxu1 %v8425_v12  ;;  %v8441_v12 = vld [vmem:[%s10876_s5 + $0x3f8] sm:$0xff]  }
 0x5fd   :  { %7988 = vmatpush3.bf16.msra.mxu0 %v8426_v17  ;;  %v1710_v17 = vmax.f32 %v1565_v0, 0.0  ;;  %v8454_v0 = vld [vmem:[%s10876_s5 + $0x320] sm:$0xff]  }
 0x5fe   :  { %8010 = vmatpush3.bf16.msra.mxu1 %v8427_v32  ;;  %7989 = vmatprep.subr.bf16.mxu0 %v8428_v33  ;;  %v1731_v32 = vmax.f32 %v1657_v8, 0.0  ;;  %v1733_v33 = vmax.f32 %v1700_v60, 0.0  ;;  %v8455_v8 = vld [vmem:[%s10876_s5 + $0x3a0] sm:$0xff]   ;;  %v8457_v60 = vld [vmem:[%s10876_s5 + $0x3d8] sm:$0xff]  }
 0x5ff   :  { %8011 = vmatprep.subr.bf16.mxu1 %v8429_v51  ;;  %v8442_v51 = vld [vmem:[%s10876_s5 + $0x338] sm:$0xff]  }
 0x601   :  { %7990 = vmatpush3.bf16.msra.mxu0 %v8430_v53  ;;  %v1742_v53 = vpack.c.bf16 %v1726_v50, %v1710_v17  ;;  %v8459_v50 = vld [vmem:[%s10876_s5 + $0x398] sm:$0xff]   ;;  %v1006_v17 = vrot.slane %v9492_v45, %v9464_v25 }
 0x602   :  { %8012 = vmatpush3.bf16.msra.mxu1 %v8431_v24  ;;  %7991 = vmatprep.subr.bf16.mxu0 %v8432_v27  ;;  %v1715_v24 = vmax.f32 %v1653_v61, 0.0  ;;  %v1744_v27 = vpack.c.bf16 %v1728_v9, %v1712_v15  ;;  %v8460_v61 = vld [vmem:[%s10876_s5 + $0x350] sm:$0xff]   ;;  %v8466_v15 = vld [vmem:[%s10876_s5 + $0x308] sm:$0xff]  }
 0x603   :  { %8013 = vmatprep.subr.bf16.mxu1 %v8433_v30  ;;  %v1717_v30 = vmax.f32 %v1696_v34, 0.0  ;;  %v8463_v9 = vld [vmem:[%s10876_s5 + $0x390] sm:$0xff]   ;;  %v8464_v34 = vld [vmem:[%s10876_s5 + $0x348] sm:$0xff]  }
 0x604   :  { %v1747_v42 = vpack.c.bf16 %v1731_v32, %v1715_v24  ;;  %v1014_v32 = vrot.slane %v9492_v45, %v9467_v26  ;;  %v8469_v45 = vld [vmem:[%s10876_s5 + $0x3c0] sm:$0xff]  }
 0x605   :  { %7992 = vmatpush3.bf16.msra.mxu0 %v8434_v44  ;;  %v1749_v44 = vpack.c.bf16 %v1733_v33, %v1717_v30  ;;  %v1655_v33 = vadd.f32 %v9592_v52, %v1006_v17 }
 0x606   :  { %8014 = vmatpush3.bf16.msra.mxu1 %v8435_v49  ;;  %7993 = vmatprep.subr.bf16.mxu0 %v8436_v41  ;;  %v8449_v49 = vld [vmem:[%s10876_s5 + $0x3e8] sm:$0xff]   ;;  %v1698_v24 = vadd.f32 %v9597_v56, %v1014_v32  ;;  %v1694_v52 = vadd.f32 %v9569_v62, %v1014_v32  ;;  %v8471_v56 = vld [vmem:[%s10876_s5 + $0x380] sm:$0xff]  }
 0x607   :  { %8015 = vmatprep.subr.bf16.mxu1 %v8437_v4  ;;  %v8450_v41 = vld [vmem:[%s10876_s5 + $0x328] sm:$0xff]   ;;  %v8453_v4 = vld [vmem:[%s10876_s5 + $0x3e0] sm:$0xff]   ;;  %v1730_v30 = vmax.f32 %v1655_v33, 0.0 }
 0x609   :  { %7994 = vmatpush3.bf16.msra.mxu0 %v8438_v47  ;;  %v8458_v47 = vld [vmem:[%s10876_s5 + $0x318] sm:$0xff]  }
 0x60a   :  { %8016 = vmatpush3.bf16.msra.mxu1 %v8439_v54  ;;  %8023 = vmatprep.subr.bf16.mxu0 %v8440_v31  ;;  %v8461_v54 = vld [vmem:[%s10876_s5 + $0x3d0] sm:$0xff]  }
 0x60b   :  { %8045 = vmatprep.subr.bf16.mxu1 %v8441_v12  ;;  %v8462_v31 = vld [vmem:[%s10876_s5 + $0x310] sm:$0xff]   ;;  %v8465_v12 = vld [vmem:[%s10876_s5 + $0x3c8] sm:$0xff]  }
 0x60c   :  { %2971 = vmatmul.mubr.bf16.vlgmr.msra.gmra.mxu0 %v1742_v53  ;;  %v8468_v53 = vld [vmem:[%s10876_s5 + $0x340] sm:$0xff]  }
 0x60d   :  { %3012 = vmatmul.mubr.bf16.vlgmr.msra.gmra.mxu1 %v1744_v27  ;;  %8024 = vmatpush3.bf16.msra.mxu0 %v8442_v51  ;;  %v8467_v51 = vld [vmem:[%s10876_s5 + $0x388] sm:$0xff]   ;;  %v8470_v27 = vld [vmem:[%s10876_s5 + $0x300] sm:$0xff]  }
 0x60e   :  { %3052 = vmatprep.mubr.bf16.mxu0 %v1747_v42  ;;  %8046 = vmatpush3.bf16.msra.mxu1 %v8443_v18  ;;  %v1651_v18 = vadd.f32 %v9564_v16, %v1006_v17 }
 0x60f   :  { %3093 = vmatprep.mubr.bf16.mxu1 %v1749_v44  ;;  %8025 = vmatprep.subr.bf16.mxu0 %v8444_v5  ;;  %v1732_v5 = vmax.f32 %v1698_v24, 0.0 }
 0x610   :  { %8047 = vmatprep.subr.bf16.mxu1 %v8445_v43  ;;  %v1714_v42 = vmax.f32 %v1651_v18, 0.0  ;;  %v1716_v43 = vmax.f32 %v1694_v52, 0.0 }
 0x611   :  { %8026 = vmatpush3.bf16.msra.mxu0 %v8446_v48 }
 0x612   :  { %8048 = vmatpush3.bf16.msra.mxu1 %v8447_v58  ;;  %8027 = vmatprep.subr.bf16.mxu0 %v8448_v59  ;;  %v1746_v16 = vpack.c.bf16 %v1730_v30, %v1714_v42  ;;  %v1748_v62 = vpack.c.bf16 %v1732_v5, %v1716_v43 }
 0x613   :  { %8049 = vmatprep.subr.bf16.mxu1 %v8449_v49 }
 0x615   :  { %8028 = vmatpush3.bf16.msra.mxu0 %v8450_v41 }
 0x616   :  { %8050 = vmatpush3.bf16.msra.mxu1 %v8451_v13  ;;  %8029 = vmatprep.subr.bf16.mxu0 %v8452_v14 }
 0x617   :  { %8051 = vmatprep.subr.bf16.mxu1 %v8453_v4 }
 0x619   :  { %8030 = vmatpush3.bf16.msra.mxu0 %v8454_v0 }
 0x61a   :  { %8052 = vmatpush3.bf16.msra.mxu1 %v8455_v8  ;;  %8031 = vmatprep.subr.bf16.mxu0 %v8456_v10 }
 0x61b   :  { %8053 = vmatprep.subr.bf16.mxu1 %v8457_v60 }
 0x61d   :  { %8032 = vmatpush3.bf16.msra.mxu0 %v8458_v47 }
 0x61e   :  { %8054 = vmatpush3.bf16.msra.mxu1 %v8459_v50  ;;  %8033 = vmatprep.subr.bf16.mxu0 %v8460_v61 }
 0x61f   :  { %8055 = vmatprep.subr.bf16.mxu1 %v8461_v54 }
 0x621   :  { %8034 = vmatpush3.bf16.msra.mxu0 %v8462_v31 }
 0x622   :  { %8056 = vmatpush3.bf16.msra.mxu1 %v8463_v9  ;;  %8035 = vmatprep.subr.bf16.mxu0 %v8464_v34 }
 0x623   :  { %8057 = vmatprep.subr.bf16.mxu1 %v8465_v12 }
 0x625   :  { %8036 = vmatpush3.bf16.msra.mxu0 %v8466_v15 }
 0x626   :  { %8058 = vmatpush3.bf16.msra.mxu1 %v8467_v51  ;;  %8037 = vmatprep.subr.bf16.mxu0 %v8468_v53 }
 0x627   :  { %8059 = vmatprep.subr.bf16.mxu1 %v8469_v45 }
 0x629   :  { %8038 = vmatpush3.bf16.msra.mxu0 %v8470_v27 }
 0x62a   :  { %8060 = vmatpush3.bf16.msra.mxu1 %v8471_v56 }
 0x62b   :  { %8281 = vmatprep.subr.bf16.mxu1 %v8684_v11 }
 0x62c   :  { %3053 = vmatmul.mubr.bf16.vlgmr.msra.gmra.mxu0 %v1746_v16 }
 0x62d   :  { %3094 = vmatmul.mubr.bf16.vlgmr.msra.gmra.mxu1 %v1748_v62  ;;  %3669 = vmatprep.mubr.bf16.mxu0 %v8682_v3 }
 0x62e   :  { %8289 = vmatprep.mubr.msk.bf16.mxu1 %vm8685_vm1, %v8684_v11 }
 0x68c   :  { %v7907_v44 = vpop.f32.mrf.mxu0  ;;  %v7929_v48 = vpop.f32.mrf.mxu1 }
 0x68e   :  { %v7908_v58 = vpop.f32.mrf.mxu0  ;;  %v7930_v59 = vpop.f32.mrf.mxu1 }
 0x68f   :  { %v7909_v31 = vadd.f32 %v7908_v58, %v7907_v44  ;;  %v7931_v9 = vadd.f32 %v7930_v59, %v7929_v48 }
 0x690   :  { %v7910_v49 = vpop.f32.mrf.mxu0  ;;  %v7932_v41 = vpop.f32.mrf.mxu1 }
 0x691   :  { %v2850_v32 = vadd.f32 %v7931_v9, %v7909_v31 }
 0x692   :  { %v7911_v13 = vpop.f32.mrf.mxu0  ;;  %v7933_v4 = vpop.f32.mrf.mxu1 }
 0x693   :  { %v7912_v15 = vadd.f32 %v7911_v13, %v7910_v49  ;;  %v7934_v33 = vadd.f32 %v7933_v4, %v7932_v41 }
 0x695   :  { %v2853_v18 = vadd.f32 %v7934_v33, %v7912_v15 }
 0x6ac   :  { %v7951_v14 = vpop.f32.mrf.mxu0  ;;  %v7973_v0 = vpop.f32.mrf.mxu1 }
 0x6ae   :  { %v7952_v8 = vpop.f32.mrf.mxu0  ;;  %v7974_v10 = vpop.f32.mrf.mxu1 }
 0x6af   :  { %v7953_v17 = vadd.f32 %v7952_v8, %v7951_v14  ;;  %v7975_v52 = vadd.f32 %v7974_v10, %v7973_v0 }
 0x6b0   :  { %v7954_v60 = vpop.f32.mrf.mxu0  ;;  %v7976_v47 = vpop.f32.mrf.mxu1 }
 0x6b1   :  { %v2891_v24 = vadd.f32 %v7953_v17, %v2850_v32 }
 0x6b2   :  { %v7955_v50 = vpop.f32.mrf.mxu0  ;;  %v7977_v54 = vpop.f32.mrf.mxu1 }
 0x6b3   :  { %v7956_v45 = vadd.f32 %v7955_v50, %v7954_v60  ;;  %v2932_v5 = vadd.f32 %v7975_v52, %v2891_v24  ;;  %v7978_v43 = vadd.f32 %v7977_v54, %v7976_v47  ;;  %v7104_v47 = vld [vmem:[%s10877_s6] ss:$0 sm:$0xff] }
 0x6b5   :  { %v2894_v42 = vadd.f32 %v7956_v45, %v2853_v18 }
 0x6b7   :  { %v2935_v58 = vadd.f32 %v7978_v43, %v2894_v42 }
 0x6cc   :  { %v7995_v61 = vpop.f32.mrf.mxu0 }
 0x6cd   :  { %v8017_v34 = vpop.f32.mrf.mxu1 }
 0x6ce   :  { %v7996_v12 = vpop.f32.mrf.mxu0 }
 0x6cf   :  { %v8018_v51 = vpop.f32.mrf.mxu1  ;;  %v7997_v27 = vadd.f32 %v7996_v12, %v7995_v61 }
 0x6d0   :  { %v7998_v53 = vpop.f32.mrf.mxu0  ;;  %v8019_v59 = vadd.f32 %v8018_v51, %v8017_v34 }
 0x6d1   :  { %v8020_v30 = vpop.f32.mrf.mxu1  ;;  %v2973_v16 = vadd.f32 %v7997_v27, %v2932_v5 }
 0x6d2   :  { %v7999_v56 = vpop.f32.mrf.mxu0 }
 0x6d3   :  { %v8000_v62 = vadd.f32 %v7999_v56, %v7998_v53  ;;  %v8021_v44 = vpop.f32.mrf.mxu1  ;;  %v3014_v13 = vadd.f32 %v8019_v59, %v2973_v16 }
 0x6d4   :  { %v8022_v0 = vadd.f32 %v8021_v44, %v8020_v30 }
 0x6d5   :  { %v2976_v14 = vadd.f32 %v8000_v62, %v2935_v58 }
 0x6d7   :  { %v3017_v31 = vadd.f32 %v8022_v0, %v2976_v14 }
 0x6ec   :  { %v8039_v48 = vpop.f32.mrf.mxu0 }
 0x6ed   :  { %v8061_v49 = vpop.f32.mrf.mxu1 }
 0x6ee   :  { %v8040_v41 = vpop.f32.mrf.mxu0 }
 0x6ef   :  { %v8041_v4 = vadd.f32 %v8040_v41, %v8039_v48  ;;  %v8062_v8 = vpop.f32.mrf.mxu1 }
 0x6f0   :  { %v8042_v60 = vpop.f32.mrf.mxu0  ;;  %v8063_v50 = vadd.f32 %v8062_v8, %v8061_v49 }
 0x6f1   :  { %v3055_v10 = vadd.f32 %v8041_v4, %v3014_v13  ;;  %v8064_v61 = vpop.f32.mrf.mxu1 }
 0x6f2   :  { %v8043_v54 = vpop.f32.mrf.mxu0 }
 0x6f3   :  { %v3096_v9 = vadd.f32 %v8063_v50, %v3055_v10  ;;  %v8044_v12 = vadd.f32 %v8043_v54, %v8042_v60  ;;  %v8065_v34 = vpop.f32.mrf.mxu1 }
 0x6f4   :  { %v8066_v15 = vadd.f32 %v8065_v34, %v8064_v61 }
 0x6f5   :  { %v3102_v17 = vadd.f32 %v7104_v47, %v3096_v9  ;;  %v3058_v32 = vadd.f32 %v8044_v12, %v3017_v31 }
 0x6f7   :  { %v3106_v33 = vcombine.high %v3102_v17, %v3102_v17  ;;  %v3113_v51 = vrot.slane %v3102_v17, %v8805_v20  ;;  %v3099_v53 = vadd.f32 %v8066_v15, %v3058_v32 }
 0x6f9   :  { %v3120_v24 = vrot.slane %v3106_v33, %v8805_v20  ;;  %v3121_v45 = vcombine.high %v3113_v51, %v3113_v51  ;;  %v3103_v18 = vadd.f32 %v7104_v47, %v3099_v53  ;;  %v3148_v52 = vadd.f32 %v3113_v51, %v9081_v19 }
 0x6fb   :  { %v3123_v27 = vcombine.high %v3103_v18, %v3103_v18  ;;  %v3130_v30 = vrot.slane %v3103_v18, %v8805_v20  ;;  %v3122_v56 = vcombine.high %v3120_v24, %v3120_v24  ;;  %v3149_v5 = vadd.f32 %v3121_v45, %v9083_v21 }
 0x6fc   :  { %v3150_v42 = vadd.f32 %v3120_v24, %v9085_v22 }
 0x6fd   :  { %v3137_v43 = vrot.slane %v3123_v27, %v8805_v20  ;;  %v3138_v16 = vcombine.high %v3130_v30, %v3130_v30  ;;  %v3151_v62 = vadd.f32 %v3122_v56, %v9087_v23  ;;  %v3166_v44 = vcombine.low %v3148_v52, %v3149_v5 }
 0x6fe   :  { %v3152_v59 = vadd.f32 %v3130_v30, %v9093_v2 }
 0x6ff   :  { %v3167_v48 = vcombine.low %v3150_v42, %v3151_v62  ;;  %v3139_v58 = vcombine.high %v3137_v43, %v3137_v43  ;;  %v3153_v19 = vadd.f32 %v3138_v16, %v9095_v6  ;;  %v3174_v49 = vrot.slane %v3166_v44, %v8805_v20 }
 0x700   :  { %v3154_v21 = vadd.f32 %v3137_v43, %v9097_v28 }
 0x701   :  { %v3181_v41 = vrot.slane %v3167_v48, %v8805_v20  ;;  %v3155_v22 = vadd.f32 %v3139_v58, %v9099_v29  ;;  %v3183_v13 = vcombine.low %v3152_v59, %v3153_v19 }
 0x703   :  { %v3182_v14 = vcombine.low %v3174_v49, %v3181_v41  ;;  %v3184_v4 = vcombine.low %v3154_v21, %v3155_v22  ;;  %v3191_v8 = vrot.slane %v3183_v13, %v8805_v20 }
 0x705   :  { %v3202_v23 = vsel %vm239_vm0, %v3182_v14, 0.0  ;;  %v3198_v60 = vrot.slane %v3184_v4, %v8805_v20  ;;  %v8472_v14 = vld [vmem:[%s10872_s1 + $0xa8] ss:$12 sps:$4 sm:$0xff]   ;;  %v8474_v4 = vld [vmem:[%s10872_s1 + $0xac] ss:$12 sps:$4 sm:$0xff]  }
 0x706   :  { %3203 = vadd.xlane.f32.xlu0 %v3202_v23  ;;  %v8475_v23 = vld [vmem:[%s10872_s1 + $0xb0] ss:$12 sps:$4 sm:$0xff]   ;;  %3645 = vmatprep.subr.bf16.mxu0 %v8474_v4 }
 0x707   :  { %v3199_v2 = vcombine.low %v3191_v8, %v3198_v60  ;;  %v8478_v8 = vld [vmem:[%s10872_s1 + $0x94] ss:$12 sps:$4 sm:$0xff]   ;;  %8282 = vmatpush3.bf16.msra.mxu1 %v8475_v23  ;;  %v8479_v60 = vld [vmem:[%s10872_s1 + $0x98] ss:$12 sps:$4 sm:$0xff]   ;;  %3646 = vmatpush1.bf16.msra.mxu0 %v8472_v14 }
 0x708   :  { %8283 = vmatprep.subr.bf16.mxu1 %v8684_v11  ;;  %3647 = vmatprep.subr.bf16.mxu0 %v8478_v8 }
 0x709   :  { %v3205_v6 = vsel %vm239_vm0, %v3199_v2, 0.0  ;;  %v8476_v2 = vld [vmem:[%s10872_s1 + $0x90] ss:$12 sps:$4 sm:$0xff]  }
 0x70a   :  { %3206 = vadd.xlane.f32.xlu1 %v3205_v6  ;;  %v8482_v6 = vld [vmem:[%s10872_s1 + $0x7c] ss:$12 sps:$4 sm:$0xff]  }
 0x70b   :  { %8284 = vmatpush3.bf16.msra.mxu1 %v8479_v60  ;;  %3648 = vmatpush1.bf16.msra.mxu0 %v8476_v2 }
 0x70c   :  { %8285 = vmatprep.subr.bf16.mxu1 %v8684_v11  ;;  %3649 = vmatprep.subr.bf16.mxu0 %v8482_v6 }
 0x78f   :  { %v3204_v0 = vpop.xlane.xlu0 %3203 }
 0x790   :  { %v3208_v10 = vmul.f32 0.015625, %v3204_v0  ;;  %v8483_v0 = vld [vmem:[%s10872_s1 + $0x80] ss:$12 sps:$4 sm:$0xff]  }
 0x791   :  { %8286 = vmatpush3.bf16.msra.mxu1 %v8483_v0 }
 0x792   :  { %v3218_v28 = vrot.slane %v3208_v10, %v8922_v35  ;;  %v3225_v29 = vrot.slane %v3208_v10, %v8925_v36  ;;  %v3232_v50 = vrot.slane %v3208_v10, %v8928_v37  ;;  %v3239_v61 = vrot.slane %v3208_v10, %v8931_v38  ;;  %v8480_v10 = vld [vmem:[%s10872_s1 + $0x78] ss:$12 sps:$4 sm:$0xff]   ;;  %8287 = vmatprep.subr.bf16.mxu1 %v8684_v11 }
 0x793   :  { %v3207_v47 = vpop.xlane.xlu1 %3206  ;;  %3650 = vmatpush1.bf16.msra.mxu0 %v8480_v10 }
 0x794   :  { %v3209_v54 = vmul.f32 0.015625, %v3207_v47  ;;  %v9771_v31 = vsub.f32 %v3148_v52, %v3218_v28  ;;  %v9773_v9 = vsub.f32 %v3149_v5, %v3225_v29  ;;  %v9775_v12 = vsub.f32 %v3150_v42, %v3232_v50  ;;  %v8486_v28 = vld [vmem:[%s10872_s1 + $0x64] ss:$12 sps:$4 sm:$0xff]   ;;  %v8487_v29 = vld [vmem:[%s10872_s1 + $0x68] ss:$12 sps:$4 sm:$0xff]  }
 0x795   :  { %v9777_v34 = vsub.f32 %v3151_v62, %v3239_v61  ;;  %v8484_v50 = vld [vmem:[%s10872_s1 + $0x60] ss:$12 sps:$4 sm:$0xff]   ;;  %3651 = vmatprep.subr.bf16.mxu0 %v8486_v28  ;;  %8288 = vmatpush3.bf16.msra.mxu1 %v8487_v29 }
 0x796   :  { %v3246_v17 = vrot.slane %v3209_v54, %v8922_v35  ;;  %v3253_v32 = vrot.slane %v3209_v54, %v8925_v36  ;;  %v3260_v15 = vrot.slane %v3209_v54, %v8928_v37  ;;  %v3267_v33 = vrot.slane %v3209_v54, %v8931_v38  ;;  %8299 = vmatprep.subr.bf16.mxu1 %v8684_v11 }
 0x797   :  { %v3284_v51 = vmul.f32 %v9771_v31, %v9771_v31  ;;  %v3285_v53 = vmul.f32 %v9773_v9, %v9773_v9  ;;  %v3286_v24 = vmul.f32 %v9775_v12, %v9775_v12  ;;  %v3287_v45 = vmul.f32 %v9777_v34, %v9777_v34  ;;  %3652 = vmatpush1.bf16.msra.mxu0 %v8484_v50 }
 0x798   :  { %v9791_v18 = vsub.f32 %v3152_v59, %v3246_v17  ;;  %v9793_v52 = vsub.f32 %v3153_v19, %v3253_v32  ;;  %v9795_v27 = vsub.f32 %v3154_v21, %v3260_v15  ;;  %v9797_v30 = vsub.f32 %v3155_v22, %v3267_v33  ;;  %8293 = vmatprep.subr.bf16.mxu0 %v8684_v11  ;;  %v7305_v33 = vld [vmem:[%s10880_s9] ss:$0 sm:$0xff] }
 0x799   :  { %v3300_v56 = vcombine.low %v3284_v51, %v3285_v53  ;;  %v3301_v5 = vcombine.low %v3286_v24, %v3287_v45  ;;  %v7306_v51 = vld [vmem:[%s10881_s10] ss:$0 sm:$0xff]  ;;  %v3427_v53 = vcombine.high %v7305_v33, %v7305_v33  ;;  %v3434_v45 = vrot.slane %v7305_v33, %v8805_v20 }
 0x79a   :  { %v3288_v42 = vmul.f32 %v9791_v18, %v9791_v18  ;;  %v3289_v43 = vmul.f32 %v9793_v52, %v9793_v52  ;;  %v3290_v16 = vmul.f32 %v9795_v27, %v9795_v27  ;;  %v3291_v62 = vmul.f32 %v9797_v30, %v9797_v30 }
 0x79b   :  { %v3308_v44 = vrot.slane %v3300_v56, %v8805_v20  ;;  %v3315_v48 = vrot.slane %v3301_v5, %v8805_v20  ;;  %v3461_v24 = vcombine.high %v7306_v51, %v7306_v51  ;;  %v3441_v56 = vrot.slane %v3427_v53, %v8805_v20 }
 0x79c   :  { %v3317_v58 = vcombine.low %v3288_v42, %v3289_v43  ;;  %v3318_v59 = vcombine.low %v3290_v16, %v3291_v62  ;;  %v3468_v5 = vrot.slane %v7306_v51, %v8805_v20  ;;  %v3442_v16 = vcombine.high %v3434_v45, %v3434_v45 }
 0x79d   :  { %v3316_v19 = vcombine.low %v3308_v44, %v3315_v48  ;;  %v3475_v42 = vrot.slane %v3461_v24, %v8805_v20  ;;  %v3443_v62 = vcombine.high %v3441_v56, %v3441_v56 }
 0x79e   :  { %v3325_v49 = vrot.slane %v3317_v58, %v8805_v20  ;;  %v3332_v41 = vrot.slane %v3318_v59, %v8805_v20 }
 0x79f   :  { %v3336_v21 = vsel %vm239_vm0, %v3316_v19, 0.0  ;;  %v3476_v19 = vcombine.high %v3468_v5, %v3468_v5 }
 0x7a0   :  { %3337 = vadd.xlane.f32.xlu0 %v3336_v21  ;;  %v3333_v22 = vcombine.low %v3325_v49, %v3332_v41  ;;  %v3477_v49 = vcombine.high %v3475_v42, %v3475_v42 }
 0x7a2   :  { %v3339_v13 = vsel %vm239_vm0, %v3333_v22, 0.0 }
 0x7a3   :  { %3340 = vadd.xlane.f32.xlu1 %v3339_v13 }
 0x829   :  { %v3338_v61 = vpop.xlane.xlu0 %3337 }
 0x82a   :  { %v3342_v47 = vmul.f32 0.015625, %v3338_v61 }
 0x82c   :  { %v3344_v54 = vadd.f32 1e-05, %v3342_v47  ;;  %v3341_v17 = vpop.xlane.xlu1 %3340 }
 0x82d   :  { %v3343_v32 = vmul.f32 0.015625, %v3341_v17 }
 0x82e   :  { %8632 = vrsqrt.f32 %v3344_v54 }
 0x82f   :  { %v3345_v15 = vadd.f32 1e-05, %v3343_v32 }
 0x831   :  { %8634 = vrsqrt.f32 %v3345_v15 }
 0x83b   :  { %v8633_v43 = vpop.eup %8632 }
 0x83c   :  { %v3356_v44 = vrot.slane %v8633_v43, %v8922_v35  ;;  %v3363_v48 = vrot.slane %v8633_v43, %v8925_v36  ;;  %v3370_v58 = vrot.slane %v8633_v43, %v8928_v37  ;;  %v3377_v59 = vrot.slane %v8633_v43, %v8931_v38 }
 0x83e   :  { %v8635_v41 = vpop.eup %8634  ;;  %v3414_v21 = vmul.f32 %v3356_v44, %v9771_v31  ;;  %v3415_v22 = vmul.f32 %v3363_v48, %v9773_v9  ;;  %v3416_v13 = vmul.f32 %v3370_v58, %v9775_v12  ;;  %v3417_v14 = vmul.f32 %v3377_v59, %v9777_v34 }
 0x83f   :  { %v3384_v4 = vrot.slane %v8635_v41, %v8922_v35  ;;  %v3391_v23 = vrot.slane %v8635_v41, %v8925_v36  ;;  %v3398_v8 = vrot.slane %v8635_v41, %v8928_v37  ;;  %v3405_v60 = vrot.slane %v8635_v41, %v8931_v38 }
 0x840   :  { %v3448_v2 = vmul.f32 %v3434_v45, %v3414_v21  ;;  %v3449_v6 = vmul.f32 %v3442_v16, %v3415_v22  ;;  %v3450_v0 = vmul.f32 %v3441_v56, %v3416_v13  ;;  %v3451_v10 = vmul.f32 %v3443_v62, %v3417_v14 }
 0x841   :  { %v3418_v31 = vmul.f32 %v3384_v4, %v9791_v18  ;;  %v3419_v9 = vmul.f32 %v3391_v23, %v9793_v52  ;;  %v3420_v12 = vmul.f32 %v3398_v8, %v9795_v27  ;;  %v3421_v34 = vmul.f32 %v3405_v60, %v9797_v30 }
 0x842   :  { %v9880_v28 = vadd.f32 %v3468_v5, %v3448_v2  ;;  %v9882_v29 = vadd.f32 %v3476_v19, %v3449_v6  ;;  %v9884_v50 = vadd.f32 %v3475_v42, %v3450_v0  ;;  %v9886_v61 = vadd.f32 %v3477_v49, %v3451_v10 }
 0x843   :  { %v3452_v47 = vmul.f32 %v3434_v45, %v3418_v31  ;;  %v3453_v54 = vmul.f32 %v3442_v16, %v3419_v9  ;;  %v3454_v17 = vmul.f32 %v3441_v56, %v3420_v12  ;;  %v3455_v32 = vmul.f32 %v3443_v62, %v3421_v34  ;;  %v7323_v62 = vld [vmem:[%s10873_s2 + $0x3] sm:$0x7] }
 0x844   :  { %v3498_v18 = vcombine.low %v9880_v28, %v9882_v29  ;;  %v3499_v52 = vcombine.low %v9884_v50, %v9886_v61  ;;  %v3566_v58 = vrot.slane %v7323_v62, %v8863_v55  ;;  %v3558_v6 = vrot.slane %v7323_v62, %v8854_v46 }
 0x845   :  { %v9892_v27 = vadd.f32 %v3468_v5, %v3452_v47  ;;  %v9894_v30 = vadd.f32 %v3476_v19, %v3453_v54  ;;  %v9896_v15 = vadd.f32 %v3475_v42, %v3454_v17  ;;  %v9898_v33 = vadd.f32 %v3477_v49, %v3455_v32 }
 0x846   :  { %v3506_v51 = vrot.slane %v3498_v18, %v8805_v20  ;;  %v3513_v53 = vrot.slane %v3499_v52, %v8805_v20  ;;  %v3562_v49 = vrot.slane %v7323_v62, %v8847_v39 }
 0x847   :  { %v3515_v24 = vcombine.low %v9892_v27, %v9894_v30  ;;  %v3516_v45 = vcombine.low %v9896_v15, %v9898_v33 }
 0x848   :  { %v3514_v43 = vcombine.low %v3506_v51, %v3513_v53 }
 0x849   :  { %v3523_v56 = vrot.slane %v3515_v24, %v8805_v20  ;;  %v3530_v5 = vrot.slane %v3516_v45, %v8805_v20 }
 0x84b   :  { %v3531_v16 = vcombine.low %v3523_v56, %v3530_v5 }
 0x84d   :  { %v3534_v42 = vpack.c.bf16 %v3531_v16, %v3514_v43 }
 0x84f   :  { %7336 = vmatmul.mubr.msk.bf16.vlgmr.msra.gmra.mxu0 %vm239_vm0, %v3534_v42  ;;  %8290 = vmatmul.mubr.msk.bf16.vlgmr.msra.gmra.mxu1 %vm239_vm0, %v3534_v42 }
 0x850   :  { %8295 = vmatprep.mubr.msk.bf16.mxu0 %vm8685_vm1, %v8684_v11  ;;  %8301 = vmatprep.mubr.msk.bf16.mxu1 %vm8685_vm1, %v8684_v11 }
 0x90f   :  { %v3671_v44 = vpop.f32.mrf.mxu0  ;;  %v3714_v48 = vpop.f32.mrf.mxu1 }
 0x910   :  { %v3715_v22 = vadd.f32 %v3714_v48, %v3566_v58  ;;  %v3672_v31 = vadd.f32 %v3671_v44, %v3558_v6 }
 0x911   :  { %v3673_v59 = vpop.f32.mrf.mxu0  ;;  %v8291_v19 = vpop.f32.mrf.mxu1 }
 0x912   :  { %v3674_v23 = vadd.f32 %v3673_v59, %v3562_v49 }
 0x913   :  { %v3675_v41 = vpop.f32.mrf.mxu0  ;;  %v3717_v21 = vpop.f32.mrf.mxu1 }
 0x914   :  { %v3718_v13 = vadd.f32 %v3717_v21, %v3566_v58  ;;  %v3676_v10 = vadd.f32 %v3675_v41, %v3558_v6 }
 0x915   :  { %v3677_v14 = vpop.f32.mrf.mxu0  ;;  %v8292_v4 = vpop.f32.mrf.mxu1 }
 0x916   :  { %v3723_v8 = vpack.c.bf16 %v3718_v13, %v3715_v22  ;;  %v3678_v60 = vadd.f32 %v3677_v14, %v3562_v49  ;;  %v3721_v9 = vpack.c.bf16 %v3676_v10, %v3672_v31 }
 0x918   :  { %v3722_v2 = vpack.c.bf16 %v3678_v60, %v3674_v23  ;;  %8300 = vmatpush3.bf16.msra.mxu1 %v3723_v8 }
 0x91a   :  { %v3728_v0 = vsel %vm239_vm0, %v3722_v2, 0 }
 0x91b   :  { %8294 = vmatpush3.bf16.xpose.msra.mxu0 %v3728_v0 }
 0x922   :  { %8296 = vmatmul.mubr.msk.bf16.vlgmr.msra.gmra.mxu0 %vm239_vm0, %v3721_v9 }
 0x923   :  { %4787 = vmatprep.mubr.bf16.mxu0 %v8682_v3 }
 0x9e2   :  { %v3764_v12 = vpop.f32.mrf.mxu0 }
 0x9e3   :  { %v3771_v34 = vsel %vm8869_vm2, %v3764_v12, -1e+30 }
 0x9e4   :  { %v8297_v47 = vpop.f32.mrf.mxu0  ;;  %v3773_v54 = vsel %vm379_vm3, %v3771_v34, -inf }
 0x9e5   :  { %3774 = vmax.xlane.f32.xlu0 %v3773_v54 }
 0x9e6   :  { %v3767_v17 = vpop.f32.mrf.mxu0 }
 0x9e7   :  { %v3772_v32 = vsel %vm8876_vm4, %v3767_v17, -1e+30 }
 0x9e8   :  { %v8298_v18 = vpop.f32.mrf.mxu0  ;;  %v3776_v52 = vsel %vm379_vm3, %v3772_v32, -inf }
 0x9e9   :  { %3777 = vmax.xlane.f32.xlu1 %v3776_v52 }
 0xa6e   :  { %v3775_v51 = vpop.xlane.xlu0 %3774 }
 0xa6f   :  { %v3779_v53 = vsub.f32 %v3771_v34, %v3775_v51 }
 0xa71   :  { %v3781_v24 = vmul.f32 1.442695, %v3779_v53 }
 0xa72   :  { %v3778_v45 = vpop.xlane.xlu1 %3777 }
 0xa73   :  { %8636 = vpow2.f32 %v3781_v24  ;;  %v3780_v56 = vsub.f32 %v3772_v32, %v3778_v45 }
 0xa75   :  { %v3783_v7 = vmul.f32 1.442695, %v3780_v56 }
 0xa77   :  { %8638 = vpow2.f32 %v3783_v7 }
 0xa80   :  { %v8637_v5 = vpop.eup %8636 }
 0xa81   :  { %v3785_v43 = vsel %vm379_vm3, %v8637_v5, 0.0 }
 0xa82   :  { %3786 = vadd.xlane.f32.xlu0 %v3785_v43 }
 0xa84   :  { %v8639_v16 = vpop.eup %8638 }
 0xa85   :  { %v3788_v1 = vsel %vm379_vm3, %v8639_v16, 0.0 }
 0xa86   :  { %3789 = vadd.xlane.f32.xlu1 %v3788_v1 }
 0xb0b   :  { %v3787_v42 = vpop.xlane.xlu0 %3786 }
 0xb0c   :  { %8640 = vrcp.f32 %v3787_v42 }
 0xb0f   :  { %v3790_v62 = vpop.xlane.xlu1 %3789 }
 0xb10   :  { %8642 = vrcp.f32 %v3790_v62 }
 0xb19   :  { %v8641_v44 = vpop.eup %8640 }
 0xb1a   :  { %v3793_v58 = vmul.f32 %v8641_v44, %v8637_v5 }
 0xb1d   :  { %v8643_v48 = vpop.eup %8642 }
 0xb1e   :  { %v3794_v59 = vmul.f32 %v8643_v48, %v8639_v16 }
 0xb20   :  { %v3795_v19 = vpack.c.bf16 %v3794_v59, %v3793_v58 }
 0xb22   :  { %8302 = vmatmul.mubr.msk.bf16.vlgmr.msra.gmra.mxu1 %vm379_vm3, %v3795_v19 }
 0xb23   :  { %4830 = vmatprep.mubr.bf16.mxu1 %v8682_v3 }
 0xbe2   :  { %v3833_v49 = vpop.f32.mrf.mxu1 }
 0xbe3   :  { %v3842_v41 = vcombine.high %v3833_v49, %v3833_v49  ;;  %v3849_v21 = vrot.slane %v3833_v49, %v8805_v20 }
 0xbe4   :  { %v8303_v22 = vpop.f32.mrf.mxu1 }
 0xbe5   :  { %v3856_v13 = vrot.slane %v3842_v41, %v8805_v20  ;;  %v3857_v14 = vcombine.high %v3849_v21, %v3849_v21  ;;  %v3884_v8 = vadd.f32 %v3849_v21, %v9880_v28 }
 0xbe6   :  { %v3836_v4 = vpop.f32.mrf.mxu1 }
 0xbe7   :  { %v3858_v23 = vcombine.high %v3856_v13, %v3856_v13  ;;  %v3885_v60 = vadd.f32 %v3857_v14, %v9882_v29  ;;  %v3859_v2 = vcombine.high %v3836_v4, %v3836_v4  ;;  %v3866_v6 = vrot.slane %v3836_v4, %v8805_v20 }
 0xbe8   :  { %v8304_v0 = vpop.f32.mrf.mxu1  ;;  %v3886_v10 = vadd.f32 %v3856_v13, %v9884_v50 }
 0xbe9   :  { %v3887_v31 = vadd.f32 %v3858_v23, %v9886_v61  ;;  %v3904_v9 = vcombine.low %v3884_v8, %v3885_v60  ;;  %v3873_v12 = vrot.slane %v3859_v2, %v8805_v20  ;;  %v3874_v34 = vcombine.high %v3866_v6, %v3866_v6 }
 0xbea   :  { %v3888_v17 = vadd.f32 %v3866_v6, %v9892_v27 }
 0xbeb   :  { %v3875_v47 = vcombine.high %v3873_v12, %v3873_v12  ;;  %v3905_v54 = vcombine.low %v3886_v10, %v3887_v31  ;;  %v3889_v28 = vadd.f32 %v3874_v34, %v9894_v30  ;;  %v3890_v29 = vadd.f32 %v3873_v12, %v9896_v15 }
 0xbec   :  { %v3912_v18 = vrot.slane %v3904_v9, %v8805_v20 }
 0xbed   :  { %v3891_v32 = vadd.f32 %v3875_v47, %v9898_v33  ;;  %v3919_v50 = vrot.slane %v3905_v54, %v8805_v20  ;;  %v3921_v52 = vcombine.low %v3888_v17, %v3889_v28 }
 0xbef   :  { %v3920_v61 = vcombine.low %v3912_v18, %v3919_v50  ;;  %v3922_v51 = vcombine.low %v3890_v29, %v3891_v32  ;;  %v3929_v24 = vrot.slane %v3921_v52, %v8805_v20  ;;  %v7394_v50 = vld [vmem:[%s10874_s3 + $0x380] sm:$0xff] }
 0xbf0   :  { %v7402_v52 = vld [vmem:[%s10874_s3 + $0x3c0] sm:$0xff] }
 0xbf1   :  { %v3940_v53 = vsel %vm239_vm0, %v3920_v61, 0.0  ;;  %v3936_v45 = vrot.slane %v3922_v51, %v8805_v20  ;;  %v7395_v61 = vld [vmem:[%s10874_s3 + $0x388] sm:$0xff]  ;;  %v7460_v51 = vcombine.low %v7394_v50, %v7402_v52 }
 0xbf2   :  { %3941 = vadd.xlane.f32.xlu0 %v3940_v53  ;;  %v7461_v53 = vcombine.high %v7394_v50, %v7402_v52 }
 0xbf3   :  { %v3937_v27 = vcombine.low %v3929_v24, %v3936_v45  ;;  %v7403_v24 = vld [vmem:[%s10874_s3 + $0x3c8] sm:$0xff]  ;;  %v7378_v45 = vld [vmem:[%s10874_s3 + $0x300] sm:$0xff] }
 0xbf4   :  { %4763 = vmatprep.subr.bf16.mxu0 %v7461_v53 }
 0xbf5   :  { %v3943_v30 = vsel %vm239_vm0, %v3937_v27, 0.0  ;;  %v7386_v27 = vld [vmem:[%s10874_s3 + $0x340] sm:$0xff]  ;;  %4764 = vmatpush1.bf16.msra.mxu0 %v7460_v51 }
 0xbf6   :  { %3944 = vadd.xlane.f32.xlu1 %v3943_v30  ;;  %v7462_v30 = vcombine.low %v7395_v61, %v7403_v24 }
 0xc7b   :  { %v3942_v15 = vpop.xlane.xlu0 %3941 }
 0xc7c   :  { %v3946_v33 = vmul.f32 0.015625, %v3942_v15  ;;  %v7463_v15 = vcombine.high %v7395_v61, %v7403_v24  ;;  %v7342_v24 = vld [vmem:[%s10878_s7 + $0x1] ss:$0 sm:$0xff] }
 0xc7e   :  { %v3956_v56 = vrot.slane %v3946_v33, %v8922_v35  ;;  %v3963_v7 = vrot.slane %v3946_v33, %v8925_v36  ;;  %v3970_v5 = vrot.slane %v3946_v33, %v8928_v37  ;;  %v3977_v43 = vrot.slane %v3946_v33, %v8931_v38  ;;  %4806 = vmatprep.subr.bf16.mxu1 %v7463_v15 }
 0xc7f   :  { %v3945_v16 = vpop.xlane.xlu1 %3944  ;;  %v7445_v33 = vcombine.high %v7378_v45, %v7386_v27  ;;  %4807 = vmatpush1.bf16.msra.mxu1 %v7462_v30  ;;  %v4172_v15 = vrot.slane %v7342_v24, %v8805_v20 }
 0xc80   :  { %v3947_v1 = vmul.f32 0.015625, %v3945_v16  ;;  %v9955_v42 = vsub.f32 %v3884_v8, %v3956_v56  ;;  %v9957_v62 = vsub.f32 %v3885_v60, %v3963_v7  ;;  %v9959_v44 = vsub.f32 %v3886_v10, %v3970_v5  ;;  %v7379_v56 = vld [vmem:[%s10874_s3 + $0x308] sm:$0xff]  ;;  %v7362_v5 = vld [vmem:[%s10874_s3 + $0x280] sm:$0xff] }
 0xc81   :  { %v9961_v48 = vsub.f32 %v3887_v31, %v3977_v43  ;;  %v7387_v7 = vld [vmem:[%s10874_s3 + $0x348] sm:$0xff]  ;;  %v7370_v16 = vld [vmem:[%s10874_s3 + $0x2c0] sm:$0xff]  ;;  %4765 = vmatprep.subr.bf16.mxu0 %v7445_v33 }
 0xc82   :  { %v3984_v58 = vrot.slane %v3947_v1, %v8922_v35  ;;  %v3991_v59 = vrot.slane %v3947_v1, %v8925_v36  ;;  %v3998_v19 = vrot.slane %v3947_v1, %v8928_v37  ;;  %v4005_v49 = vrot.slane %v3947_v1, %v8931_v38  ;;  %v7363_v1 = vld [vmem:[%s10874_s3 + $0x288] sm:$0xff] }
 0xc83   :  { %v4022_v41 = vmul.f32 %v9955_v42, %v9955_v42  ;;  %v4023_v21 = vmul.f32 %v9957_v62, %v9957_v62  ;;  %v4024_v22 = vmul.f32 %v9959_v44, %v9959_v44  ;;  %v4025_v13 = vmul.f32 %v9961_v48, %v9961_v48 }
 0xc84   :  { %v9975_v14 = vsub.f32 %v3888_v17, %v3984_v58  ;;  %v9977_v4 = vsub.f32 %v3889_v28, %v3991_v59  ;;  %v9979_v23 = vsub.f32 %v3890_v29, %v3998_v19  ;;  %v9981_v8 = vsub.f32 %v3891_v32, %v4005_v49  ;;  %v7371_v58 = vld [vmem:[%s10874_s3 + $0x2c8] sm:$0xff] }
 0xc85   :  { %v4038_v60 = vcombine.low %v4022_v41, %v4023_v21  ;;  %v4039_v2 = vcombine.low %v4024_v22, %v4025_v13  ;;  %v7447_v43 = vcombine.high %v7379_v56, %v7387_v7  ;;  %v7444_v59 = vcombine.low %v7378_v45, %v7386_v27  ;;  %v7346_v41 = vld [vmem:[%s10874_s3 + $0x200] sm:$0xff]  ;;  %v10039_v21 = vld [vmem:[%s10874_s3 + $0x390] sm:$0xff] }
 0xc86   :  { %v4026_v6 = vmul.f32 %v9975_v14, %v9975_v14  ;;  %v4027_v0 = vmul.f32 %v9977_v4, %v9977_v4  ;;  %v4028_v10 = vmul.f32 %v9979_v23, %v9979_v23  ;;  %v4029_v31 = vmul.f32 %v9981_v8, %v9981_v8  ;;  %v10044_v22 = vld [vmem:[%s10874_s3 + $0x3d0] sm:$0xff]  ;;  %v7343_v45 = vld [vmem:[%s10879_s8 + $0x1] ss:$0 sm:$0xff] }
 0xc87   :  { %v4046_v9 = vrot.slane %v4038_v60, %v8805_v20  ;;  %v4053_v12 = vrot.slane %v4039_v2, %v8805_v20  ;;  %v7446_v19 = vcombine.low %v7379_v56, %v7387_v7  ;;  %v7429_v49 = vcombine.high %v7362_v5, %v7370_v16  ;;  %4808 = vmatprep.subr.bf16.mxu1 %v7447_v43  ;;  %v7354_v60 = vld [vmem:[%s10874_s3 + $0x240] sm:$0xff] }
 0xc88   :  { %v4055_v34 = vcombine.low %v4026_v6, %v4027_v0  ;;  %v4056_v47 = vcombine.low %v4028_v10, %v4029_v31  ;;  %v7431_v13 = vcombine.high %v7363_v1, %v7371_v58  ;;  %v7464_v2 = vcombine.low %v10039_v21, %v10044_v22  ;;  %v10054_v6 = vld [vmem:[%s10874_s3 + $0x398] sm:$0xff]  ;;  %v7347_v10 = vld [vmem:[%s10874_s3 + $0x208] sm:$0xff]  ;;  %4766 = vmatpush1.bf16.msra.mxu0 %v7444_v59 }
 0xc89   :  { %v4054_v54 = vcombine.low %v4046_v9, %v4053_v12  ;;  %v10059_v0 = vld [vmem:[%s10874_s3 + $0x3d8] sm:$0xff]  ;;  %v7355_v31 = vld [vmem:[%s10874_s3 + $0x248] sm:$0xff]  ;;  %v7428_v12 = vcombine.low %v7362_v5, %v7370_v16  ;;  %4809 = vmatpush1.bf16.msra.mxu1 %v7446_v19  ;;  %4767 = vmatprep.subr.bf16.mxu0 %v7429_v49  ;;  %v4165_v27 = vcombine.high %v7342_v24, %v7342_v24 }
 0xc8a   :  { %v4063_v17 = vrot.slane %v4055_v34, %v8805_v20  ;;  %v4070_v28 = vrot.slane %v4056_v47, %v8805_v20  ;;  %v7466_v9 = vcombine.low %v10054_v6, %v10059_v0  ;;  %v7430_v34 = vcombine.low %v7363_v1, %v7371_v58  ;;  %4810 = vmatprep.subr.bf16.mxu1 %v7431_v13 }
 0xc8b   :  { %v4074_v29 = vsel %vm239_vm0, %v4054_v54, 0.0  ;;  %v7413_v47 = vcombine.high %v7346_v41, %v7354_v60  ;;  %v7415_v54 = vcombine.high %v7347_v10, %v7355_v31  ;;  %v4199_v30 = vcombine.high %v7343_v45, %v7343_v45 }
 0xc8c   :  { %4075 = vadd.xlane.f32.xlu0 %v4074_v29  ;;  %v4071_v32 = vcombine.low %v4063_v17, %v4070_v28  ;;  %4768 = vmatpush1.bf16.msra.mxu0 %v7428_v12  ;;  %v7412_v17 = vcombine.low %v7346_v41, %v7354_v60  ;;  %v7414_v28 = vcombine.low %v7347_v10, %v7355_v31 }
 0xc8d   :  { %4811 = vmatpush1.bf16.msra.mxu1 %v7430_v34  ;;  %4769 = vmatprep.subr.bf16.mxu0 %v7413_v47  ;;  %v7465_v29 = vcombine.high %v10039_v21, %v10044_v22  ;;  %v4179_v33 = vrot.slane %v4165_v27, %v8805_v20  ;;  %v4206_v56 = vrot.slane %v7343_v45, %v8805_v20  ;;  %v7349_v21 = vld [vmem:[%s10874_s3 + $0x218] sm:$0xff] }
 0xc8e   :  { %v4077_v18 = vsel %vm239_vm0, %v4071_v32, 0.0  ;;  %4812 = vmatprep.subr.bf16.mxu1 %v7415_v54  ;;  %v7467_v32 = vcombine.high %v10054_v6, %v10059_v0  ;;  %v4213_v7 = vrot.slane %v4199_v30, %v8805_v20  ;;  %v4180_v43 = vcombine.high %v4172_v15, %v4172_v15  ;;  %v7357_v22 = vld [vmem:[%s10874_s3 + $0x258] sm:$0xff] }
 0xc8f   :  { %4078 = vadd.xlane.f32.xlu1 %v4077_v18  ;;  %v4181_v16 = vcombine.high %v4179_v33, %v4179_v33  ;;  %v4214_v49 = vcombine.high %v4206_v56, %v4206_v56 }
 0xc90   :  { %4770 = vmatpush1.bf16.msra.mxu0 %v7412_v17  ;;  %v4215_v41 = vcombine.high %v4213_v7, %v4213_v7 }
 0xc91   :  { %4813 = vmatpush1.bf16.msra.mxu1 %v7414_v28  ;;  %4849 = vmatprep.subr.bf16.mxu0 %v7465_v29 }
 0xc92   :  { %4892 = vmatprep.subr.bf16.mxu1 %v7467_v32 }
 0xd15   :  { %v4076_v18 = vpop.xlane.xlu0 %4075 }
 0xd16   :  { %v4080_v50 = vmul.f32 0.015625, %v4076_v18 }
 0xd18   :  { %v4082_v52 = vadd.f32 1e-05, %v4080_v50  ;;  %v4079_v61 = vpop.xlane.xlu1 %4078 }
 0xd19   :  { %v4081_v51 = vmul.f32 0.015625, %v4079_v61 }
 0xd1a   :  { %8644 = vrsqrt.f32 %v4082_v52 }
 0xd1b   :  { %v4083_v53 = vadd.f32 1e-05, %v4081_v51 }
 0xd1d   :  { %8646 = vrsqrt.f32 %v4083_v53 }
 0xd27   :  { %v8645_v5 = vpop.eup %8644 }
 0xd28   :  { %v4094_v1 = vrot.slane %v8645_v5, %v8922_v35  ;;  %v4101_v58 = vrot.slane %v8645_v5, %v8925_v36  ;;  %v4108_v59 = vrot.slane %v8645_v5, %v8928_v37  ;;  %v4115_v19 = vrot.slane %v8645_v5, %v8931_v38 }
 0xd2a   :  { %v8647_v13 = vpop.eup %8646  ;;  %v4152_v60 = vmul.f32 %v4094_v1, %v9955_v42  ;;  %v4153_v10 = vmul.f32 %v4101_v58, %v9957_v62  ;;  %v4154_v31 = vmul.f32 %v4108_v59, %v9959_v44  ;;  %v4155_v12 = vmul.f32 %v4115_v19, %v9961_v48  ;;  %v7388_v58 = vld [vmem:[%s10874_s3 + $0x350] sm:$0xff]  ;;  %v7381_v59 = vld [vmem:[%s10874_s3 + $0x318] sm:$0xff] }
 0xd2b   :  { %v4122_v34 = vrot.slane %v8647_v13, %v8922_v35  ;;  %v4129_v47 = vrot.slane %v8647_v13, %v8925_v36  ;;  %v4136_v54 = vrot.slane %v8647_v13, %v8928_v37  ;;  %v4143_v17 = vrot.slane %v8647_v13, %v8931_v38  ;;  %v7389_v19 = vld [vmem:[%s10874_s3 + $0x358] sm:$0xff] }
 0xd2c   :  { %v4186_v28 = vmul.f32 %v4172_v15, %v4152_v60  ;;  %v4187_v29 = vmul.f32 %v4180_v43, %v4153_v10  ;;  %v4188_v32 = vmul.f32 %v4179_v33, %v4154_v31  ;;  %v4189_v18 = vmul.f32 %v4181_v16, %v4155_v12  ;;  %v7364_v31 = vld [vmem:[%s10874_s3 + $0x290] sm:$0xff] }
 0xd2d   :  { %v4156_v42 = vmul.f32 %v4122_v34, %v9975_v14  ;;  %v4157_v62 = vmul.f32 %v4129_v47, %v9977_v4  ;;  %v4158_v44 = vmul.f32 %v4136_v54, %v9979_v23  ;;  %v4159_v48 = vmul.f32 %v4143_v17, %v9981_v8  ;;  %v7372_v12 = vld [vmem:[%s10874_s3 + $0x2d0] sm:$0xff]  ;;  %v7365_v34 = vld [vmem:[%s10874_s3 + $0x298] sm:$0xff] }
 0xd2e   :  { %v10099_v50 = vadd.f32 %v4206_v56, %v4186_v28  ;;  %v10101_v52 = vadd.f32 %v4214_v49, %v4187_v29  ;;  %v10103_v61 = vadd.f32 %v4213_v7, %v4188_v32  ;;  %v10105_v51 = vadd.f32 %v4215_v41, %v4189_v18  ;;  %v7373_v47 = vld [vmem:[%s10874_s3 + $0x2d8] sm:$0xff]  ;;  %v7348_v32 = vld [vmem:[%s10874_s3 + $0x210] sm:$0xff] }
 0xd2f   :  { %v4190_v53 = vmul.f32 %v4172_v15, %v4156_v42  ;;  %v4191_v24 = vmul.f32 %v4180_v43, %v4157_v62  ;;  %v4192_v45 = vmul.f32 %v4179_v33, %v4158_v44  ;;  %v4193_v27 = vmul.f32 %v4181_v16, %v4159_v48  ;;  %v7356_v18 = vld [vmem:[%s10874_s3 + $0x250] sm:$0xff]  ;;  %v7398_v42 = vld [vmem:[%s10874_s3 + $0x3a0] sm:$0xff]  ;;  %v7399_v44 = vld [vmem:[%s10874_s3 + $0x3a8] sm:$0xff] }
 0xd30   :  { %v4245_v14 = vcombine.low %v10099_v50, %v10101_v52  ;;  %v4246_v4 = vcombine.low %v10103_v61, %v10105_v51  ;;  %v7451_v10 = vcombine.high %v7381_v59, %v7389_v19  ;;  %v7450_v17 = vcombine.low %v7381_v59, %v7389_v19  ;;  %v7406_v62 = vld [vmem:[%s10874_s3 + $0x3e0] sm:$0xff]  ;;  %v7407_v48 = vld [vmem:[%s10874_s3 + $0x3e8] sm:$0xff] }
 0xd31   :  { %v10111_v23 = vadd.f32 %v4206_v56, %v4190_v53  ;;  %v10113_v8 = vadd.f32 %v4214_v49, %v4191_v24  ;;  %v10115_v30 = vadd.f32 %v4213_v7, %v4192_v45  ;;  %v10117_v5 = vadd.f32 %v4215_v41, %v4193_v27  ;;  %v7380_v7 = vld [vmem:[%s10874_s3 + $0x310] sm:$0xff]  ;;  %v7367_v59 = vld [vmem:[%s10874_s3 + $0x2a8] sm:$0xff] }
 0xd32   :  { %v4253_v1 = vrot.slane %v4245_v14, %v8805_v20  ;;  %v4260_v15 = vrot.slane %v4246_v4, %v8805_v20  ;;  %v7449_v60 = vcombine.high %v7380_v7, %v7388_v58  ;;  %v7448_v54 = vcombine.low %v7380_v7, %v7388_v58  ;;  %v7382_v14 = vld [vmem:[%s10874_s3 + $0x320] sm:$0xff]  ;;  %v7375_v19 = vld [vmem:[%s10874_s3 + $0x2e8] sm:$0xff] }
 0xd33   :  { %v4262_v33 = vcombine.low %v10111_v23, %v10113_v8  ;;  %v4263_v43 = vcombine.low %v10115_v30, %v10117_v5  ;;  %v7433_v28 = vcombine.high %v7364_v31, %v7372_v12  ;;  %v7435_v29 = vcombine.high %v7365_v34, %v7373_v47  ;;  %v7390_v4 = vld [vmem:[%s10874_s3 + $0x360] sm:$0xff] }
 0xd34   :  { %v4261_v49 = vcombine.low %v4253_v1, %v4260_v15  ;;  %v7434_v6 = vcombine.low %v7365_v34, %v7373_v47  ;;  %v7417_v0 = vcombine.high %v7348_v32, %v7356_v18  ;;  %v7416_v53 = vcombine.low %v7348_v32, %v7356_v18  ;;  %v7383_v1 = vld [vmem:[%s10874_s3 + $0x328] sm:$0xff]  ;;  %v7366_v7 = vld [vmem:[%s10874_s3 + $0x2a0] sm:$0xff]  ;;  %v7400_v32 = vld [vmem:[%s10874_s3 + $0x3b0] sm:$0xff] }
 0xd35   :  { %v4270_v16 = vrot.slane %v4262_v33, %v8805_v20  ;;  %v4277_v56 = vrot.slane %v4263_v43, %v8805_v20  ;;  %v7418_v24 = vcombine.low %v7349_v21, %v7357_v22  ;;  %v7469_v45 = vcombine.high %v7398_v42, %v7406_v62  ;;  %v7391_v15 = vld [vmem:[%s10874_s3 + $0x368] sm:$0xff]  ;;  %v7374_v58 = vld [vmem:[%s10874_s3 + $0x2e0] sm:$0xff]  ;;  %v7408_v18 = vld [vmem:[%s10874_s3 + $0x3f0] sm:$0xff] }
 0xd36   :  { %v7471_v27 = vcombine.high %v7399_v44, %v7407_v48  ;;  %v7468_v33 = vcombine.low %v7398_v42, %v7406_v62  ;;  %v7470_v43 = vcombine.low %v7399_v44, %v7407_v48  ;;  %v7351_v34 = vld [vmem:[%s10874_s3 + $0x228] sm:$0xff]  ;;  %v7384_v42 = vld [vmem:[%s10874_s3 + $0x330] sm:$0xff]  ;;  %v7385_v44 = vld [vmem:[%s10874_s3 + $0x338] sm:$0xff] }
 0xd37   :  { %v4278_v41 = vcombine.low %v4270_v16, %v4277_v56  ;;  %v7453_v16 = vcombine.high %v7382_v14, %v7390_v4  ;;  %v7455_v56 = vcombine.high %v7383_v1, %v7391_v15  ;;  %v7359_v47 = vld [vmem:[%s10874_s3 + $0x268] sm:$0xff]  ;;  %v7392_v62 = vld [vmem:[%s10874_s3 + $0x370] sm:$0xff]  ;;  %v7393_v48 = vld [vmem:[%s10874_s3 + $0x378] sm:$0xff] }
 0xd39   :  { %v10139_v13 = vpack.c.bf16 %v4278_v41, %v4261_v49  ;;  %v7452_v49 = vcombine.low %v7382_v14, %v7390_v4  ;;  %v7454_v41 = vcombine.low %v7383_v1, %v7391_v15  ;;  %v7368_v14 = vld [vmem:[%s10874_s3 + $0x2b0] sm:$0xff]  ;;  %v7369_v1 = vld [vmem:[%s10874_s3 + $0x2b8] sm:$0xff] }
 0xd3a   :  { %v7376_v4 = vld [vmem:[%s10874_s3 + $0x2f0] sm:$0xff]  ;;  %v7377_v15 = vld [vmem:[%s10874_s3 + $0x2f8] sm:$0xff] }
 0xd3b   :  { %7476 = vmatmul.mubr.msk.bf16.vlgmr.msra.gmra.mxu0 %vm239_vm0, %v10139_v13  ;;  %7477 = vmatmul.mubr.msk.bf16.vlgmr.msra.gmra.mxu1 %vm239_vm0, %v10139_v13 }
 0xd3c   :  { %4850 = vmatpush1.bf16.msra.mxu0 %v7464_v2  ;;  %4893 = vmatpush1.bf16.msra.mxu1 %v7466_v9  ;;  %v7432_v2 = vcombine.low %v7364_v31, %v7372_v12  ;;  %v7419_v9 = vcombine.high %v7349_v21, %v7357_v22  ;;  %v7350_v31 = vld [vmem:[%s10874_s3 + $0x220] sm:$0xff]  ;;  %v7401_v21 = vld [vmem:[%s10874_s3 + $0x3b8] sm:$0xff] }
 0xd3d   :  { %4851 = vmatprep.subr.bf16.mxu0 %v7449_v60  ;;  %4894 = vmatprep.subr.bf16.mxu1 %v7451_v10  ;;  %v7437_v60 = vcombine.high %v7366_v7, %v7374_v58  ;;  %v7439_v10 = vcombine.high %v7367_v59, %v7375_v19  ;;  %v7358_v12 = vld [vmem:[%s10874_s3 + $0x260] sm:$0xff]  ;;  %v7409_v22 = vld [vmem:[%s10874_s3 + $0x3f8] sm:$0xff] }
 0xd3e   :  { %4873 = vmatprep.mubr.bf16.mxu0 %v8682_v3  ;;  %4916 = vmatprep.mubr.bf16.mxu1 %v8682_v3 }
 0xd40   :  { %4852 = vmatpush1.bf16.msra.mxu0 %v7448_v54  ;;  %4895 = vmatpush1.bf16.msra.mxu1 %v7450_v17  ;;  %v7436_v54 = vcombine.low %v7366_v7, %v7374_v58  ;;  %v7438_v17 = vcombine.low %v7367_v59, %v7375_v19  ;;  %v7352_v7 = vld [vmem:[%s10874_s3 + $0x230] sm:$0xff]  ;;  %v7353_v59 = vld [vmem:[%s10874_s3 + $0x238] sm:$0xff] }
 0xd41   :  { %4853 = vmatprep.subr.bf16.mxu0 %v7433_v28  ;;  %4896 = vmatprep.subr.bf16.mxu1 %v7435_v29  ;;  %v7421_v28 = vcombine.high %v7350_v31, %v7358_v12  ;;  %v7423_v29 = vcombine.high %v7351_v34, %v7359_v47  ;;  %v7360_v58 = vld [vmem:[%s10874_s3 + $0x270] sm:$0xff]  ;;  %v7361_v19 = vld [vmem:[%s10874_s3 + $0x278] sm:$0xff] }
 0xd44   :  { %4854 = vmatpush1.bf16.msra.mxu0 %v7432_v2  ;;  %4897 = vmatpush1.bf16.msra.mxu1 %v7434_v6  ;;  %v7420_v2 = vcombine.low %v7350_v31, %v7358_v12  ;;  %v7422_v6 = vcombine.low %v7351_v34, %v7359_v47  ;;  %v7424_v31 = vcombine.low %v7352_v7, %v7360_v58  ;;  %v8488_v34 = vld [vmem:[%s10876_s5 + $0x478] sm:$0xff]  }
 0xd45   :  { %4855 = vmatprep.subr.bf16.mxu0 %v7417_v0  ;;  %4898 = vmatprep.subr.bf16.mxu1 %v7419_v9  ;;  %v7473_v0 = vcombine.high %v7400_v32, %v7408_v18  ;;  %v7475_v9 = vcombine.high %v7401_v21, %v7409_v22  ;;  %v7426_v12 = vcombine.low %v7353_v59, %v7361_v19  ;;  %v8490_v47 = vld [vmem:[%s10876_s5 + $0x438] sm:$0xff]  }
 0xd48   :  { %4856 = vmatpush1.bf16.msra.mxu0 %v7416_v53  ;;  %4899 = vmatpush1.bf16.msra.mxu1 %v7418_v24  ;;  %v7472_v53 = vcombine.low %v7400_v32, %v7408_v18  ;;  %v7474_v24 = vcombine.low %v7401_v21, %v7409_v22  ;;  %v8495_v32 = vld [vmem:[%s10876_s5 + $0x4b0] sm:$0xff]   ;;  %v8496_v18 = vld [vmem:[%s10876_s5 + $0x468] sm:$0xff]  }
 0xd49   :  { %4935 = vmatprep.subr.bf16.mxu0 %v7469_v45  ;;  %4978 = vmatprep.subr.bf16.mxu1 %v7471_v27  ;;  %v7457_v45 = vcombine.high %v7384_v42, %v7392_v62  ;;  %v7459_v27 = vcombine.high %v7385_v44, %v7393_v48  ;;  %v8498_v21 = vld [vmem:[%s10876_s5 + $0x428] sm:$0xff]  }
 0xd4a   :  { %v8499_v22 = vld [vmem:[%s10876_s5 + $0x4a8] sm:$0xff]  }
 0xd4b   :  { %7478 = vmatmul.mubr.msk.bf16.vlgmr.msra.gmra.mxu0 %vm239_vm0, %v10139_v13  ;;  %7479 = vmatmul.mubr.msk.bf16.vlgmr.msra.gmra.mxu1 %vm239_vm0, %v10139_v13 }
 0xd4c   :  { %4936 = vmatpush1.bf16.msra.mxu0 %v7468_v33  ;;  %4979 = vmatpush1.bf16.msra.mxu1 %v7470_v43  ;;  %v7456_v33 = vcombine.low %v7384_v42, %v7392_v62  ;;  %v7458_v43 = vcombine.low %v7385_v44, %v7393_v48  ;;  %v8504_v42 = vld [vmem:[%s10876_s5 + $0x458] sm:$0xff]  }
 0xd4d   :  { %4937 = vmatprep.subr.bf16.mxu0 %v7453_v16  ;;  %4980 = vmatprep.subr.bf16.mxu1 %v7455_v56  ;;  %v7441_v16 = vcombine.high %v7368_v14, %v7376_v4  ;;  %v7443_v56 = vcombine.high %v7369_v1, %v7377_v15  ;;  %v8505_v62 = vld [vmem:[%s10876_s5 + $0x4d8] sm:$0xff]  }
 0xd4e   :  { %4959 = vmatprep.mubr.bf16.mxu0 %v8682_v3  ;;  %5002 = vmatprep.mubr.bf16.mxu1 %v8682_v3  ;;  %v8506_v44 = vld [vmem:[%s10876_s5 + $0x418] sm:$0xff]  }
 0xd4f   :  { %v8507_v48 = vld [vmem:[%s10876_s5 + $0x498] sm:$0xff]  }
 0xd50   :  { %4938 = vmatpush1.bf16.msra.mxu0 %v7452_v49  ;;  %4981 = vmatpush1.bf16.msra.mxu1 %v7454_v41  ;;  %v7440_v49 = vcombine.low %v7368_v14, %v7376_v4  ;;  %v7442_v41 = vcombine.low %v7369_v1, %v7377_v15  ;;  %v8512_v14 = vld [vmem:[%s10876_s5 + $0x448] sm:$0xff]  }
 0xd51   :  { %4939 = vmatprep.subr.bf16.mxu0 %v7437_v60  ;;  %4982 = vmatprep.subr.bf16.mxu1 %v7439_v10  ;;  %v7425_v60 = vcombine.high %v7352_v7, %v7360_v58  ;;  %v7427_v10 = vcombine.high %v7353_v59, %v7361_v19  ;;  %v8513_v4 = vld [vmem:[%s10876_s5 + $0x4c8] sm:$0xff]   ;;  %v8520_v7 = vld [vmem:[%s10876_s5 + $0x578] sm:$0xff]   ;;  %v10394_v59 = vld [vmem:[%s10875_s4 + $0x10] sm:$0xff] }
 0xd52   :  { %v8514_v1 = vld [vmem:[%s10876_s5 + $0x408] sm:$0xff]   ;;  %v8521_v58 = vld [vmem:[%s10876_s5 + $0x5f8] sm:$0xff]  }
 0xd53   :  { %v8515_v15 = vld [vmem:[%s10876_s5 + $0x488] sm:$0xff]  }
 0xd54   :  { %4940 = vmatpush1.bf16.msra.mxu0 %v7436_v54  ;;  %4983 = vmatpush1.bf16.msra.mxu1 %v7438_v17  ;;  %v8491_v54 = vld [vmem:[%s10876_s5 + $0x4b8] sm:$0xff]   ;;  %v8492_v17 = vld [vmem:[%s10876_s5 + $0x470] sm:$0xff]  }
 0xd55   :  { %4941 = vmatprep.subr.bf16.mxu0 %v7421_v28  ;;  %4984 = vmatprep.subr.bf16.mxu1 %v7423_v29  ;;  %v8493_v28 = vld [vmem:[%s10876_s5 + $0x4f0] sm:$0xff]  }
 0xd56   :  { %v8494_v29 = vld [vmem:[%s10876_s5 + $0x430] sm:$0xff]  }
 0xd58   :  { %4942 = vmatpush1.bf16.msra.mxu0 %v7420_v2  ;;  %4985 = vmatpush1.bf16.msra.mxu1 %v7422_v6  ;;  %v8500_v2 = vld [vmem:[%s10876_s5 + $0x460] sm:$0xff]  }
 0xd59   :  { %5021 = vmatprep.subr.bf16.mxu0 %v7473_v0  ;;  %5064 = vmatprep.subr.bf16.mxu1 %v7475_v9  ;;  %v8501_v6 = vld [vmem:[%s10876_s5 + $0x4e0] sm:$0xff]  }
 0xd5a   :  { %v8502_v0 = vld [vmem:[%s10876_s5 + $0x420] sm:$0xff]  }
 0xd5b   :  { %7480 = vmatmul.mubr.msk.bf16.vlgmr.msra.gmra.mxu0 %vm239_vm0, %v10139_v13  ;;  %7481 = vmatmul.mubr.msk.bf16.vlgmr.msra.gmra.mxu1 %vm239_vm0, %v10139_v13  ;;  %v8503_v9 = vld [vmem:[%s10876_s5 + $0x4a0] sm:$0xff]  }
 0xd5c   :  { %5022 = vmatpush1.bf16.msra.mxu0 %v7472_v53  ;;  %5065 = vmatpush1.bf16.msra.mxu1 %v7474_v24  ;;  %v8508_v53 = vld [vmem:[%s10876_s5 + $0x450] sm:$0xff]  }
 0xd5d   :  { %5023 = vmatprep.subr.bf16.mxu0 %v7457_v45  ;;  %5066 = vmatprep.subr.bf16.mxu1 %v7459_v27  ;;  %v8509_v24 = vld [vmem:[%s10876_s5 + $0x4d0] sm:$0xff]  }
 0xd5e   :  { %5045 = vmatprep.mubr.bf16.mxu0 %v8682_v3  ;;  %5088 = vmatprep.mubr.bf16.mxu1 %v8682_v3  ;;  %v8489_v3 = vld [vmem:[%s10876_s5 + $0x4f8] sm:$0xff]   ;;  %v8510_v45 = vld [vmem:[%s10876_s5 + $0x410] sm:$0xff]  }
 0xd5f   :  { %v8511_v27 = vld [vmem:[%s10876_s5 + $0x490] sm:$0xff]  }
 0xd60   :  { %5024 = vmatpush1.bf16.msra.mxu0 %v7456_v33  ;;  %5067 = vmatpush1.bf16.msra.mxu1 %v7458_v43  ;;  %v8516_v33 = vld [vmem:[%s10876_s5 + $0x440] sm:$0xff]  }
 0xd61   :  { %5025 = vmatprep.subr.bf16.mxu0 %v7441_v16  ;;  %5068 = vmatprep.subr.bf16.mxu1 %v7443_v56  ;;  %v8517_v43 = vld [vmem:[%s10876_s5 + $0x4c0] sm:$0xff]  }
 0xd62   :  { %v8518_v16 = vld [vmem:[%s10876_s5 + $0x400] sm:$0xff]  }
 0xd63   :  { %v8519_v56 = vld [vmem:[%s10876_s5 + $0x480] sm:$0xff]  }
 0xd64   :  { %5026 = vmatpush1.bf16.msra.mxu0 %v7440_v49  ;;  %5069 = vmatpush1.bf16.msra.mxu1 %v7442_v41  ;;  %v4359_v41 = vrot.slane %v10394_v59, %v8847_v39 }
 0xd65   :  { %5027 = vmatprep.subr.bf16.mxu0 %v7425_v60  ;;  %5070 = vmatprep.subr.bf16.mxu1 %v7427_v10  ;;  %v4367_v60 = vrot.slane %v10394_v59, %v9374_v40  ;;  %v4355_v10 = vrot.slane %v10394_v59, %v8854_v46 }
 0xd68   :  { %5028 = vmatpush1.bf16.msra.mxu0 %v7424_v31  ;;  %5071 = vmatpush1.bf16.msra.mxu1 %v7426_v12  ;;  %v4363_v31 = vrot.slane %v10394_v59, %v8863_v55 }
 0xd69   :  { %8076 = vmatprep.subr.bf16.mxu0 %v8488_v34  ;;  %8098 = vmatprep.subr.bf16.mxu1 %v8489_v3 }
 0xd6b   :  { %7482 = vmatmul.mubr.msk.bf16.vlgmr.msra.gmra.mxu0 %vm239_vm0, %v10139_v13  ;;  %7483 = vmatmul.mubr.msk.bf16.vlgmr.msra.gmra.mxu1 %vm239_vm0, %v10139_v13  ;;  %v8497_v13 = vld [vmem:[%s10876_s5 + $0x4e8] sm:$0xff]  }
 0xd6c   :  { %8077 = vmatpush3.bf16.msra.mxu0 %v8490_v47  ;;  %8099 = vmatpush3.bf16.msra.mxu1 %v8491_v54 }
 0xd6d   :  { %8078 = vmatprep.subr.bf16.mxu0 %v8492_v17  ;;  %8100 = vmatprep.subr.bf16.mxu1 %v8493_v28 }
 0xd70   :  { %8079 = vmatpush3.bf16.msra.mxu0 %v8494_v29  ;;  %8101 = vmatpush3.bf16.msra.mxu1 %v8495_v32 }
 0xd71   :  { %8080 = vmatprep.subr.bf16.mxu0 %v8496_v18  ;;  %8102 = vmatprep.subr.bf16.mxu1 %v8497_v13 }
 0xd74   :  { %8081 = vmatpush3.bf16.msra.mxu0 %v8498_v21  ;;  %8103 = vmatpush3.bf16.msra.mxu1 %v8499_v22 }
 0xd75   :  { %8082 = vmatprep.subr.bf16.mxu0 %v8500_v2  ;;  %8104 = vmatprep.subr.bf16.mxu1 %v8501_v6 }
 0xd78   :  { %8083 = vmatpush3.bf16.msra.mxu0 %v8502_v0  ;;  %8105 = vmatpush3.bf16.msra.mxu1 %v8503_v9 }
 0xd79   :  { %8084 = vmatprep.subr.bf16.mxu0 %v8504_v42  ;;  %8106 = vmatprep.subr.bf16.mxu1 %v8505_v62 }
 0xd7c   :  { %8085 = vmatpush3.bf16.msra.mxu0 %v8506_v44  ;;  %8107 = vmatpush3.bf16.msra.mxu1 %v8507_v48 }
 0xd7d   :  { %8086 = vmatprep.subr.bf16.mxu0 %v8508_v53  ;;  %8108 = vmatprep.subr.bf16.mxu1 %v8509_v24 }
 0xd80   :  { %8087 = vmatpush3.bf16.msra.mxu0 %v8510_v45  ;;  %8109 = vmatpush3.bf16.msra.mxu1 %v8511_v27  ;;  %v8522_v27 = vld [vmem:[%s10876_s5 + $0x538] sm:$0xff]  }
 0xd81   :  { %8088 = vmatprep.subr.bf16.mxu0 %v8512_v14  ;;  %8110 = vmatprep.subr.bf16.mxu1 %v8513_v4  ;;  %v8523_v14 = vld [vmem:[%s10876_s5 + $0x5b8] sm:$0xff]  }
 0xd84   :  { %8089 = vmatpush3.bf16.msra.mxu0 %v8514_v1  ;;  %8111 = vmatpush3.bf16.msra.mxu1 %v8515_v15  ;;  %v8524_v15 = vld [vmem:[%s10876_s5 + $0x570] sm:$0xff]  }
 0xd85   :  { %8090 = vmatprep.subr.bf16.mxu0 %v8516_v33  ;;  %8112 = vmatprep.subr.bf16.mxu1 %v8517_v43  ;;  %v8525_v33 = vld [vmem:[%s10876_s5 + $0x5f0] sm:$0xff]  }
 0xd86   :  { %v8526_v43 = vld [vmem:[%s10876_s5 + $0x530] sm:$0xff]  }
 0xd88   :  { %8091 = vmatpush3.bf16.msra.mxu0 %v8518_v16  ;;  %8113 = vmatpush3.bf16.msra.mxu1 %v8519_v56  ;;  %v8527_v16 = vld [vmem:[%s10876_s5 + $0x5b0] sm:$0xff]  }
 0xd89   :  { %8120 = vmatprep.subr.bf16.mxu0 %v8520_v7  ;;  %8142 = vmatprep.subr.bf16.mxu1 %v8521_v58  ;;  %v8528_v58 = vld [vmem:[%s10876_s5 + $0x568] sm:$0xff]  }
 0xdfb   :  { %v4789_v19 = vpop.f32.mrf.mxu0  ;;  %v4832_v49 = vpop.f32.mrf.mxu1 }
 0xdfc   :  { %v4790_v32 = vadd.f32 %v4789_v19, %v4355_v10  ;;  %v4833_v18 = vadd.f32 %v4832_v49, %v4363_v31  ;;  %v8529_v19 = vld [vmem:[%s10876_s5 + $0x5e8] sm:$0xff]   ;;  %v4375_v49 = vrot.slane %v10394_v59, %v9402_v57 }
 0xdfd   :  { %v4791_v12 = vpop.f32.mrf.mxu0  ;;  %v4834_v34 = vpop.f32.mrf.mxu1 }
 0xdfe   :  { %v4792_v54 = vadd.f32 %v4791_v12, %v4359_v41  ;;  %v4835_v17 = vadd.f32 %v4834_v34, %v4367_v60  ;;  %v5099_v48 = vmax.f32 %v4790_v32, 0.0  ;;  %v5101_v53 = vmax.f32 %v4833_v18, 0.0  ;;  %v8531_v12 = vld [vmem:[%s10876_s5 + $0x5a8] sm:$0xff]  }
 0xdff   :  { %v4793_v3 = vpop.f32.mrf.mxu0  ;;  %v4836_v47 = vpop.f32.mrf.mxu1 }
 0xe00   :  { %v4794_v28 = vadd.f32 %v4793_v3, %v4355_v10  ;;  %v4837_v29 = vadd.f32 %v4836_v47, %v4363_v31  ;;  %v5100_v9 = vmax.f32 %v4792_v54, 0.0  ;;  %v5102_v42 = vmax.f32 %v4835_v17, 0.0  ;;  %v8530_v31 = vld [vmem:[%s10876_s5 + $0x528] sm:$0xff]   ;;  %v8532_v47 = vld [vmem:[%s10876_s5 + $0x560] sm:$0xff]  }
 0xe01   :  { %v4795_v13 = vpop.f32.mrf.mxu0  ;;  %v4838_v21 = vpop.f32.mrf.mxu1  ;;  %v8533_v54 = vld [vmem:[%s10876_s5 + $0x5e0] sm:$0xff]  }
 0xe02   :  { %v4796_v22 = vadd.f32 %v4795_v13, %v4359_v41  ;;  %v4839_v2 = vadd.f32 %v4838_v21, %v4367_v60  ;;  %v5115_v6 = vmax.f32 %v4794_v28, 0.0  ;;  %v5117_v0 = vmax.f32 %v4837_v29, 0.0  ;;  %v8534_v21 = vld [vmem:[%s10876_s5 + $0x520] sm:$0xff]  }
 0xe03   :  { %v4383_v41 = vrot.slane %v10394_v59, %v9405_v63 }
 0xe04   :  { %v5116_v62 = vmax.f32 %v4796_v22, 0.0  ;;  %v5118_v44 = vmax.f32 %v4839_v2, 0.0  ;;  %v5131_v4 = vpack.c.bf16 %v5115_v6, %v5099_v48  ;;  %v5133_v1 = vpack.c.bf16 %v5117_v0, %v5101_v53  ;;  %v8535_v22 = vld [vmem:[%s10876_s5 + $0x5a0] sm:$0xff]   ;;  %v8536_v2 = vld [vmem:[%s10876_s5 + $0x558] sm:$0xff]  }
 0xe05   :  { %v8537_v6 = vld [vmem:[%s10876_s5 + $0x5d8] sm:$0xff]  }
 0xe06   :  { %v5132_v24 = vpack.c.bf16 %v5116_v62, %v5100_v9  ;;  %v5134_v45 = vpack.c.bf16 %v5118_v44, %v5102_v42  ;;  %v8538_v53 = vld [vmem:[%s10876_s5 + $0x518] sm:$0xff]  }
 0xe08   :  { %6204 = vmatprep.mubr.bf16.mxu0 %v5132_v24  ;;  %6245 = vmatprep.mubr.bf16.mxu1 %v5134_v45  ;;  %v8539_v24 = vld [vmem:[%s10876_s5 + $0x598] sm:$0xff]   ;;  %v8540_v45 = vld [vmem:[%s10876_s5 + $0x550] sm:$0xff]  }
 0xe09   :  { %6205 = vmatmul.mubr.bf16.vlgmr.msra.gmra.mxu0 %v5131_v4  ;;  %6246 = vmatmul.mubr.bf16.vlgmr.msra.gmra.mxu1 %v5133_v1  ;;  %v8543_v4 = vld [vmem:[%s10876_s5 + $0x590] sm:$0xff]  }
 0xe0a   :  { %8121 = vmatpush3.bf16.msra.mxu0 %v8522_v27  ;;  %8143 = vmatpush3.bf16.msra.mxu1 %v8523_v14  ;;  %v8541_v27 = vld [vmem:[%s10876_s5 + $0x5d0] sm:$0xff]  }
 0xe0b   :  { %v10422_v56 = vpop.f32.mrf.mxu0  ;;  %v10424_v7 = vpop.f32.mrf.mxu1  ;;  %8122 = vmatprep.subr.bf16.mxu0 %v8524_v15  ;;  %8144 = vmatprep.subr.bf16.mxu1 %v8525_v33  ;;  %v8542_v14 = vld [vmem:[%s10876_s5 + $0x510] sm:$0xff]   ;;  %v8544_v33 = vld [vmem:[%s10876_s5 + $0x548] sm:$0xff]  }
 0xe0d   :  { %v4877_v60 = vpop.f32.mrf.mxu0  ;;  %v4920_v10 = vpop.f32.mrf.mxu1 }
 0xe0e   :  { %8123 = vmatpush3.bf16.msra.mxu0 %v8526_v43  ;;  %8145 = vmatpush3.bf16.msra.mxu1 %v8527_v16  ;;  %v4878_v17 = vadd.f32 %v4877_v60, %v4375_v49  ;;  %v4921_v28 = vadd.f32 %v4920_v10, %v4383_v41  ;;  %v8545_v43 = vld [vmem:[%s10876_s5 + $0x5c8] sm:$0xff]   ;;  %v4371_v16 = vrot.slane %v10394_v59, %v9464_v25 }
 0xe0f   :  { %v4879_v34 = vpop.f32.mrf.mxu0  ;;  %v4922_v3 = vpop.f32.mrf.mxu1  ;;  %8124 = vmatprep.subr.bf16.mxu0 %v8528_v58  ;;  %8146 = vmatprep.subr.bf16.mxu1 %v8529_v19  ;;  %v4379_v58 = vrot.slane %v10394_v59, %v9467_v26  ;;  %v10495_v19 = vld [vmem:[%s10875_s4 + $0x18] sm:$0xff]  ;;  %v8546_v10 = vld [vmem:[%s10876_s5 + $0x508] sm:$0xff]  }
 0xe10   :  { %v5104_v0 = vmax.f32 %v4878_v17, 0.0  ;;  %v5106_v9 = vmax.f32 %v4921_v28, 0.0  ;;  %v4391_v60 = vrot.slane %v10495_v19, %v8847_v39  ;;  %v8547_v59 = vld [vmem:[%s10876_s5 + $0x588] sm:$0xff]   ;;  %v8548_v39 = vld [vmem:[%s10876_s5 + $0x540] sm:$0xff]  }
 0xe11   :  { %v4881_v29 = vpop.f32.mrf.mxu0  ;;  %v4924_v32 = vpop.f32.mrf.mxu1  ;;  %v8549_v28 = vld [vmem:[%s10876_s5 + $0x5c0] sm:$0xff]  }
 0xe12   :  { %v4882_v18 = vadd.f32 %v4881_v29, %v4375_v49  ;;  %v4925_v13 = vadd.f32 %v4924_v32, %v4383_v41  ;;  %8125 = vmatpush3.bf16.msra.mxu0 %v8530_v31  ;;  %8147 = vmatpush3.bf16.msra.mxu1 %v8531_v12  ;;  %v4880_v31 = vadd.f32 %v4879_v34, %v4371_v16 }
 0xe13   :  { %8126 = vmatprep.subr.bf16.mxu0 %v8532_v47  ;;  %8148 = vmatprep.subr.bf16.mxu1 %v8533_v54  ;;  %v4923_v12 = vadd.f32 %v4922_v3, %v4379_v58  ;;  %v4399_v47 = vrot.slane %v10495_v19, %v9374_v40  ;;  %v4876_v34 = vadd.f32 %v10422_v56, %v4371_v16 }
 0xe14   :  { %v5120_v42 = vmax.f32 %v4882_v18, 0.0  ;;  %v5122_v62 = vmax.f32 %v4925_v13, 0.0  ;;  %v4919_v3 = vadd.f32 %v10424_v7, %v4379_v58  ;;  %v8552_v7 = vld [vmem:[%s10876_s5 + $0x678] sm:$0xff]   ;;  %v8558_v58 = vld [vmem:[%s10876_s5 + $0x630] sm:$0xff]  }
 0xe16   :  { %v5136_v44 = vpack.c.bf16 %v5120_v42, %v5104_v0  ;;  %v5138_v48 = vpack.c.bf16 %v5122_v62, %v5106_v9  ;;  %8127 = vmatpush3.bf16.msra.mxu0 %v8534_v21  ;;  %8149 = vmatpush3.bf16.msra.mxu1 %v8535_v22  ;;  %v8550_v21 = vld [vmem:[%s10876_s5 + $0x500] sm:$0xff]   ;;  %v8553_v0 = vld [vmem:[%s10876_s5 + $0x6f8] sm:$0xff]   ;;  %v5103_v42 = vmax.f32 %v4876_v34, 0.0  ;;  %v5105_v62 = vmax.f32 %v4919_v3, 0.0 }
 0xe17   :  { %8128 = vmatprep.subr.bf16.mxu0 %v8536_v2  ;;  %8150 = vmatprep.subr.bf16.mxu1 %v8537_v6  ;;  %v8551_v22 = vld [vmem:[%s10876_s5 + $0x580] sm:$0xff]   ;;  %v5119_v2 = vmax.f32 %v4880_v31, 0.0  ;;  %v5121_v6 = vmax.f32 %v4923_v12, 0.0  ;;  %v8568_v3 = vld [vmem:[%s10876_s5 + $0x658] sm:$0xff]  }
 0xe18   :  { %6286 = vmatprep.mubr.bf16.mxu0 %v5136_v44  ;;  %6327 = vmatprep.mubr.bf16.mxu1 %v5138_v48  ;;  %v8564_v31 = vld [vmem:[%s10876_s5 + $0x660] sm:$0xff]  }
 0xe19   :  { %v8565_v12 = vld [vmem:[%s10876_s5 + $0x6e0] sm:$0xff]  }
 0xe1a   :  { %8129 = vmatpush3.bf16.msra.mxu0 %v8538_v53  ;;  %8151 = vmatpush3.bf16.msra.mxu1 %v8539_v24  ;;  %v8554_v53 = vld [vmem:[%s10876_s5 + $0x638] sm:$0xff]   ;;  %v5135_v24 = vpack.c.bf16 %v5119_v2, %v5103_v42  ;;  %v8567_v34 = vld [vmem:[%s10876_s5 + $0x6a0] sm:$0xff]   ;;  %v4387_v42 = vrot.slane %v10495_v19, %v8854_v46  ;;  %v8579_v46 = vld [vmem:[%s10876_s5 + $0x688] sm:$0xff]  }
 0xe1b   :  { %v10478_v1 = vpop.f32.mrf.mxu0  ;;  %v10480_v15 = vpop.f32.mrf.mxu1  ;;  %8130 = vmatprep.subr.bf16.mxu0 %v8540_v45  ;;  %8152 = vmatprep.subr.bf16.mxu1 %v8541_v27  ;;  %v5137_v45 = vpack.c.bf16 %v5121_v6, %v5105_v62  ;;  %v8574_v6 = vld [vmem:[%s10876_s5 + $0x610] sm:$0xff]   ;;  %v4395_v62 = vrot.slane %v10495_v19, %v8863_v55  ;;  %v8580_v55 = vld [vmem:[%s10876_s5 + $0x640] sm:$0xff]  }
 0xe1d   :  { %v4963_v49 = vpop.f32.mrf.mxu0  ;;  %v5006_v41 = vpop.f32.mrf.mxu1 }
 0xe1e   :  { %8131 = vmatpush3.bf16.msra.mxu0 %v8542_v14  ;;  %8153 = vmatpush3.bf16.msra.mxu1 %v8543_v4  ;;  %v4964_v32 = vadd.f32 %v4963_v49, %v4391_v60  ;;  %v5007_v56 = vadd.f32 %v5006_v41, %v4399_v47  ;;  %v8555_v14 = vld [vmem:[%s10876_s5 + $0x6b8] sm:$0xff]   ;;  %v8559_v49 = vld [vmem:[%s10876_s5 + $0x6b0] sm:$0xff]   ;;  %v8560_v41 = vld [vmem:[%s10876_s5 + $0x668] sm:$0xff]  }
 0xe1f   :  { %v10507_v54 = vpop.f32.mrf.mxu0  ;;  %v10509_v17 = vpop.f32.mrf.mxu1  ;;  %8132 = vmatprep.subr.bf16.mxu0 %v8544_v33  ;;  %8154 = vmatprep.subr.bf16.mxu1 %v8545_v43  ;;  %v8556_v33 = vld [vmem:[%s10876_s5 + $0x670] sm:$0xff]  }
 0xe20   :  { %v5108_v48 = vmax.f32 %v4964_v32, 0.0  ;;  %v5110_v27 = vmax.f32 %v5007_v56, 0.0  ;;  %v8557_v43 = vld [vmem:[%s10876_s5 + $0x6f0] sm:$0xff]   ;;  %v8570_v32 = vld [vmem:[%s10876_s5 + $0x618] sm:$0xff]  }
 0xe21   :  { %v4967_v29 = vpop.f32.mrf.mxu0  ;;  %v5010_v40 = vpop.f32.mrf.mxu1 }
 0xe22   :  { %v4968_v18 = vadd.f32 %v4967_v29, %v4391_v60  ;;  %v5011_v13 = vadd.f32 %v5010_v40, %v4399_v47  ;;  %8133 = vmatpush3.bf16.msra.mxu0 %v8546_v10  ;;  %8155 = vmatpush3.bf16.msra.mxu1 %v8547_v59  ;;  %v8561_v60 = vld [vmem:[%s10876_s5 + $0x6e8] sm:$0xff]   ;;  %v8569_v29 = vld [vmem:[%s10876_s5 + $0x6d8] sm:$0xff]  }
 0xe23   :  { %8134 = vmatprep.subr.bf16.mxu0 %v8548_v39  ;;  %8156 = vmatprep.subr.bf16.mxu1 %v8549_v28  ;;  %v8562_v10 = vld [vmem:[%s10876_s5 + $0x628] sm:$0xff]   ;;  %v8566_v39 = vld [vmem:[%s10876_s5 + $0x620] sm:$0xff]  }
 0xe24   :  { %v5124_v9 = vmax.f32 %v4968_v18, 0.0  ;;  %v5126_v44 = vmax.f32 %v5011_v13, 0.0  ;;  %v8563_v59 = vld [vmem:[%s10876_s5 + $0x6a8] sm:$0xff]   ;;  %v8571_v13 = vld [vmem:[%s10876_s5 + $0x698] sm:$0xff]  }
 0xe26   :  { %8135 = vmatpush3.bf16.msra.mxu0 %v8550_v21  ;;  %8157 = vmatpush3.bf16.msra.mxu1 %v8551_v22  ;;  %v5140_v4 = vpack.c.bf16 %v5124_v9, %v5108_v48  ;;  %v5142_v16 = vpack.c.bf16 %v5126_v44, %v5110_v27  ;;  %v8572_v21 = vld [vmem:[%s10876_s5 + $0x650] sm:$0xff]   ;;  %v8577_v9 = vld [vmem:[%s10876_s5 + $0x6c8] sm:$0xff]   ;;  %v5009_v27 = vadd.f32 %v10509_v17, %v4395_v62 }
 0xe27   :  { %8164 = vmatprep.subr.bf16.mxu0 %v8552_v7  ;;  %8186 = vmatprep.subr.bf16.mxu1 %v8553_v0  ;;  %v8573_v22 = vld [vmem:[%s10876_s5 + $0x6d0] sm:$0xff]   ;;  %v8576_v0 = vld [vmem:[%s10876_s5 + $0x648] sm:$0xff]  }
 0xe28   :  { %v8575_v7 = vld [vmem:[%s10876_s5 + $0x690] sm:$0xff]   ;;  %v8578_v48 = vld [vmem:[%s10876_s5 + $0x608] sm:$0xff]  }
 0xe29   :  { %6287 = vmatmul.mubr.bf16.vlgmr.msra.gmra.mxu0 %v5135_v24  ;;  %6328 = vmatmul.mubr.bf16.vlgmr.msra.gmra.mxu1 %v5137_v45  ;;  %v4407_v24 = vrot.slane %v10495_v19, %v9402_v57  ;;  %v8581_v57 = vld [vmem:[%s10876_s5 + $0x6c0] sm:$0xff]  }
 0xe2a   :  { %8165 = vmatpush3.bf16.msra.mxu0 %v8554_v53  ;;  %6368 = vmatprep.mubr.bf16.mxu0 %v5140_v4  ;;  %v4966_v53 = vadd.f32 %v10507_v54, %v4387_v42  ;;  %v4962_v54 = vadd.f32 %v10478_v1, %v4387_v42  ;;  %v8584_v1 = vld [vmem:[%s10876_s5 + $0x778] sm:$0xff]   ;;  %v8595_v42 = vld [vmem:[%s10876_s5 + $0x7a8] sm:$0xff]  }
 0xe2b   :  { %8187 = vmatpush3.bf16.msra.mxu1 %v8555_v14  ;;  %6409 = vmatprep.mubr.bf16.mxu1 %v5142_v16  ;;  %v10567_v47 = vpop.f32.mrf.mxu0  ;;  %v10572_v28 = vpop.f32.mrf.mxu1  ;;  %v4415_v14 = vrot.slane %v10495_v19, %v9405_v63  ;;  %v8582_v16 = vld [vmem:[%s10876_s5 + $0x600] sm:$0xff]  }
 0xe2c   :  { %8166 = vmatprep.subr.bf16.mxu0 %v8556_v33  ;;  %8188 = vmatprep.subr.bf16.mxu1 %v8557_v43  ;;  %v5005_v33 = vadd.f32 %v10480_v15, %v4395_v62  ;;  %v5123_v17 = vmax.f32 %v4966_v53, 0.0  ;;  %v8583_v63 = vld [vmem:[%s10876_s5 + $0x680] sm:$0xff]  }
 0xe2d   :  { %v5049_v40 = vpop.f32.mrf.mxu0  ;;  %v5092_v18 = vpop.f32.mrf.mxu1  ;;  %v8596_v62 = vld [vmem:[%s10876_s5 + $0x760] sm:$0xff]  }
 0xe2e   :  { %8167 = vmatpush3.bf16.msra.mxu0 %v8558_v58  ;;  %v5050_v58 = vadd.f32 %v5049_v40, %v4407_v24  ;;  %v5093_v15 = vadd.f32 %v5092_v18, %v4415_v14  ;;  %v8599_v53 = vld [vmem:[%s10876_s5 + $0x7a0] sm:$0xff]  }
 0xe2f   :  { %8189 = vmatpush3.bf16.msra.mxu1 %v8559_v49  ;;  %8168 = vmatprep.subr.bf16.mxu0 %v8560_v41  ;;  %v10595_v2 = vpop.f32.mrf.mxu0  ;;  %v10600_v56 = vpop.f32.mrf.mxu1  ;;  %v5125_v49 = vmax.f32 %v5009_v27, 0.0  ;;  %v8585_v41 = vld [vmem:[%s10876_s5 + $0x7f8] sm:$0xff]   ;;  %v8604_v27 = vld [vmem:[%s10876_s5 + $0x750] sm:$0xff]  }
 0xe30   :  { %8190 = vmatprep.subr.bf16.mxu1 %v8561_v60  ;;  %v5107_v60 = vmax.f32 %v4962_v54, 0.0  ;;  %v5114_v40 = vmax.f32 %v5093_v15, 0.0  ;;  %v8607_v54 = vld [vmem:[%s10876_s5 + $0x790] sm:$0xff]  }
 0xe31   :  { %v5053_v44 = vpop.f32.mrf.mxu0  ;;  %v5096_v45 = vpop.f32.mrf.mxu1 }
 0xe32   :  { %8169 = vmatpush3.bf16.msra.mxu0 %v8562_v10  ;;  %v5054_v4 = vadd.f32 %v5053_v44, %v4407_v24  ;;  %v5097_v43 = vadd.f32 %v5096_v45, %v4415_v14  ;;  %v8597_v44 = vld [vmem:[%s10876_s5 + $0x7e0] sm:$0xff]   ;;  %v8600_v24 = vld [vmem:[%s10876_s5 + $0x758] sm:$0xff]   ;;  %v8605_v14 = vld [vmem:[%s10876_s5 + $0x7d0] sm:$0xff]  }
 0xe33   :  { %8191 = vmatpush3.bf16.msra.mxu1 %v8563_v59  ;;  %8170 = vmatprep.subr.bf16.mxu0 %v8564_v31  ;;  %v5109_v59 = vmax.f32 %v5005_v33, 0.0  ;;  %v8601_v45 = vld [vmem:[%s10876_s5 + $0x7d8] sm:$0xff]   ;;  %v8609_v33 = vld [vmem:[%s10876_s5 + $0x7c8] sm:$0xff]  }
 0xe34   :  { %8192 = vmatprep.subr.bf16.mxu1 %v8565_v12  ;;  %v5128_v10 = vmax.f32 %v5054_v4, 0.0  ;;  %v5130_v31 = vmax.f32 %v5097_v43, 0.0  ;;  %v8586_v12 = vld [vmem:[%s10876_s5 + $0x738] sm:$0xff]   ;;  %v8608_v4 = vld [vmem:[%s10876_s5 + $0x748] sm:$0xff]   ;;  %v4403_v43 = vrot.slane %v10495_v19, %v9464_v25  ;;  %v8612_v25 = vld [vmem:[%s10876_s5 + $0x740] sm:$0xff]  }
 0xe36   :  { %8171 = vmatpush3.bf16.msra.mxu0 %v8566_v39  ;;  %v5139_v39 = vpack.c.bf16 %v5123_v17, %v5107_v60  ;;  %v8610_v17 = vld [vmem:[%s10876_s5 + $0x708] sm:$0xff]  }
 0xe37   :  { %8193 = vmatpush3.bf16.msra.mxu1 %v8567_v34  ;;  %8172 = vmatprep.subr.bf16.mxu0 %v8568_v3  ;;  %v5112_v34 = vmax.f32 %v5050_v58, 0.0  ;;  %v8587_v3 = vld [vmem:[%s10876_s5 + $0x7b8] sm:$0xff]   ;;  %v5052_v58 = vadd.f32 %v10595_v2, %v4403_v43 }
 0xe38   :  { %8194 = vmatprep.subr.bf16.mxu1 %v8569_v29  ;;  %v5141_v29 = vpack.c.bf16 %v5125_v49, %v5109_v59  ;;  %v8614_v49 = vld [vmem:[%s10876_s5 + $0x700] sm:$0xff]  }
 0xe39   :  { %v5144_v18 = vpack.c.bf16 %v5128_v10, %v5112_v34  ;;  %v5127_v15 = vmax.f32 %v5052_v58, 0.0 }
 0xe3a   :  { %8173 = vmatpush3.bf16.msra.mxu0 %v8570_v32  ;;  %v8588_v32 = vld [vmem:[%s10876_s5 + $0x770] sm:$0xff]  }
 0xe3b   :  { %8195 = vmatpush3.bf16.msra.mxu1 %v8571_v13  ;;  %8174 = vmatprep.subr.bf16.mxu0 %v8572_v21  ;;  %v8589_v13 = vld [vmem:[%s10876_s5 + $0x7f0] sm:$0xff]   ;;  %v5146_v21 = vpack.c.bf16 %v5130_v31, %v5114_v40 }
 0xe3c   :  { %8196 = vmatprep.subr.bf16.mxu1 %v8573_v22  ;;  %v8590_v22 = vld [vmem:[%s10876_s5 + $0x730] sm:$0xff]  }
 0xe3e   :  { %8175 = vmatpush3.bf16.msra.mxu0 %v8574_v6  ;;  %v8591_v6 = vld [vmem:[%s10876_s5 + $0x7b0] sm:$0xff]  }
 0xe3f   :  { %8197 = vmatpush3.bf16.msra.mxu1 %v8575_v7  ;;  %8176 = vmatprep.subr.bf16.mxu0 %v8576_v0  ;;  %v8592_v7 = vld [vmem:[%s10876_s5 + $0x768] sm:$0xff]  }
 0xe40   :  { %8198 = vmatprep.subr.bf16.mxu1 %v8577_v9  ;;  %v8593_v0 = vld [vmem:[%s10876_s5 + $0x7e8] sm:$0xff]  }
 0xe41   :  { %v8594_v9 = vld [vmem:[%s10876_s5 + $0x728] sm:$0xff]  }
 0xe42   :  { %8177 = vmatpush3.bf16.msra.mxu0 %v8578_v48  ;;  %v8598_v48 = vld [vmem:[%s10876_s5 + $0x720] sm:$0xff]  }
 0xe43   :  { %8199 = vmatpush3.bf16.msra.mxu1 %v8579_v46  ;;  %8178 = vmatprep.subr.bf16.mxu0 %v8580_v55  ;;  %v8602_v46 = vld [vmem:[%s10876_s5 + $0x718] sm:$0xff]  }
 0xe44   :  { %8200 = vmatprep.subr.bf16.mxu1 %v8581_v57  ;;  %v8603_v55 = vld [vmem:[%s10876_s5 + $0x798] sm:$0xff]   ;;  %v8606_v57 = vld [vmem:[%s10876_s5 + $0x710] sm:$0xff]  }
 0xe46   :  { %8179 = vmatpush3.bf16.msra.mxu0 %v8582_v16  ;;  %v4411_v16 = vrot.slane %v10495_v19, %v9467_v26  ;;  %v8613_v26 = vld [vmem:[%s10876_s5 + $0x7c0] sm:$0xff]   ;;  %v5048_v19 = vadd.f32 %v10567_v47, %v4403_v43 }
 0xe47   :  { %8201 = vmatpush3.bf16.msra.mxu1 %v8583_v63  ;;  %8208 = vmatprep.subr.bf16.mxu0 %v8584_v1  ;;  %v8611_v63 = vld [vmem:[%s10876_s5 + $0x788] sm:$0xff]  }
 0xe48   :  { %8230 = vmatprep.subr.bf16.mxu1 %v8585_v41  ;;  %v5095_v1 = vadd.f32 %v10600_v56, %v4411_v16  ;;  %v5091_v2 = vadd.f32 %v10572_v28, %v4411_v16  ;;  %v8615_v56 = vld [vmem:[%s10876_s5 + $0x780] sm:$0xff]   ;;  %v5111_v60 = vmax.f32 %v5048_v19, 0.0 }
 0xe49   :  { %6369 = vmatmul.mubr.bf16.vlgmr.msra.gmra.mxu0 %v5139_v39 }
 0xe4a   :  { %6410 = vmatmul.mubr.bf16.vlgmr.msra.gmra.mxu1 %v5141_v29  ;;  %8209 = vmatpush3.bf16.msra.mxu0 %v8586_v12  ;;  %v5129_v41 = vmax.f32 %v5095_v1, 0.0  ;;  %v5113_v10 = vmax.f32 %v5091_v2, 0.0  ;;  %v5143_v47 = vpack.c.bf16 %v5127_v15, %v5111_v60 }
 0xe4b   :  { %6450 = vmatprep.mubr.bf16.mxu0 %v5144_v18  ;;  %8231 = vmatpush3.bf16.msra.mxu1 %v8587_v3 }
 0xe4c   :  { %6491 = vmatprep.mubr.bf16.mxu1 %v5146_v21  ;;  %8210 = vmatprep.subr.bf16.mxu0 %v8588_v32  ;;  %v5145_v28 = vpack.c.bf16 %v5129_v41, %v5113_v10 }
 0xe4d   :  { %8232 = vmatprep.subr.bf16.mxu1 %v8589_v13 }
 0xe4e   :  { %8211 = vmatpush3.bf16.msra.mxu0 %v8590_v22 }
 0xe4f   :  { %8233 = vmatpush3.bf16.msra.mxu1 %v8591_v6  ;;  %8212 = vmatprep.subr.bf16.mxu0 %v8592_v7 }
 0xe50   :  { %8234 = vmatprep.subr.bf16.mxu1 %v8593_v0 }
 0xe52   :  { %8213 = vmatpush3.bf16.msra.mxu0 %v8594_v9 }
 0xe53   :  { %8235 = vmatpush3.bf16.msra.mxu1 %v8595_v42  ;;  %8214 = vmatprep.subr.bf16.mxu0 %v8596_v62 }
 0xe54   :  { %8236 = vmatprep.subr.bf16.mxu1 %v8597_v44 }
 0xe56   :  { %8215 = vmatpush3.bf16.msra.mxu0 %v8598_v48 }
 0xe57   :  { %8237 = vmatpush3.bf16.msra.mxu1 %v8599_v53  ;;  %8216 = vmatprep.subr.bf16.mxu0 %v8600_v24 }
 0xe58   :  { %8238 = vmatprep.subr.bf16.mxu1 %v8601_v45 }
 0xe5a   :  { %8217 = vmatpush3.bf16.msra.mxu0 %v8602_v46 }
 0xe5b   :  { %8239 = vmatpush3.bf16.msra.mxu1 %v8603_v55  ;;  %8218 = vmatprep.subr.bf16.mxu0 %v8604_v27 }
 0xe5c   :  { %8240 = vmatprep.subr.bf16.mxu1 %v8605_v14 }
 0xe5e   :  { %8219 = vmatpush3.bf16.msra.mxu0 %v8606_v57 }
 0xe5f   :  { %8241 = vmatpush3.bf16.msra.mxu1 %v8607_v54  ;;  %8220 = vmatprep.subr.bf16.mxu0 %v8608_v4 }
 0xe60   :  { %8242 = vmatprep.subr.bf16.mxu1 %v8609_v33 }
 0xe62   :  { %8221 = vmatpush3.bf16.msra.mxu0 %v8610_v17 }
 0xe63   :  { %8243 = vmatpush3.bf16.msra.mxu1 %v8611_v63  ;;  %8222 = vmatprep.subr.bf16.mxu0 %v8612_v25 }
 0xe64   :  { %8244 = vmatprep.subr.bf16.mxu1 %v8613_v26 }
 0xe66   :  { %8223 = vmatpush3.bf16.msra.mxu0 %v8614_v49 }
 0xe67   :  { %8245 = vmatpush3.bf16.msra.mxu1 %v8615_v56  ;;  %8305 = vmatprep.subr.bf16.mxu0 %v8684_v11 }
 0xe69   :  { %6451 = vmatmul.mubr.bf16.vlgmr.msra.gmra.mxu0 %v5143_v47 }
 0xe6a   :  { %6492 = vmatmul.mubr.bf16.vlgmr.msra.gmra.mxu1 %v5145_v28  ;;  %8313 = vmatprep.mubr.msk.bf16.mxu0 %vm8685_vm1, %v8684_v11 }
 0xec9   :  { %v8092_v59 = vpop.f32.mrf.mxu0  ;;  %v8114_v31 = vpop.f32.mrf.mxu1 }
 0xecb   :  { %v8093_v12 = vpop.f32.mrf.mxu0  ;;  %v8115_v39 = vpop.f32.mrf.mxu1 }
 0xecc   :  { %v8094_v42 = vadd.f32 %v8093_v12, %v8092_v59  ;;  %v8116_v62 = vadd.f32 %v8115_v39, %v8114_v31 }
 0xecd   :  { %v8095_v34 = vpop.f32.mrf.mxu0  ;;  %v8117_v3 = vpop.f32.mrf.mxu1 }
 0xece   :  { %v6248_v24 = vadd.f32 %v8116_v62, %v8094_v42 }
 0xecf   :  { %v8096_v29 = vpop.f32.mrf.mxu0  ;;  %v8118_v32 = vpop.f32.mrf.mxu1 }
 0xed0   :  { %v8097_v45 = vadd.f32 %v8096_v29, %v8095_v34  ;;  %v8119_v46 = vadd.f32 %v8118_v32, %v8117_v3  ;;  %v7345_v34 = vld [vmem:[%s10877_s6 + $0x1] ss:$0 sm:$0xff] }
 0xed2   :  { %v6251_v54 = vadd.f32 %v8119_v46, %v8097_v45 }
 0xee9   :  { %v8136_v40 = vpop.f32.mrf.mxu0  ;;  %v8158_v18 = vpop.f32.mrf.mxu1 }
 0xeeb   :  { %v8137_v13 = vpop.f32.mrf.mxu0  ;;  %v8159_v21 = vpop.f32.mrf.mxu1 }
 0xeec   :  { %v8138_v53 = vadd.f32 %v8137_v13, %v8136_v40  ;;  %v8160_v4 = vadd.f32 %v8159_v21, %v8158_v18 }
 0xeed   :  { %v8139_v22 = vpop.f32.mrf.mxu0  ;;  %v8161_v6 = vpop.f32.mrf.mxu1 }
 0xeee   :  { %v6289_v14 = vadd.f32 %v8138_v53, %v6248_v24 }
 0xeef   :  { %v8140_v7 = vpop.f32.mrf.mxu0  ;;  %v8162_v9 = vpop.f32.mrf.mxu1 }
 0xef0   :  { %v8141_v57 = vadd.f32 %v8140_v7, %v8139_v22  ;;  %v6330_v17 = vadd.f32 %v8160_v4, %v6289_v14  ;;  %v8163_v63 = vadd.f32 %v8162_v9, %v8161_v6 }
 0xef2   :  { %v6292_v58 = vadd.f32 %v8141_v57, %v6251_v54 }
 0xef4   :  { %v6333_v2 = vadd.f32 %v8163_v63, %v6292_v58 }
 0xf09   :  { %v8180_v0 = vpop.f32.mrf.mxu0 }
 0xf0a   :  { %v8202_v44 = vpop.f32.mrf.mxu1 }
 0xf0b   :  { %v8181_v48 = vpop.f32.mrf.mxu0 }
 0xf0c   :  { %v8203_v55 = vpop.f32.mrf.mxu1  ;;  %v8182_v33 = vadd.f32 %v8181_v48, %v8180_v0 }
 0xf0d   :  { %v8183_v27 = vpop.f32.mrf.mxu0  ;;  %v8204_v49 = vadd.f32 %v8203_v55, %v8202_v44 }
 0xf0e   :  { %v8205_v43 = vpop.f32.mrf.mxu1  ;;  %v6371_v25 = vadd.f32 %v8182_v33, %v6330_v17 }
 0xf0f   :  { %v8184_v16 = vpop.f32.mrf.mxu0 }
 0xf10   :  { %v8185_v1 = vadd.f32 %v8184_v16, %v8183_v27  ;;  %v8206_v26 = vpop.f32.mrf.mxu1  ;;  %v6412_v41 = vadd.f32 %v8204_v49, %v6371_v25 }
 0xf11   :  { %v8207_v59 = vadd.f32 %v8206_v26, %v8205_v43 }
 0xf12   :  { %v6374_v60 = vadd.f32 %v8185_v1, %v6333_v2 }
 0xf14   :  { %v6415_v29 = vadd.f32 %v8207_v59, %v6374_v60 }
 0xf29   :  { %v8224_v19 = vpop.f32.mrf.mxu0 }
 0xf2a   :  { %v8246_v15 = vpop.f32.mrf.mxu1 }
 0xf2b   :  { %v8225_v56 = vpop.f32.mrf.mxu0 }
 0xf2c   :  { %v8226_v10 = vadd.f32 %v8225_v56, %v8224_v19  ;;  %v8247_v47 = vpop.f32.mrf.mxu1 }
 0xf2d   :  { %v8227_v28 = vpop.f32.mrf.mxu0  ;;  %v8248_v12 = vadd.f32 %v8247_v47, %v8246_v15 }
 0xf2e   :  { %v6453_v31 = vadd.f32 %v8226_v10, %v6412_v41  ;;  %v8249_v39 = vpop.f32.mrf.mxu1 }
 0xf2f   :  { %v8228_v3 = vpop.f32.mrf.mxu0 }
 0xf30   :  { %v6494_v40 = vadd.f32 %v8248_v12, %v6453_v31  ;;  %v8229_v32 = vadd.f32 %v8228_v3, %v8227_v28  ;;  %v8250_v18 = vpop.f32.mrf.mxu1 }
 0xf31   :  { %v8251_v22 = vadd.f32 %v8250_v18, %v8249_v39 }
 0xf32   :  { %v6500_v13 = vadd.f32 %v7345_v34, %v6494_v40  ;;  %v6456_v21 = vadd.f32 %v8229_v32, %v6415_v29 }
 0xf34   :  { %v6504_v6 = vcombine.high %v6500_v13, %v6500_v13  ;;  %v6511_v7 = vrot.slane %v6500_v13, %v8805_v20  ;;  %v6497_v0 = vadd.f32 %v8251_v22, %v6456_v21 }
 0xf36   :  { %v6518_v9 = vrot.slane %v6504_v6, %v8805_v20  ;;  %v6519_v42 = vcombine.high %v6511_v7, %v6511_v7  ;;  %v6501_v62 = vadd.f32 %v7345_v34, %v6497_v0  ;;  %v6546_v44 = vadd.f32 %v6511_v7, %v10099_v50 }
 0xf38   :  { %v6521_v48 = vcombine.high %v6501_v62, %v6501_v62  ;;  %v6528_v53 = vrot.slane %v6501_v62, %v8805_v20  ;;  %v6520_v24 = vcombine.high %v6518_v9, %v6518_v9  ;;  %v6547_v45 = vadd.f32 %v6519_v42, %v10101_v52 }
 0xf39   :  { %v6548_v46 = vadd.f32 %v6518_v9, %v10103_v61 }
 0xf3a   :  { %v6535_v55 = vrot.slane %v6521_v48, %v8805_v20  ;;  %v6536_v27 = vcombine.high %v6528_v53, %v6528_v53  ;;  %v6549_v14 = vadd.f32 %v6520_v24, %v10105_v51  ;;  %v6566_v57 = vcombine.low %v6546_v44, %v6547_v45 }
 0xf3b   :  { %v6550_v33 = vadd.f32 %v6528_v53, %v10111_v23 }
 0xf3c   :  { %v6567_v54 = vcombine.low %v6548_v46, %v6549_v14  ;;  %v6537_v4 = vcombine.high %v6535_v55, %v6535_v55  ;;  %v6551_v50 = vadd.f32 %v6536_v27, %v10113_v8  ;;  %v6574_v43 = vrot.slane %v6566_v57, %v8805_v20  ;;  %v8617_v57 = vld [vmem:[%s10882_s11 + $0x10] sm:$0xff]  }
 0xf3d   :  { %v6552_v52 = vadd.f32 %v6535_v55, %v10115_v30 }
 0xf3e   :  { %v6581_v16 = vrot.slane %v6567_v54, %v8805_v20  ;;  %v6553_v61 = vadd.f32 %v6537_v4, %v10117_v5  ;;  %v6583_v17 = vcombine.low %v6550_v33, %v6551_v50  ;;  %v8618_v54 = vld [vmem:[%s10882_s11 + $0x8] sm:$0xff]   ;;  %v8619_v4 = vld [vmem:[%s10882_s11] sm:$0xff]  }
 0xf40   :  { %v6582_v58 = vcombine.low %v6574_v43, %v6581_v16  ;;  %v6584_v63 = vcombine.low %v6552_v52, %v6553_v61  ;;  %v6591_v25 = vrot.slane %v6583_v17, %v8805_v20  ;;  %v7870_v17 = vld [vmem:[%s10880_s9 + $0x1] ss:$0 sm:$0xff] }
 0xf42   :  { %v6602_v51 = vsel %vm239_vm0, %v6582_v58, 0.0  ;;  %v6598_v1 = vrot.slane %v6584_v63, %v8805_v20  ;;  %v7871_v58 = vld [vmem:[%s10881_s10 + $0x1] ss:$0 sm:$0xff]  ;;  %v6827_v63 = vcombine.high %v7870_v17, %v7870_v17 }
 0xf43   :  { %6603 = vadd.xlane.f32.xlu0 %v6602_v51  ;;  %v6861_v51 = vcombine.high %v7871_v58, %v7871_v58 }
 0xf44   :  { %v6599_v23 = vcombine.low %v6591_v25, %v6598_v1  ;;  %v6841_v25 = vrot.slane %v6827_v63, %v8805_v20  ;;  %v6868_v1 = vrot.slane %v7871_v58, %v8805_v20 }
 0xf46   :  { %v6605_v8 = vsel %vm239_vm0, %v6599_v23, 0.0  ;;  %v6875_v23 = vrot.slane %v6861_v51, %v8805_v20 }
 0xf47   :  { %6606 = vadd.xlane.f32.xlu1 %v6605_v8 }
 0xfcc   :  { %v6604_v26 = vpop.xlane.xlu0 %6603 }
 0xfcd   :  { %v6608_v19 = vmul.f32 0.015625, %v6604_v26 }
 0xfcf   :  { %v6618_v30 = vrot.slane %v6608_v19, %v8922_v35  ;;  %v6625_v5 = vrot.slane %v6608_v19, %v8925_v36  ;;  %v6632_v2 = vrot.slane %v6608_v19, %v8928_v37  ;;  %v6639_v49 = vrot.slane %v6608_v19, %v8931_v38 }
 0xfd0   :  { %v6607_v15 = vpop.xlane.xlu1 %6606  ;;  %v6843_v19 = vcombine.high %v6841_v25, %v6841_v25 }
 0xfd1   :  { %v6609_v56 = vmul.f32 0.015625, %v6607_v15  ;;  %v10773_v41 = vsub.f32 %v6546_v44, %v6618_v30  ;;  %v10775_v60 = vsub.f32 %v6547_v45, %v6625_v5  ;;  %v10777_v10 = vsub.f32 %v6548_v46, %v6632_v2 }
 0xfd2   :  { %v10779_v47 = vsub.f32 %v6549_v14, %v6639_v49  ;;  %v8616_v14 = vld [vmem:[%s10882_s11 + $0x18] sm:$0xff]   ;;  %v6876_v15 = vcombine.high %v6868_v1, %v6868_v1  ;;  %s8690_s11 = smov [#allocation2]  }
 0xfd3   :  { %v6646_v28 = vrot.slane %v6609_v56, %v8922_v35  ;;  %v6653_v59 = vrot.slane %v6609_v56, %v8925_v36  ;;  %v6660_v31 = vrot.slane %v6609_v56, %v8928_v37  ;;  %v6667_v12 = vrot.slane %v6609_v56, %v8931_v38  ;;  %8306 = vmatpush3.bf16.msra.mxu0 %v8616_v14 }
 0xfd4   :  { %v6684_v39 = vmul.f32 %v10773_v41, %v10773_v41  ;;  %v6685_v34 = vmul.f32 %v10775_v60, %v10775_v60  ;;  %v6686_v3 = vmul.f32 %v10777_v10, %v10777_v10  ;;  %v6687_v29 = vmul.f32 %v10779_v47, %v10779_v47  ;;  %8307 = vmatprep.subr.bf16.mxu0 %v8684_v11 }
 0xfd5   :  { %v10793_v40 = vsub.f32 %v6550_v33, %v6646_v28  ;;  %v10795_v32 = vsub.f32 %v6551_v50, %v6653_v59  ;;  %v10797_v18 = vsub.f32 %v6552_v52, %v6660_v31  ;;  %v10799_v13 = vsub.f32 %v6553_v61, %v6667_v12 }
 0xfd6   :  { %v6700_v21 = vcombine.low %v6684_v39, %v6685_v34  ;;  %v6701_v22 = vcombine.low %v6686_v3, %v6687_v29  ;;  %v6877_v56 = vcombine.high %v6875_v23, %v6875_v23 }
 0xfd7   :  { %v6688_v6 = vmul.f32 %v10793_v40, %v10793_v40  ;;  %v6689_v7 = vmul.f32 %v10795_v32, %v10795_v32  ;;  %v6690_v0 = vmul.f32 %v10797_v18, %v10797_v18  ;;  %v6691_v9 = vmul.f32 %v10799_v13, %v10799_v13  ;;  %8308 = vmatpush3.bf16.msra.mxu0 %v8617_v57 }
 0xfd8   :  { %v6708_v42 = vrot.slane %v6700_v21, %v8805_v20  ;;  %v6715_v62 = vrot.slane %v6701_v22, %v8805_v20  ;;  %8309 = vmatprep.subr.bf16.mxu0 %v8684_v11 }
 0xfd9   :  { %v6717_v44 = vcombine.low %v6688_v6, %v6689_v7  ;;  %v6718_v48 = vcombine.low %v6690_v0, %v6691_v9 }
 0xfda   :  { %v6716_v53 = vcombine.low %v6708_v42, %v6715_v62 }
 0xfdb   :  { %v6725_v24 = vrot.slane %v6717_v44, %v8805_v20  ;;  %v6732_v45 = vrot.slane %v6718_v48, %v8805_v20  ;;  %8310 = vmatpush3.bf16.msra.mxu0 %v8618_v54 }
 0xfdc   :  { %v6736_v46 = vsel %vm239_vm0, %v6716_v53, 0.0  ;;  %8311 = vmatprep.subr.bf16.mxu0 %v8684_v11  ;;  %v6834_v11 = vrot.slane %v7870_v17, %v8805_v20 }
 0xfdd   :  { %6737 = vadd.xlane.f32.xlu0 %v6736_v46  ;;  %v6733_v55 = vcombine.low %v6725_v24, %v6732_v45 }
 0xfde   :  { %v6842_v26 = vcombine.high %v6834_v11, %v6834_v11 }
 0xfdf   :  { %v6739_v27 = vsel %vm239_vm0, %v6733_v55, 0.0  ;;  %8312 = vmatpush3.bf16.msra.mxu0 %v8619_v4 }
 0xfe0   :  { %6740 = vadd.xlane.f32.xlu1 %v6739_v27 }
0x1066   :  { %v6738_v33 = vpop.xlane.xlu0 %6737 }
0x1067   :  { %v6742_v50 = vmul.f32 0.015625, %v6738_v33  ;;  %v7872_v33 = vld [vmem:[%s10883_s12] ss:$0 sm:$0xff]  ;;  %s7075_s12 = sshll.u32 %s8690_s11, 4  ;;  %s7076_s12 = int_to_ptr.vmem [resolvable:$true] %s7075_s12 }
0x1068   :  { %s8660_s17 = scalar_lea.vmem %s7076_s12, 256  ;;  %p8665_p1 = scmp.lt.s32.totalorder %s7076_s12, %s7076_s12 }
0x1069   :  { %v6744_v43 = vadd.f32 1e-05, %v6742_v50  ;;  %v6741_v16 = vpop.xlane.xlu1 %6740  ;;  %p8661_p0 = scmp.ne.s32.totalorder %s7076_s12, %s8660_s17  ;;  %p8666_p2 = scmp.lt.s32.totalorder %s8660_s17, %s8660_s17 }
0x106a   :  { %v6743_v52 = vmul.f32 0.015625, %v6741_v16 }
0x106b   :  { %8648 = vrsqrt.f32 %v6744_v43  ;;  %p8667_p3 = por %p8666_p2, %p8665_p1 }
0x106c   :  { %v6745_v61 = vadd.f32 1e-05, %v6743_v52 }
0x106d   :  { %p8668_p4 = pnand %p8667_p3, %p8661_p0 }
0x106e   :  { %8650 = vrsqrt.f32 %v6745_v61 }
0x1078   :  { %v8649_v8 = vpop.eup %8648 }
0x1079   :  { %v6756_v30 = vrot.slane %v8649_v8, %v8922_v35  ;;  %v6763_v5 = vrot.slane %v8649_v8, %v8925_v36  ;;  %v6770_v2 = vrot.slane %v8649_v8, %v8928_v37  ;;  %v6777_v49 = vrot.slane %v8649_v8, %v8931_v38 }
0x107b   :  { %v8651_v28 = vpop.eup %8650  ;;  %v6814_v59 = vmul.f32 %v6756_v30, %v10773_v41  ;;  %v6815_v31 = vmul.f32 %v6763_v5, %v10775_v60  ;;  %v6816_v12 = vmul.f32 %v6770_v2, %v10777_v10  ;;  %v6817_v39 = vmul.f32 %v6777_v49, %v10779_v47 }
0x107c   :  { %v6784_v34 = vrot.slane %v8651_v28, %v8922_v35  ;;  %v6791_v3 = vrot.slane %v8651_v28, %v8925_v36  ;;  %v6798_v29 = vrot.slane %v8651_v28, %v8928_v37  ;;  %v6805_v21 = vrot.slane %v8651_v28, %v8931_v38 }
0x107d   :  { %v6848_v22 = vmul.f32 %v6834_v11, %v6814_v59  ;;  %v6849_v6 = vmul.f32 %v6842_v26, %v6815_v31  ;;  %v6850_v7 = vmul.f32 %v6841_v25, %v6816_v12  ;;  %v6851_v0 = vmul.f32 %v6843_v19, %v6817_v39 }
0x107e   :  { %v6818_v41 = vmul.f32 %v6784_v34, %v10793_v40  ;;  %v6819_v60 = vmul.f32 %v6791_v3, %v10795_v32  ;;  %v6820_v10 = vmul.f32 %v6798_v29, %v10797_v18  ;;  %v6821_v47 = vmul.f32 %v6805_v21, %v10799_v13 }
0x107f   :  { %v6882_v9 = vadd.f32 %v6868_v1, %v6848_v22  ;;  %v6883_v35 = vadd.f32 %v6876_v15, %v6849_v6  ;;  %v6884_v42 = vadd.f32 %v6875_v23, %v6850_v7  ;;  %v6885_v36 = vadd.f32 %v6877_v56, %v6851_v0 }
0x1080   :  { %v6852_v62 = vmul.f32 %v6834_v11, %v6818_v41  ;;  %v6853_v37 = vmul.f32 %v6842_v26, %v6819_v60  ;;  %v6854_v44 = vmul.f32 %v6841_v25, %v6820_v10  ;;  %v6855_v38 = vmul.f32 %v6843_v19, %v6821_v47 }
0x1081   :  { %v6898_v48 = vcombine.low %v6882_v9, %v6883_v35  ;;  %v6899_v53 = vcombine.low %v6884_v42, %v6885_v36 }
0x1082   :  { %v6886_v24 = vadd.f32 %v6868_v1, %v6852_v62  ;;  %v6887_v45 = vadd.f32 %v6876_v15, %v6853_v37  ;;  %v6888_v46 = vadd.f32 %v6875_v23, %v6854_v44  ;;  %v6889_v40 = vadd.f32 %v6877_v56, %v6855_v38 }
0x1083   :  { %v6906_v32 = vrot.slane %v6898_v48, %v8805_v20  ;;  %v6913_v18 = vrot.slane %v6899_v53, %v8805_v20 }
0x1084   :  { %v6915_v55 = vcombine.low %v6886_v24, %v6887_v45  ;;  %v6916_v13 = vcombine.low %v6888_v46, %v6889_v40 }
0x1085   :  { %v6914_v57 = vcombine.low %v6906_v32, %v6913_v18 }
0x1086   :  { %v6923_v27 = vrot.slane %v6915_v55, %v8805_v20  ;;  %v6930_v14 = vrot.slane %v6916_v13, %v8805_v20 }
0x1088   :  { %v6931_v54 = vcombine.low %v6923_v27, %v6930_v14 }
0x108a   :  { %v6934_v4 = vpack.c.bf16 %v6931_v54, %v6914_v57 }
0x108c   :  { %8314 = vmatmul.mubr.msk.bf16.vlgmr.msra.gmra.mxu0 %vm239_vm0, %v6934_v4 }
0x114c   :  { %v7011_v50 = vpop.f32.mrf.mxu0 }
0x114d   :  { %v7012_v43 = vadd.f32 %v7872_v33, %v7011_v50 }
0x114e   :  { %v8315_v16 = vpop.f32.mrf.mxu0 }
0x114f   :  { %v7020_v52 = vcombine.high %v7012_v43, %v7012_v43  ;;  %v7027_v61 = vrot.slane %v7012_v43, %v8805_v20  ;;  %7878 = vst.sshfl [vmem:[#allocation2] sm:$0x3 pattern:$0x76325410] %v7012_v43 }
0x1150   :  { %v7014_v17 = vpop.f32.mrf.mxu0 }
0x1151   :  { %v7034_v58 = vrot.slane %v7020_v52, %v8805_v20  ;;  %v7035_v63 = vcombine.high %v7027_v61, %v7027_v61  ;;  %7879 = vst.sshfl [vmem:[#allocation2 + $0x4] sm:$0x3 pattern:$0x76325410] %v7020_v52  ;;  %v7015_v51 = vadd.f32 %v7872_v33, %v7014_v17 }
0x1152   :  { %v8316_v11 = vpop.f32.mrf.mxu0 }
0x1153   :  { %v7036_v25 = vcombine.high %v7034_v58, %v7034_v58  ;;  %7063 = vst [vmem:[#allocation2 + $0x2] sm:$0x3] %v7035_v63  ;;  %v7037_v1 = vcombine.high %v7015_v51, %v7015_v51  ;;  %v7044_v23 = vrot.slane %v7015_v51, %v8805_v20  ;;  %7880 = vst.sshfl [vmem:[#allocation2 + $0x8] sm:$0x3 pattern:$0x76325410] %v7015_v51 }
0x1155   :  { %7065 = vst [vmem:[#allocation2 + $0x6] sm:$0x3] %v7036_v25  ;;  %v7051_v8 = vrot.slane %v7037_v1, %v8805_v20  ;;  %v7052_v26 = vcombine.high %v7044_v23, %v7044_v23  ;;  %7881 = vst.sshfl [vmem:[#allocation2 + $0xc] sm:$0x3 pattern:$0x76325410] %v7037_v1 }
0x1157   :  { %v7053_v19 = vcombine.high %v7051_v8, %v7051_v8  ;;  %7067 = vst [vmem:[#allocation2 + $0xa] sm:$0x3] %v7052_v26 }
0x1159   :  { %7069 = vst [vmem:[#allocation2 + $0xe] sm:$0x3] %v7053_v19 }
0x115a   :  { %8671 = shalt.err (!%p8668_p4)
}
0x115b   :  { %s8691_s18 = smov 32   ;;  %s8692_s19 = smov 2  }
0x115c   :  { %7081 = dma.vmem_to_hbm [thread:$0]  %s7076_s12, 256, %s10884_s13, [#allocation3], %s8691_s18, %s8691_s18, %s8692_s19  }
0x115d   :  { %8680 = dma.done.wait [#allocation3], 256  }
0x115e   :  { %8681 = vsyncadd [#allocation3], 4294967040 }
0x115f   :  { %7085 = vsyncpa [#allocation3], 1 }

</bundles_post_ra>
